<compile_context>
chip_gen: v6e
topology: v6e:2x2x1
jax: 0.10.0
libtpu: 0.0.40
codegen_flags: <defaults>
</compile_context>

<pallas_src>
import functools

import jax
import jax.numpy as jnp
import numpy as np
from jax import lax
from jax.experimental import pallas as pl
from jax.experimental.pallas import tpu as pltpu

_EPS = 1e-8
_VMEM_LIMIT_BYTES = 48 * 1024 * 1024    # fits v5e/v6e (128 MiB) and v7x (64 MiB) with headroom
_WORK_BUDGET_BYTES = 36 * 1024 * 1024   # target per-grid-step footprint


def _make_seqnorm_kernel(dims, use_var, C, H, W, btile):
    """Kernel specialized for (dims, var) and the static shapes."""
    for d in dims:
        if d not in (1, 2, 3):
            raise NotImplementedError(f"SeqNorm dim {d} not supported")

    need_h = 2 in dims
    need_w = 3 in dims
    HW = H * W
    BC = btile * C
    hi = lax.Precision.HIGHEST  # keep f32 accuracy through the MXU reduce/broadcast matmuls

    def _dot(a, b):
        return jnp.dot(a, b, precision=hi, preferred_element_type=jnp.float32)

    def kernel(*refs):
        i = 0
        x_ref = refs[i]; i += 1
        if need_h:
            rh_ref, rht_ref = refs[i], refs[i + 1]; i += 2
        if need_w:
            rw_ref, rwt_ref = refs[i], refs[i + 1]; i += 2
        o_ref = refs[i]

        # x block: (btile, C, HW) with lane axis hw = h*W + w.  All stats come
        # from this ORIGINAL block; `out` carries the sequential updates.
        x3 = x_ref[...].astype(jnp.float32)          # (btile, C, HW)
        x2 = x3.reshape(BC, HW)                      # free merge (btile==1 or C%8==0)
        out = x2

        for d in dims:
            if d == 1:
                # Channel stats: per-sample sublane reduce on the XLU.
                mean = jnp.sum(x3, axis=1, keepdims=True) * (1.0 / C)     # (btile, 1, HW)
                out3 = out.reshape(btile, C, HW) - mean
                if use_var:
                    diff = x3 - mean                                       # two-pass variance
                    inv_nm1 = (1.0 / (C - 1)) if C > 1 else float("nan")
                    var = jnp.sum(diff * diff, axis=1, keepdims=True) * inv_nm1
                    out3 = out3 * lax.rsqrt(var + _EPS)                    # EUP + broadcast mul
                out = out3.reshape(BC, HW)
            else:
                # Reduce over H (d=2, stride-W lane groups) or W (d=3, contiguous
                # lane groups) via constant 0/1 reduce / broadcast matrices on the MXU.
                if d == 2:
                    R, RT, n = rh_ref[...], rht_ref[...], H
                else:
                    R, RT, n = rw_ref[...], rwt_ref[...], W
                mean = _dot(x2, R) * (1.0 / n)        # (BC, k) per-group means
                mean_b = _dot(mean, RT)               # (BC, HW) broadcast back to lanes
                out = out - mean_b
                if use_var:
                    diff = x2 - mean_b                # stats from ORIGINAL x, two-pass
                    inv_nm1 = (1.0 / (n - 1)) if n > 1 else float("nan")
                    var = _dot(diff * diff, R) * inv_nm1                  # (BC, k)
                    rstd = lax.rsqrt(var + _EPS)                          # EUP, tiny array
                    out = out * _dot(rstd, RT)                            # broadcast multiply

        o_ref[...] = out.reshape(btile, C, HW).astype(o_ref.dtype)

    return kernel


def _choose_btile(B, C, per_sample_bytes):
    """Largest divisor of B that fits the VMEM budget and keeps >= 2 grid steps."""
    if C % 8 != 0:
        return 1  # keep the (btile, C) -> (btile*C) sublane merge a free relayout
    btile = 1
    for bt in range(1, B + 1):
        if B % bt:
            continue
        if bt * per_sample_bytes > _WORK_BUDGET_BYTES:
            continue
        if B >= 2 and B // bt < 2:
            continue  # keep at least 2 parallel grid steps (v7x has 2 TensorCores)
        btile = bt
    return btile


@functools.partial(jax.jit, static_argnames=("dims", "use_var"))
def seq_norm(x, dims=(1, 2, 3), use_var=False):
    B, C, H, W = x.shape
    HW = H * W
    for d in dims:
        if d not in (1, 2, 3):
            raise NotImplementedError(f"SeqNorm dim {d} not supported")
    need_h = 2 in dims
    need_w = 3 in dims

    # Lane-dense layout: [B, C, H, W] -> [B, C, H*W] (free, row-major).
    x3 = x.reshape(B, C, HW)

    itemsize = jnp.dtype(x.dtype).itemsize
    # 2x double-buffered input + 2x output tiles (I/O dtype) + ~10 f32 working slabs.
    per_sample_bytes = C * HW * (4 * itemsize + 10 * 4)
    btile = _choose_btile(B, C, per_sample_bytes)
    # TODO(synk): if a single sample's slab exceeds the VMEM budget (very large C*H*W),
    # switch to a two-pass (stats grid, then apply grid) structure instead of a resident slab.

    kernel = _make_seqnorm_kernel(dims, use_var, C, H, W, btile)

    # Constant 0/1 reduce / broadcast matrices for the packed lane axis hw = h*W + w.
    hw_idx = np.arange(HW)
    operands = [x3]
    in_specs = [pl.BlockSpec((btile, C, HW), lambda i: (i, 0, 0))]
    if need_h:
        red_h = (hw_idx[:, None] % W == np.arange(W)[None, :]).astype(np.float32)   # (HW, W)
        operands += [jnp.asarray(red_h), jnp.asarray(np.ascontiguousarray(red_h.T))]
        in_specs += [pl.BlockSpec((HW, W), lambda i: (0, 0)),
                     pl.BlockSpec((W, HW), lambda i: (0, 0))]
    if need_w:
        red_w = (hw_idx[:, None] // W == np.arange(H)[None, :]).astype(np.float32)  # (HW, H)
        operands += [jnp.asarray(red_w), jnp.asarray(np.ascontiguousarray(red_w.T))]
        in_specs += [pl.BlockSpec((HW, H), lambda i: (0, 0)),
                     pl.BlockSpec((H, HW), lambda i: (0, 0))]

    out3 = pl.pallas_call(
        kernel,
        out_shape=jax.ShapeDtypeStruct((B, C, HW), x.dtype),
        grid_spec=pl.GridSpec(
            grid=(B // btile,),
            in_specs=in_specs,
            out_specs=pl.BlockSpec((btile, C, HW), lambda i: (i, 0, 0)),
        ),
        compiler_params=pltpu.CompilerParams(
            dimension_semantics=("parallel",),
            vmem_limit_bytes=_VMEM_LIMIT_BYTES,
        ),
    )(*operands)

    return out3.reshape(B, C, H, W)


def seq_norm_ref(x, dims=(1, 2, 3), use_var=False):
    """Pure-JAX reference mirroring the PyTorch forward (unbiased torch.var)."""
    x = x.astype(jnp.float32)
    out = x
    for d in dims:
        mean = jnp.mean(x, axis=d, keepdims=True)
        out = out - mean
        if use_var:
            n = x.shape[d]
            v = jnp.sum((x - mean) ** 2, axis=d, keepdims=True) / (n - 1)
            out = out / jnp.sqrt(v + 1e-8)
    return out


if __name__ == "__main__":
    # SeqNorm has no learnable parameters; only (dims, var) config.
    dims = (1, 2, 3)      # normalize over channel, then H, then W (sequential)
    use_var = True

    key = jax.random.PRNGKey(0)
    x = jax.random.normal(key, (2, 4, 16, 16), dtype=jnp.float32)

    out = seq_norm(x, dims=dims, use_var=use_var)
    out = jax.block_until_ready(out)

    ref = seq_norm_ref(x, dims=dims, use_var=use_var)
    np.testing.assert_allclose(np.asarray(out), np.asarray(ref), rtol=1e-4, atol=1e-5)

    print("KERNEL_OK")
</pallas_src>

<mosaic_0001>
module attributes {stable_mosaic.version = 11 : i64} {
  func.func @kernel(%arg0: i32, %arg1: memref<1x4x256xf32, #tpu.memory_space<vmem>>, %arg2: memref<256x16xf32, #tpu.memory_space<vmem>>, %arg3: memref<16x256xf32, #tpu.memory_space<vmem>>, %arg4: memref<256x16xf32, #tpu.memory_space<vmem>>, %arg5: memref<16x256xf32, #tpu.memory_space<vmem>>, %arg6: memref<1x4x256xf32, #tpu.memory_space<vmem>>) attributes {dimension_semantics = [#tpu.dimension_semantics<parallel>], iteration_bounds = array<i64: 2>, scalar_prefetch = 0 : i64, scratch_operands = 0 : i64, tpu.core_type = #tpu.core_type<tc>, window_params = [{transform_indices = @transform_0, window_bounds = array<i64: 1, 4, 256>}, {pipeline_mode = #tpu.pipeline_mode<synchronous>, transform_indices = @transform_1, window_bounds = array<i64: 256, 16>}, {pipeline_mode = #tpu.pipeline_mode<synchronous>, transform_indices = @transform_2, window_bounds = array<i64: 16, 256>}, {pipeline_mode = #tpu.pipeline_mode<synchronous>, transform_indices = @transform_3, window_bounds = array<i64: 256, 16>}, {pipeline_mode = #tpu.pipeline_mode<synchronous>, transform_indices = @transform_4, window_bounds = array<i64: 16, 256>}, {transform_indices = @transform_5, window_bounds = array<i64: 1, 4, 256>}]} {
    %c0 = arith.constant 0 : index
    %c0_0 = arith.constant 0 : index
    %c0_1 = arith.constant 0 : index
    %0 = vector.load %arg1[%c0, %c0_0, %c0_1] : memref<1x4x256xf32, #tpu.memory_space<vmem>>, vector<1x4x256xf32>
    %1 = vector.shape_cast %0 : vector<1x4x256xf32> to vector<4x256xf32>
    %cst = arith.constant dense<0.000000e+00> : vector<1x256xf32>
    %2 = vector.multi_reduction <add>, %0, %cst [1] : vector<1x4x256xf32> to vector<1x256xf32>
    %3 = vector.shape_cast %2 : vector<1x256xf32> to vector<1x1x256xf32>
    %cst_2 = arith.constant 2.500000e-01 : f32
    %4 = vector.broadcast %cst_2 : f32 to vector<1x1x256xf32>
    %5 = arith.mulf %3, %4 : vector<1x1x256xf32>
    %6 = vector.shape_cast %1 : vector<4x256xf32> to vector<1x4x256xf32>
    %7 = vector.broadcast %5 : vector<1x1x256xf32> to vector<1x4x256xf32>
    %8 = arith.subf %6, %7 : vector<1x4x256xf32>
    %9 = vector.broadcast %5 : vector<1x1x256xf32> to vector<1x4x256xf32>
    %10 = arith.subf %0, %9 : vector<1x4x256xf32>
    %11 = arith.mulf %10, %10 : vector<1x4x256xf32>
    %cst_3 = arith.constant dense<0.000000e+00> : vector<1x256xf32>
    %12 = vector.multi_reduction <add>, %11, %cst_3 [1] : vector<1x4x256xf32> to vector<1x256xf32>
    %13 = vector.shape_cast %12 : vector<1x256xf32> to vector<1x1x256xf32>
    %cst_4 = arith.constant 0.333333343 : f32
    %14 = vector.broadcast %cst_4 : f32 to vector<1x1x256xf32>
    %15 = arith.mulf %13, %14 : vector<1x1x256xf32>
    %cst_5 = arith.constant 9.99999993E-9 : f32
    %16 = vector.broadcast %cst_5 : f32 to vector<1x1x256xf32>
    %17 = arith.addf %15, %16 : vector<1x1x256xf32>
    %18 = math.rsqrt %17 : vector<1x1x256xf32>
    %19 = vector.broadcast %18 : vector<1x1x256xf32> to vector<1x4x256xf32>
    %20 = arith.mulf %8, %19 : vector<1x4x256xf32>
    %21 = vector.shape_cast %20 : vector<1x4x256xf32> to vector<4x256xf32>
    %c0_6 = arith.constant 0 : index
    %c0_7 = arith.constant 0 : index
    %22 = vector.load %arg2[%c0_6, %c0_7] : memref<256x16xf32, #tpu.memory_space<vmem>>, vector<256x16xf32>
    %c0_8 = arith.constant 0 : index
    %c0_9 = arith.constant 0 : index
    %23 = vector.load %arg3[%c0_8, %c0_9] : memref<16x256xf32, #tpu.memory_space<vmem>>, vector<16x256xf32>
    %cst_10 = arith.constant dense<0.000000e+00> : vector<4x16xf32>
    %24 = tpu.matmul %1, %22, %cst_10 {dimension_numbers = #tpu.dot_dimension_numbers<[1], [0], [0], [1], [0, 0, 1, 1], [], []>, precision = #tpu.contract_precision<fp32>} : vector<4x256xf32>, vector<256x16xf32>, vector<4x16xf32> -> vector<4x16xf32>
    %cst_11 = arith.constant 6.250000e-02 : f32
    %25 = vector.broadcast %cst_11 : f32 to vector<4x16xf32>
    %26 = arith.mulf %24, %25 : vector<4x16xf32>
    %cst_12 = arith.constant dense<0.000000e+00> : vector<4x256xf32>
    %27 = tpu.matmul %26, %23, %cst_12 {dimension_numbers = #tpu.dot_dimension_numbers<[1], [0], [0], [1], [0, 0, 1, 1], [], []>, precision = #tpu.contract_precision<fp32>} : vector<4x16xf32>, vector<16x256xf32>, vector<4x256xf32> -> vector<4x256xf32>
    %28 = arith.subf %21, %27 : vector<4x256xf32>
    %29 = arith.subf %1, %27 : vector<4x256xf32>
    %30 = arith.mulf %29, %29 : vector<4x256xf32>
    %cst_13 = arith.constant dense<0.000000e+00> : vector<4x16xf32>
    %31 = tpu.matmul %30, %22, %cst_13 {dimension_numbers = #tpu.dot_dimension_numbers<[1], [0], [0], [1], [0, 0, 1, 1], [], []>, precision = #tpu.contract_precision<fp32>} : vector<4x256xf32>, vector<256x16xf32>, vector<4x16xf32> -> vector<4x16xf32>
    %cst_14 = arith.constant 0.0666666701 : f32
    %32 = vector.broadcast %cst_14 : f32 to vector<4x16xf32>
    %33 = arith.mulf %31, %32 : vector<4x16xf32>
    %cst_15 = arith.constant 9.99999993E-9 : f32
    %34 = vector.broadcast %cst_15 : f32 to vector<4x16xf32>
    %35 = arith.addf %33, %34 : vector<4x16xf32>
    %36 = math.rsqrt %35 : vector<4x16xf32>
    %cst_16 = arith.constant dense<0.000000e+00> : vector<4x256xf32>
    %37 = tpu.matmul %36, %23, %cst_16 {dimension_numbers = #tpu.dot_dimension_numbers<[1], [0], [0], [1], [0, 0, 1, 1], [], []>, precision = #tpu.contract_precision<fp32>} : vector<4x16xf32>, vector<16x256xf32>, vector<4x256xf32> -> vector<4x256xf32>
    %38 = arith.mulf %28, %37 : vector<4x256xf32>
    %c0_17 = arith.constant 0 : index
    %c0_18 = arith.constant 0 : index
    %39 = vector.load %arg4[%c0_17, %c0_18] : memref<256x16xf32, #tpu.memory_space<vmem>>, vector<256x16xf32>
    %c0_19 = arith.constant 0 : index
    %c0_20 = arith.constant 0 : index
    %40 = vector.load %arg5[%c0_19, %c0_20] : memref<16x256xf32, #tpu.memory_space<vmem>>, vector<16x256xf32>
    %cst_21 = arith.constant dense<0.000000e+00> : vector<4x16xf32>
    %41 = tpu.matmul %1, %39, %cst_21 {dimension_numbers = #tpu.dot_dimension_numbers<[1], [0], [0], [1], [0, 0, 1, 1], [], []>, precision = #tpu.contract_precision<fp32>} : vector<4x256xf32>, vector<256x16xf32>, vector<4x16xf32> -> vector<4x16xf32>
    %cst_22 = arith.constant 6.250000e-02 : f32
    %42 = vector.broadcast %cst_22 : f32 to vector<4x16xf32>
    %43 = arith.mulf %41, %42 : vector<4x16xf32>
    %cst_23 = arith.constant dense<0.000000e+00> : vector<4x256xf32>
    %44 = tpu.matmul %43, %40, %cst_23 {dimension_numbers = #tpu.dot_dimension_numbers<[1], [0], [0], [1], [0, 0, 1, 1], [], []>, precision = #tpu.contract_precision<fp32>} : vector<4x16xf32>, vector<16x256xf32>, vector<4x256xf32> -> vector<4x256xf32>
    %45 = arith.subf %38, %44 : vector<4x256xf32>
    %46 = arith.subf %1, %44 : vector<4x256xf32>
    %47 = arith.mulf %46, %46 : vector<4x256xf32>
    %cst_24 = arith.constant dense<0.000000e+00> : vector<4x16xf32>
    %48 = tpu.matmul %47, %39, %cst_24 {dimension_numbers = #tpu.dot_dimension_numbers<[1], [0], [0], [1], [0, 0, 1, 1], [], []>, precision = #tpu.contract_precision<fp32>} : vector<4x256xf32>, vector<256x16xf32>, vector<4x16xf32> -> vector<4x16xf32>
    %cst_25 = arith.constant 0.0666666701 : f32
    %49 = vector.broadcast %cst_25 : f32 to vector<4x16xf32>
    %50 = arith.mulf %48, %49 : vector<4x16xf32>
    %cst_26 = arith.constant 9.99999993E-9 : f32
    %51 = vector.broadcast %cst_26 : f32 to vector<4x16xf32>
    %52 = arith.addf %50, %51 : vector<4x16xf32>
    %53 = math.rsqrt %52 : vector<4x16xf32>
    %cst_27 = arith.constant dense<0.000000e+00> : vector<4x256xf32>
    %54 = tpu.matmul %53, %40, %cst_27 {dimension_numbers = #tpu.dot_dimension_numbers<[1], [0], [0], [1], [0, 0, 1, 1], [], []>, precision = #tpu.contract_precision<fp32>} : vector<4x16xf32>, vector<16x256xf32>, vector<4x256xf32> -> vector<4x256xf32>
    %55 = arith.mulf %45, %54 : vector<4x256xf32>
    %56 = vector.shape_cast %55 : vector<4x256xf32> to vector<1x4x256xf32>
    %c0_28 = arith.constant 0 : index
    %c0_29 = arith.constant 0 : index
    %c0_30 = arith.constant 0 : index
    %57 = vector.load %arg6[%c0_28, %c0_29, %c0_30] : memref<1x4x256xf32, #tpu.memory_space<vmem>>, vector<1x4x256xf32>
    tpu.vector_store %arg6[%c0_28, %c0_29, %c0_30], %56 {strides = array<i32>} : memref<1x4x256xf32, #tpu.memory_space<vmem>>, vector<1x4x256xf32>,
    return
  }
  func.func @transform_0(%arg0: i32) -> (i32, i32, i32) {
    %c0_i32 = arith.constant 0 : i32
    %c0_i32_0 = arith.constant 0 : i32
    %c0_i32_1 = arith.constant 0 : i32
    return %arg0, %c0_i32, %c0_i32_0 : i32, i32, i32
  }
  func.func @transform_1(%arg0: i32) -> (i32, i32) {
    %c0_i32 = arith.constant 0 : i32
    %c0_i32_0 = arith.constant 0 : i32
    %c0_i32_1 = arith.constant 0 : i32
    return %c0_i32, %c0_i32_0 : i32, i32
  }
  func.func @transform_2(%arg0: i32) -> (i32, i32) {
    %c0_i32 = arith.constant 0 : i32
    %c0_i32_0 = arith.constant 0 : i32
    %c0_i32_1 = arith.constant 0 : i32
    return %c0_i32, %c0_i32_0 : i32, i32
  }
  func.func @transform_3(%arg0: i32) -> (i32, i32) {
    %c0_i32 = arith.constant 0 : i32
    %c0_i32_0 = arith.constant 0 : i32
    %c0_i32_1 = arith.constant 0 : i32
    return %c0_i32, %c0_i32_0 : i32, i32
  }
  func.func @transform_4(%arg0: i32) -> (i32, i32) {
    %c0_i32 = arith.constant 0 : i32
    %c0_i32_0 = arith.constant 0 : i32
    %c0_i32_1 = arith.constant 0 : i32
    return %c0_i32, %c0_i32_0 : i32, i32
  }
  func.func @transform_5(%arg0: i32) -> (i32, i32, i32) {
    %c0_i32 = arith.constant 0 : i32
    %c0_i32_0 = arith.constant 0 : i32
    %c0_i32_1 = arith.constant 0 : i32
    return %arg0, %c0_i32, %c0_i32_0 : i32, i32, i32
  }
}

</mosaic_0001>

<bundles_post_ra>
// kernel: seq_norm.1
= control target key start
LH: loop header
LB: loop body
LE: loop exit
PB: predicated region body
PF: predicated region fallthrough
CT: control target
= control target key end

     0   :  { %10 = vsyncpa [#allocation3], 0  ;;  %s9013_s0 = inlined_call_operand.vmem [shape: f32[2,4,256], index: 0, kind: input, shape index: {}]   ;;  %s9014_s1 = inlined_call_operand.hbm [shape: f32[256,16], index: 1, kind: input, shape index: {}]   ;;  %s9015_s2 = inlined_call_operand.vmem [shape: f32[16,256], index: 2, kind: input, shape index: {}]   ;;  %s9016_s3 = inlined_call_operand.hbm [shape: f32[256,16], index: 3, kind: input, shape index: {}]   ;;  %s9017_s4 = inlined_call_operand.vmem [shape: f32[16,256], index: 4, kind: input, shape index: {}]   ;;  %s9018_s5 = inlined_call_operand.vmem [shape: f32[2,4,256], index: 5, kind: output, shape index: {}]  }
   0x1   :  { %11 = vsyncpa [#allocation5], 0  ;;  %s6925_s18 = smov 0  }
   0x2 LB: > { %s6931_s19 = sadd.s32 4294967295, %s6888_s18   ;;  %p5925_p0 = scmp.ge.s32.totalorder %s6888_s18, 1  ;;  %s6888_s18 = sphi %s6925_s18, %s17_s18  }
   0x3   : > { %p158_p1 = scmp.lt.s32.totalorder %s6888_s18, 3  ;;  %s6890_s20 = smov [#allocation2]  }
   0x4   : > { %s170_s21 = sshll.u32 %s6890_s20, 4  ;;  %p6795_p3 = scmp.eq.s32.totalorder %s6931_s19, 0  ;;  %s171_s21 = int_to_ptr.vmem [resolvable:$true] %s170_s21 }
   0x5   : > { %p6935_p2 = pnand %p5925_p0, %p158_p1  ;;  %s6891_s23 = smov [#allocation4]  }
   0x6   : > { %s186_s24 = sshll.u32 %s6891_s23, 4  ;;  %s6833_s26 = scalar_lea.vmem %s171_s21, 4096  ;;  %s187_s24 = int_to_ptr.vmem [resolvable:$true] %s186_s24 }
   0x7   : > { %p6788_p4 = pneg %p6935_p2  ;;  %p6834_p7 = scmp.ne.s32.totalorder %s171_s21, %s6833_s26 }
   0x8   : > { %p6841_p10 = scmp.lt.s32.totalorder %s171_s21, %s171_s21  ;;  %p6842_p11 = scmp.lt.s32.totalorder %s6833_s26, %s6833_s26 }
   0x9   : > { %p6944_p5 = pnand %p6795_p3, %p6788_p4 }
   0xa   : > { %p6843_p12 = por %p6842_p11, %p6841_p10 }
   0xb   : > { %p6824_p6 = pneg %p6944_p5 }
   0xd   : > { %p6836_p8 = pnand %p6834_p7, %p6824_p6 }
   0xf   : > { %p6837_p9 = pneg %p6836_p8 }
  0x11   : > { %p6844_p13 = pnand %p6843_p12, %p6837_p9 }
  0x13   : > { %6847 = shalt.err (!%p6844_p13)
}
  0x14   : > { %s6892_s27 = smov 128   ;;  %s6893_s28 = smov 8  }
  0x15   : > { %6791 = dma.hbm_to_vmem [thread:$0]  (!%p6944_p5), %s9014_s1, 4096, %s171_s21, [#allocation3], %s6892_s27, %s6892_s27, %s6893_s28  }
  0x16   : > { %s6859_s6 = scalar_lea.vmem %s187_s24, 4096  ;;  %p6867_p7 = scmp.lt.s32.totalorder %s187_s24, %s187_s24 }
  0x17   : > { %p6860_p0 = scmp.ne.s32.totalorder %s187_s24, %s6859_s6  ;;  %p6868_p8 = scmp.lt.s32.totalorder %s6859_s6, %s6859_s6 }
  0x19   : > { %p6862_p1 = pnand %p6860_p0, %p6824_p6  ;;  %p6869_p10 = por %p6868_p8, %p6867_p7 }
  0x1b   : > { %p6863_p4 = pneg %p6862_p1 }
  0x1d   : > { %p6870_p9 = pnand %p6869_p10, %p6863_p4 }
  0x1f   : > { %6873 = shalt.err (!%p6870_p9)
}
  0x20   : > { %6794 = dma.hbm_to_vmem [thread:$0]  (!%p6944_p5), %s9016_s3, 4096, %s187_s24, [#allocation5], %s6892_s27, %s6892_s27, %s6893_s28  }
  0x21   : > { %213 = sbr.rel (%p6935_p2) target bundleno = 1965 (0x7ad), region = 40 }
  0x26   : > { %6879 = dma.done.wait (%p6795_p3), [#allocation3], 4096  }
  0x27   : > { %6881 = vsyncadd (%p6795_p3), [#allocation3], 4294963200 }
  0x28   : > { %6883 = dma.done.wait (%p6795_p3), [#allocation5], 4096  }
  0x29   : > { %6885 = vsyncadd (%p6795_p3), [#allocation5], 4294963200  ;;  %v341_v0 = vld [vmem:[#allocation2 + $0xf8] sm:$0xff]  ;;  %v340_v2 = vld [vmem:[#allocation2 + $0xf0] sm:$0xff]  ;;  %p245_p2 = scmp.lt.s32.totalorder %s6931_s19, 1  ;;  %vm1209_vm0 = vcmask 130048  }
  0x2a   : > { %v325_v1 = vld [vmem:[#allocation2 + $0x78] sm:$0xff]  ;;  %v6976_v3 = vand.u32 4294901760, %v341_v0  ;;  %v6980_v5 = vand.u32 4294901760, %v340_v2  ;;  %v324_v6 = vld [vmem:[#allocation2 + $0x70] sm:$0xff]  ;;  %v339_v7 = vld [vmem:[#allocation2 + $0xe8] sm:$0xff]  ;;  %vm259_vm1 = vcmask 1043456  }
  0x2b   : > { %v6978_v4 = vand.u32 4294901760, %v325_v1  ;;  %v323_v8 = vld [vmem:[#allocation2 + $0x68] sm:$0xff]  ;;  %v6982_v9 = vand.u32 4294901760, %v324_v6  ;;  %v6984_v10 = vand.u32 4294901760, %v339_v7  ;;  %v338_v12 = vld [vmem:[#allocation2 + $0xe0] sm:$0xff]  ;;  %v337_v14 = vld [vmem:[#allocation2 + $0xd8] sm:$0xff] }
  0x2c   : > { %v6986_v11 = vand.u32 4294901760, %v323_v8  ;;  %v322_v13 = vld [vmem:[#allocation2 + $0x60] sm:$0xff]  ;;  %5940 = vmatprep.subr.mxu0 %v6976_v3  ;;  %v6989_v15 = vand.u32 4294901760, %v338_v12  ;;  %v6993_v17 = vand.u32 4294901760, %v337_v14  ;;  %v6996_v18 = vsub.f32 %v341_v0, %v6976_v3  ;;  %v6998_v19 = vld [vmem:[#allocation2 + $0x58] sm:$0xff]  ;;  %v7000_v20 = vld [vmem:[#allocation2 + $0xd0] sm:$0xff] }
  0x2d   : > { %v6991_v16 = vand.u32 4294901760, %v322_v13  ;;  %v7002_v21 = vld [vmem:[#allocation2 + $0x50] sm:$0xff]  ;;  %5941 = vmatpush3.msra.mxu0 %v6978_v4  ;;  %v7006_v22 = vand.u32 4294901760, %v6998_v19  ;;  %v7009_v23 = vsub.f32 %v325_v1, %v6978_v4  ;;  %v7012_v24 = vand.u32 4294901760, %v7000_v20  ;;  %v7017_v26 = vld [vmem:[#allocation2 + $0xc8] sm:$0xff]  ;;  %v7021_v28 = vld [vmem:[#allocation2 + $0xc0] sm:$0xff] }
  0x2e   : > { %9386 = vst [vmem:[#allocation8_spill] sm:$0xff] %v6996_v18  ;;  %v7015_v25 = vsub.f32 %v340_v2, %v6980_v5  ;;  %v7019_v27 = vld [vmem:[#allocation2 + $0x48] sm:$0xff]  ;;  %5942 = vmatprep.subr.mxu0 %v6980_v5  ;;  %v7025_v29 = vand.u32 4294901760, %v6996_v18  ;;  %v7028_v30 = vand.u32 4294901760, %v7002_v21  ;;  %v7031_v31 = vsub.f32 %v324_v6, %v6982_v9  ;;  %v7049_v37 = vld [vmem:[#allocation2 + $0x40] sm:$0xff]  ;;  %v7074_v46 = vld [vmem:[#allocation2 + $0xb8] sm:$0xff] }
  0x2f   : > { %9387 = vst [vmem:[#allocation9_spill] sm:$0xff] %v7009_v23  ;;  %v7034_v32 = vand.u32 4294901760, %v7017_v26  ;;  %5943 = vmatpush3.msra.mxu0 %v6982_v9  ;;  %v7038_v33 = vand.u32 4294901760, %v7009_v23  ;;  %v7044_v35 = vsub.f32 %v339_v7, %v6984_v10  ;;  %v7047_v36 = vand.u32 4294901760, %v7019_v27  ;;  %v7087_v51 = vld [vmem:[#allocation2 + $0x38] sm:$0xff]  ;;  %v7099_v56 = vld [vmem:[#allocation2 + $0xb0] sm:$0xff] }
  0x30   : > { %9388 = vst [vmem:[#allocation10_spill] sm:$0xff] %v7015_v25  ;;  %9389 = vst [vmem:[#allocation11_spill] sm:$0xff] %v7025_v29  ;;  %v7041_v34 = vand.u32 4294901760, %v7015_v25  ;;  %5944 = vmatprep.subr.mxu0 %v6984_v10  ;;  %v574_v38 = vsub.f32 %v6996_v18, %v7025_v29  ;;  %v7055_v39 = vand.u32 4294901760, %v7031_v31  ;;  %v7058_v40 = vsub.f32 %v323_v8, %v6986_v11  ;;  %v7113_v61 = vld [vmem:[#allocation2 + $0x30] sm:$0xff]  ;;  %v7127_v2 = vld [vmem:[#allocation2 + $0xa8] sm:$0xff] }
  0x31   : > { %9390 = vst [vmem:[#allocation12_spill] sm:$0xff] %v7028_v30  ;;  %9391 = vst [vmem:[#allocation13_spill] sm:$0xff] %v7031_v31  ;;  %v7061_v41 = vand.u32 4294901760, %v7021_v28  ;;  %5945 = vmatpush3.msra.mxu0 %v6986_v11  ;;  %v462_v42 = vsub.f32 %v7009_v23, %v7038_v33  ;;  %v7069_v44 = vand.u32 4294901760, %v7044_v35  ;;  %v7072_v45 = vsub.f32 %v338_v12, %v6989_v15  ;;  %s9964_s19 = smov (!%p245_p2, %s6931_s19), 1 }
  0x32   : > { %9392 = vst [vmem:[#allocation14_spill] sm:$0xff] %v7034_v32  ;;  %9393 = vst [vmem:[#allocation15_spill] sm:$0xff] %v7038_v33  ;;  %v581_v43 = vsub.f32 %v7015_v25, %v7041_v34  ;;  %5946 = vmatprep.subr.mxu0 %v6989_v15  ;;  %v7077_v47 = vand.u32 4294901760, %v574_v38  ;;  %v469_v48 = vsub.f32 %v7031_v31, %v7055_v39  ;;  %v7082_v49 = vand.u32 4294901760, %v7058_v40  ;;  %v7281_v33 = vld [vmem:[#allocation2 + $0x88] sm:$0xff]  ;;  %s5938_s9 = sshll.u32 %s9964_s19, 3 }
  0x33   : > { %9394 = vst [vmem:[#allocation16_spill] sm:$0xff] %v7041_v34  ;;  %9395 = vst [vmem:[#allocation17_spill] sm:$0xff] %v7044_v35  ;;  %v7085_v50 = vand.u32 4294901760, %v7049_v37  ;;  %5947 = vmatpush3.msra.mxu0 %v6991_v16  ;;  %v7090_v52 = vand.u32 4294901760, %v462_v42  ;;  %v588_v54 = vsub.f32 %v7044_v35, %v7069_v44  ;;  %v7097_v55 = vand.u32 4294901760, %v7072_v45  ;;  %s7334_s12 = scalar_lea.vmem %s9013_s0, %s5938_s9  ;;  %s254_s8 = scalar_lea.vmem %s9018_s5, %s5938_s9 }
  0x34   : > { %9396 = vst [vmem:[#allocation18_spill] sm:$0xff] %v7047_v36  ;;  %9397 = vst [vmem:[#allocation19_spill] sm:$0xff] %v7055_v39  ;;  %v7092_v53 = vand.u32 4294901760, %v581_v43  ;;  %5948 = vmatprep.subr.mxu0 %v6993_v17  ;;  %5975 = vmatprep.subr.mxu1 %v7077_v47  ;;  %v7103_v57 = vand.u32 4294901760, %v469_v48  ;;  %v476_v58 = vsub.f32 %v7058_v40, %v7082_v49  ;;  %v7111_v60 = vand.u32 4294901760, %v7074_v46 }
  0x35   : > { %9398 = vst [vmem:[#allocation20_spill] sm:$0xff] %v7058_v40  ;;  %9399 = vst [vmem:[#allocation21_spill] sm:$0xff] %v7061_v41  ;;  %v7108_v59 = vsub.f32 %v322_v13, %v6991_v16  ;;  %5949 = vmatpush3.msra.mxu0 %v7006_v22  ;;  %5976 = vmatpush3.msra.mxu1 %v7090_v52  ;;  %v7117_v62 = vand.u32 4294901760, %v588_v54  ;;  %v595_v63 = vsub.f32 %v7072_v45, %v7097_v55  ;;  %v7143_v13 = vld [vmem:[#allocation2 + $0x28] sm:$0xff] }
  0x36   : > { %9400 = vst [vmem:[#allocation22_spill] sm:$0xff] %v7069_v44  ;;  %9401 = vst [vmem:[#allocation23_spill] sm:$0xff] %v7072_v45  ;;  %v7122_v0 = vsub.f32 %v337_v14, %v6993_v17  ;;  %v7125_v1 = vand.u32 4294901760, %v7087_v51  ;;  %5950 = vmatprep.subr.mxu0 %v7012_v24  ;;  %5977 = vmatprep.subr.mxu1 %v7092_v53  ;;  %v7131_v6 = vand.u32 4294901760, %v476_v58  ;;  %v7141_v12 = vand.u32 4294901760, %v7099_v56  ;;  %v7174_v58 = vld [vmem:[#allocation2 + $0xa0] sm:$0xff] }
  0x37   : > { %9402 = vst [vmem:[#allocation24_spill] sm:$0xff] %v7077_v47  ;;  %9403 = vst [vmem:[#allocation25_spill] sm:$0xff] %v7082_v49  ;;  %v7134_v7 = vand.u32 4294901760, %v7108_v59  ;;  %v7138_v8 = vsub.f32 %v6998_v19, %v7006_v22  ;;  %5951 = vmatpush3.msra.mxu0 %v7028_v30  ;;  %5978 = vmatpush3.msra.mxu1 %v7103_v57  ;;  %v7147_v14 = vand.u32 4294901760, %v595_v63  ;;  %v7157_v19 = vand.u32 4294901760, %v7113_v61  ;;  %v7236_v49 = vld [vmem:[#allocation2 + $0x18] sm:$0xff] }
  0x38   : > { %9404 = vst [vmem:[#allocation26_spill] sm:$0xff] %v7085_v50  ;;  %9405 = vst [vmem:[#allocation27_spill] sm:$0xff] %v7090_v52  ;;  %v7150_v38 = vand.u32 4294901760, %v7122_v0  ;;  %v7154_v42 = vsub.f32 %v7000_v20, %v7012_v24  ;;  %5952 = vmatprep.subr.mxu0 %v7034_v32  ;;  %5979 = vmatprep.subr.mxu1 %v7117_v62  ;;  %v7169_v54 = vsub.f32 %v7002_v21, %v7028_v30 }
  0x39   : > { %9406 = vst [vmem:[#allocation28_spill] sm:$0xff] %v7092_v53  ;;  %9407 = vst [vmem:[#allocation29_spill] sm:$0xff] %v7097_v55  ;;  %v483_v43 = vsub.f32 %v7108_v59, %v7134_v7  ;;  %v7165_v48 = vand.u32 4294901760, %v7138_v8  ;;  %v7172_v20 = vand.u32 4294901760, %v7127_v2  ;;  %5953 = vmatpush3.msra.mxu0 %v7047_v36  ;;  %5980 = vmatpush3.msra.mxu1 %v7131_v6  ;;  %v7279_v34 = vand.u32 4294901760, %v7236_v49 }
  0x3a   : > { %9408 = vst [vmem:[#allocation30_spill] sm:$0xff] %v7103_v57  ;;  %9409 = vst [vmem:[#allocation31_spill] sm:$0xff] %v7108_v59  ;;  %v602_v63 = vsub.f32 %v7122_v0, %v7150_v38  ;;  %v7185_v21 = vsub.f32 %v7017_v26, %v7034_v32  ;;  %v7188_v57 = vand.u32 4294901760, %v7143_v13  ;;  %5954 = vmatprep.subr.mxu0 %v7061_v41  ;;  %5981 = vmatprep.subr.mxu1 %v7147_v14  ;;  %v7203_v26 = vld [vmem:[#allocation2 + $0x20] sm:$0xff] }
  0x3b   : > { %9410 = vst [vmem:[#allocation32_spill] sm:$0xff] %v7111_v60  ;;  %9411 = vst [vmem:[#allocation33_spill] sm:$0xff] %v7117_v62  ;;  %v7181_v62 = vand.u32 4294901760, %v7154_v42  ;;  %v490_v53 = vsub.f32 %v7138_v8, %v7165_v48  ;;  %v7197_v52 = vand.u32 4294901760, %v7169_v54  ;;  %v7201_v47 = vsub.f32 %v7019_v27, %v7047_v36  ;;  %5955 = vmatpush3.msra.mxu0 %v7085_v50  ;;  %v7362_v36 = vld [vmem:[#allocation2] sm:$0xff] }
  0x3c   : > { %9412 = vst [vmem:[#allocation34_spill] sm:$0xff] %v7122_v0  ;;  %9413 = vst [vmem:[#allocation35_spill] sm:$0xff] %v7125_v1  ;;  %5956 = vmatprep.subr.mxu0 %v7111_v60  ;;  %v7234_v55 = vsub.f32 %v7021_v28, %v7061_v41  ;;  %v7249_v44 = vsub.f32 %v7049_v37, %v7085_v50  ;;  %v7251_v28 = vld [vmem:[#allocation2 + $0x90] sm:$0xff]  ;;  %v7292_v29 = vsub.f32 %v7087_v51, %v7125_v1  ;;  %v7377_v32 = vld [vmem:[%s7334_s12] sm:$0xff] }
  0x3d   : > { %9414 = vst [vmem:[#allocation36_spill] sm:$0xff] %v7131_v6  ;;  %9415 = vst [vmem:[#allocation37_spill] sm:$0xff] %v7134_v7  ;;  %v7192_v6 = vand.u32 4294901760, %v483_v43  ;;  %v609_v43 = vsub.f32 %v7154_v42, %v7181_v62  ;;  %v7216_v7 = vld [vmem:[#allocation2 + $0x98] sm:$0xff]  ;;  %v7225_v27 = vand.u32 4294901760, %v490_v53  ;;  %5957 = vmatpush3.msra.mxu0 %v7125_v1  ;;  %v7265_v37 = vld [vmem:[#allocation2 + $0x10] sm:$0xff]  ;;  %v7360_v41 = vsub.f32 %v7143_v13, %v7188_v57 }
  0x3e   : > { %9416 = vst [vmem:[#allocation38_spill] sm:$0xff] %v7138_v8  ;;  %9417 = vst [vmem:[#allocation39_spill] sm:$0xff] %v7141_v12  ;;  %5958 = vmatprep.subr.mxu0 %v7141_v12  ;;  %v7263_v39 = vand.u32 4294901760, %v7216_v7  ;;  %v7309_v51 = vand.u32 4294901760, %v7265_v37  ;;  %v7311_v1 = vld [vmem:[#allocation2 + $0x8] sm:$0xff]  ;;  %v7398_v30 = vand.u32 4294901760, %v7362_v36 }
  0x3f   : > { %9418 = vst [vmem:[#allocation40_spill] sm:$0xff] %v7147_v14  ;;  %9419 = vst [vmem:[#allocation41_spill] sm:$0xff] %v7150_v38  ;;  %v7206_v38 = vand.u32 4294901760, %v602_v63  ;;  %v7211_v14 = vand.u32 4294901760, %v7185_v21  ;;  %5982 = vmatpush3.msra.mxu1 %v7192_v6  ;;  %v497_v63 = vsub.f32 %v7169_v54, %v7197_v52  ;;  %5959 = vmatpush3.msra.mxu0 %v7157_v19 }
  0x40   : > { %9420 = vst [vmem:[#allocation42_spill] sm:$0xff] %v7154_v42  ;;  %9421 = vst [vmem:[#allocation43_spill] sm:$0xff] %v7157_v19  ;;  %5960 = vmatprep.subr.mxu0 %v7172_v20 }
  0x41   : > { %9422 = vst [vmem:[#allocation44_spill] sm:$0xff] %v7165_v48  ;;  %9423 = vst [vmem:[#allocation45_spill] sm:$0xff] %v7169_v54  ;;  %v7214_v48 = vand.u32 4294901760, %v7174_v58  ;;  %5983 = vmatprep.subr.mxu1 %v7206_v38  ;;  %v616_v53 = vsub.f32 %v7185_v21, %v7211_v14  ;;  %5961 = vmatpush3.msra.mxu0 %v7188_v57 }
  0x42   : > { %9424 = vst [vmem:[#allocation46_spill] sm:$0xff] %v7172_v20  ;;  %9425 = vst [vmem:[#allocation47_spill] sm:$0xff] %v7181_v62  ;;  %v7230_v62 = vand.u32 4294901760, %v7201_v47  ;;  %5984 = vmatpush3.msra.mxu1 %v7225_v27 }
  0x43   : > { %9426 = vst [vmem:[#allocation48_spill] sm:$0xff] %v7185_v21  ;;  %9427 = vst [vmem:[#allocation49_spill] sm:$0xff] %v7188_v57  ;;  %5962 = vmatprep.subr.mxu0 %v7214_v48 }
  0x44   : > { %9428 = vst [vmem:[#allocation50_spill] sm:$0xff] %v7192_v6  ;;  %9429 = vst [vmem:[#allocation51_spill] sm:$0xff] %v7197_v52  ;;  %v7240_v6 = vand.u32 4294901760, %v609_v43  ;;  %v7245_v52 = vand.u32 4294901760, %v7203_v26  ;;  %v504_v43 = vsub.f32 %v7201_v47, %v7230_v62 }
  0x45   : > { %9430 = vst [vmem:[#allocation52_spill] sm:$0xff] %v7201_v47  ;;  %9431 = vst [vmem:[#allocation53_spill] sm:$0xff] %v7206_v38  ;;  %v7255_v38 = vand.u32 4294901760, %v497_v63  ;;  %v7272_v63 = vand.u32 4294901760, %v7249_v44 }
  0x46   : > { %9432 = vst [vmem:[#allocation54_spill] sm:$0xff] %v7211_v14  ;;  %9433 = vst [vmem:[#allocation55_spill] sm:$0xff] %v7214_v48  ;;  %v7260_v14 = vand.u32 4294901760, %v7234_v55  ;;  %5985 = vmatprep.subr.mxu1 %v7240_v6  ;;  %5963 = vmatpush3.msra.mxu0 %v7245_v52 }
  0x47   : > { %9434 = vst [vmem:[#allocation56_spill] sm:$0xff] %v7225_v27  ;;  %9435 = vst [vmem:[#allocation57_spill] sm:$0xff] %v7230_v62  ;;  %v7269_v27 = vand.u32 4294901760, %v616_v53  ;;  %v7276_v62 = vsub.f32 %v7074_v46, %v7111_v60  ;;  %5986 = vmatpush3.msra.mxu1 %v7255_v38  ;;  %v7295_v46 = vand.u32 4294901760, %v7251_v28  ;;  %v7322_v60 = vsub.f32 %v7113_v61, %v7157_v19 }
  0x48   : > { %9436 = vst [vmem:[#allocation58_spill] sm:$0xff] %v7234_v55  ;;  %9437 = vst [vmem:[#allocation59_spill] sm:$0xff] %v7240_v6  ;;  %v7286_v6 = vand.u32 4294901760, %v504_v43  ;;  %v623_v53 = vsub.f32 %v7234_v55, %v7260_v14  ;;  %v7346_v19 = vsub.f32 %v7127_v2, %v7172_v20  ;;  %5964 = vmatprep.subr.mxu0 %v7263_v39 }
  0x49   : > { %9438 = vst [vmem:[#allocation60_spill] sm:$0xff] %v7245_v52  ;;  %9439 = vst [vmem:[#allocation61_spill] sm:$0xff] %v7249_v44  ;;  %5987 = vmatprep.subr.mxu1 %v7269_v27  ;;  %v7302_v43 = vand.u32 4294901760, %v7276_v62  ;;  %5965 = vmatpush3.msra.mxu0 %v7279_v34 }
  0x4a   : > { %9440 = vst [vmem:[#allocation62_spill] sm:$0xff] %v7255_v38  ;;  %9441 = vst [vmem:[#allocation63_spill] sm:$0xff] %v7260_v14  ;;  %v511_v38 = vsub.f32 %v7249_v44, %v7272_v63  ;;  %v7306_v14 = vsub.f32 %v7099_v56, %v7141_v12  ;;  %5988 = vmatpush3.msra.mxu1 %v7286_v6  ;;  %v7325_v56 = vand.u32 4294901760, %v7281_v33  ;;  %v7327_v12 = vld [vmem:[#allocation2 + $0x80] sm:$0xff]  ;;  %5966 = vmatprep.subr.mxu0 %v7295_v46 }
  0x4b   : > { %9442 = vst [vmem:[#allocation64_spill] sm:$0xff] %v7263_v39  ;;  %9443 = vst [vmem:[#allocation65_spill] sm:$0xff] %v7269_v27  ;;  %v7315_v27 = vand.u32 4294901760, %v623_v53  ;;  %v7374_v20 = vand.u32 4294901760, %v7327_v12  ;;  %5967 = vmatpush3.msra.mxu0 %v7309_v51 }
  0x4c   : > { %9444 = vst [vmem:[#allocation66_spill] sm:$0xff] %v7272_v63  ;;  %9445 = vst [vmem:[#allocation67_spill] sm:$0xff] %v7276_v62  ;;  %v7318_v63 = vand.u32 4294901760, %v7292_v29  ;;  %v7337_v53 = vand.u32 4294901760, %v511_v38  ;;  %v7342_v61 = vand.u32 4294901760, %v7306_v14  ;;  %v7353_v38 = vand.u32 4294901760, %v7322_v60  ;;  %5968 = vmatprep.subr.mxu0 %v7325_v56 }
  0x4d   : > { %9446 = vst [vmem:[#allocation68_spill] sm:$0xff] %v7279_v34  ;;  %9447 = vst [vmem:[#allocation69_spill] sm:$0xff] %v7286_v6  ;;  %v630_v6 = vsub.f32 %v7276_v62, %v7302_v43  ;;  %5989 = vmatprep.subr.mxu1 %v7315_v27 }
  0x4e   : > { %9448 = vst [vmem:[#allocation70_spill] sm:$0xff] %v7292_v29  ;;  %9449 = vst [vmem:[#allocation71_spill] sm:$0xff] %v7295_v46  ;;  %v518_v50 = vsub.f32 %v7292_v29, %v7318_v63  ;;  %5990 = vmatpush3.msra.mxu1 %v7337_v53 }
  0x4f   : > { %9450 = vst [vmem:[#allocation72_spill] sm:$0xff] %v7302_v43  ;;  %9451 = vst [vmem:[#allocation73_spill] sm:$0xff] %v7306_v14  ;;  %v7356_v43 = vand.u32 4294901760, %v7311_v1  ;;  %v7365_v2 = vand.u32 4294901760, %v630_v6  ;;  %v525_v6 = vsub.f32 %v7322_v60, %v7353_v38 }
  0x50   : > { %9452 = vst [vmem:[#allocation74_spill] sm:$0xff] %v7309_v51  ;;  %9453 = vst [vmem:[#allocation75_spill] sm:$0xff] %v7315_v27  ;;  %v637_v27 = vsub.f32 %v7306_v14, %v7342_v61  ;;  %v7379_v13 = vand.u32 4294901760, %v518_v50 }
  0x51   : > { %9454 = vst [vmem:[#allocation76_spill] sm:$0xff] %v7318_v63  ;;  %9455 = vst [vmem:[#allocation77_spill] sm:$0xff] %v7322_v60  ;;  %v7371_v63 = vand.u32 4294901760, %v7346_v19  ;;  %5991 = vmatprep.subr.mxu1 %v7365_v2  ;;  %5969 = vmatpush3.msra.mxu0 %v7356_v43 }
  0x52   : > { %9456 = vst [vmem:[#allocation78_spill] sm:$0xff] %v7325_v56  ;;  %9457 = vst [vmem:[#allocation79_spill] sm:$0xff] %v7337_v53  ;;  %v7385_v53 = vand.u32 4294901760, %v7360_v41  ;;  %v7392_v57 = vand.u32 4294901760, %v637_v27  ;;  %5992 = vmatpush3.msra.mxu1 %v7379_v13  ;;  %5970 = vmatprep.subr.mxu0 %v7374_v20 }
  0x53   : > { %9458 = vst [vmem:[#allocation80_spill] sm:$0xff] %v7342_v61  ;;  %9459 = vst [vmem:[#allocation81_spill] sm:$0xff] %v7346_v19  ;;  %v7389_v61 = vsub.f32 %v7174_v58, %v7214_v48  ;;  %v644_v50 = vsub.f32 %v7346_v19, %v7371_v63  ;;  %v7405_v58 = vand.u32 4294901760, %v525_v6  ;;  %v7442_v48 = vsub.f32 %v7236_v49, %v7279_v34 }
  0x54   : > { %9460 = vst [vmem:[#allocation82_spill] sm:$0xff] %v7353_v38  ;;  %9461 = vst [vmem:[#allocation83_spill] sm:$0xff] %v7356_v43  ;;  %v7402_v38 = vsub.f32 %v7203_v26, %v7245_v52  ;;  %v532_v27 = vsub.f32 %v7360_v41, %v7385_v53  ;;  %5993 = vmatprep.subr.mxu1 %v7392_v57  ;;  %5971 = vmatpush3.msra.mxu0 %v7398_v30 }
  0x55   : > { %9462 = vst [vmem:[#allocation84_spill] sm:$0xff] %v7360_v41  ;;  %9463 = vst [vmem:[#allocation85_spill] sm:$0xff] %v7365_v2  ;;  %v7411_v2 = vand.u32 4294901760, %v7389_v61  ;;  %v7418_v26 = vand.u32 4294901760, %v644_v50  ;;  %5994 = vmatpush3.msra.mxu1 %v7405_v58  ;;  %6010 = vmatprep.subr.mxu0 %v6996_v18 }
  0x56   : > { %9464 = vst [vmem:[#allocation86_spill] sm:$0xff] %v7371_v63  ;;  %9465 = vst [vmem:[#allocation87_spill] sm:$0xff] %v7374_v20  ;;  %v7415_v63 = vcombine.high %v7377_v32, %v7377_v32  ;;  %v7422_v6 = vand.u32 4294901760, %v7402_v38  ;;  %v7432_v52 = vand.u32 4294901760, %v532_v27 }
  0x57   : > { %9466 = vst [vmem:[#allocation88_spill] sm:$0xff] %v7377_v32  ;;  %9467 = vst [vmem:[#allocation89_spill] sm:$0xff] %v7379_v13  ;;  %v7426_v13 = vsub.f32 %v7216_v7, %v7263_v39  ;;  %v651_v50 = vsub.f32 %v7389_v61, %v7411_v2  ;;  %5995 = vmatprep.subr.mxu1 %v7418_v26 }
  0x58   : > { %9468 = vst [vmem:[#allocation90_spill] sm:$0xff] %v7385_v53  ;;  %9469 = vst [vmem:[#allocation91_spill] sm:$0xff] %v7389_v61  ;;  %v7429_v53 = vand.u32 4294901760, %v7377_v32  ;;  %v539_v7 = vsub.f32 %v7402_v38, %v7422_v6  ;;  %5996 = vmatpush3.msra.mxu1 %v7432_v52 }
  0x59   : > { %9470 = vst [vmem:[#allocation92_spill] sm:$0xff] %v7392_v57  ;;  %9471 = vst [vmem:[#allocation93_spill] sm:$0xff] %v7398_v30  ;;  %v7438_v57 = vand.u32 4294901760, %v7415_v63  ;;  %v7449_v27 = vand.u32 4294901760, %v7426_v13  ;;  %v7460_v49 = vand.u32 4294901760, %v651_v50 }
  0x5a   : > { %9472 = vst [vmem:[#allocation94_spill] sm:$0xff] %v7402_v38  ;;  %9473 = vst [vmem:[#allocation95_spill] sm:$0xff] %v7405_v58  ;;  %v7453_v58 = vsub.f32 %v7377_v32, %v7429_v53  ;;  %v7472_v32 = vsub.f32 %v7265_v37, %v7309_v51  ;;  %v7474_v34 = vand.u32 4294901760, %v539_v7 }
  0x5b   : > { %9474 = vst [vmem:[#allocation96_spill] sm:$0xff] %v7411_v2  ;;  %9475 = vst [vmem:[#allocation97_spill] sm:$0xff] %v7415_v63  ;;  %v7457_v2 = vsub.f32 %v7251_v28, %v7295_v46  ;;  %v658_v28 = vsub.f32 %v7426_v13, %v7449_v27  ;;  %683 = vmatprep.mubr.f32.mxu1 %v7438_v57  ;;  %5997 = vmatprep.subr.mxu1 %v7460_v49 }
  0x5c   : > { %9476 = vst [vmem:[#allocation98_spill] sm:$0xff] %v7418_v26  ;;  %9477 = vst [vmem:[#allocation99_spill] sm:$0xff] %v7422_v6  ;;  %v7464_v26 = vsub.f32 %v7415_v63, %v7438_v57  ;;  %v7468_v6 = vand.u32 4294901760, %v7442_v48  ;;  %v7479_v50 = vand.u32 4294901760, %v7453_v58  ;;  %v7492_v7 = vand.u32 4294901760, %v7472_v32  ;;  %5998 = vmatpush3.msra.mxu1 %v7474_v34 }
  0x5d   : > { %9478 = vst [vmem:[#allocation100_spill] sm:$0xff] %v7426_v13  ;;  %9479 = vst [vmem:[#allocation101_spill] sm:$0xff] %v7429_v53  ;;  %v7482_v63 = vand.u32 4294901760, %v7457_v2 }
  0x5e   : > { %9480 = vst [vmem:[#allocation102_spill] sm:$0xff] %v7432_v52  ;;  %9481 = vst [vmem:[#allocation103_spill] sm:$0xff] %v7438_v57  ;;  %v7487_v18 = vand.u32 4294901760, %v7464_v26  ;;  %v546_v37 = vsub.f32 %v7442_v48, %v7468_v6  ;;  %v7496_v52 = vsub.f32 %v7281_v33, %v7325_v56  ;;  %v553_v33 = vsub.f32 %v7472_v32, %v7492_v7 }
  0x5f   : > { %9482 = vst [vmem:[#allocation104_spill] sm:$0xff] %v7442_v48  ;;  %9483 = vst [vmem:[#allocation105_spill] sm:$0xff] %v7449_v27  ;;  %v7499_v27 = vand.u32 4294901760, %v658_v28  ;;  %v665_v57 = vsub.f32 %v7457_v2, %v7482_v63 }
  0x60   : > { %9484 = vst [vmem:[#allocation106_spill] sm:$0xff] %v7453_v58  ;;  %9485 = vst [vmem:[#allocation107_spill] sm:$0xff] %v7457_v2  ;;  %v445_v51 = vsub.f32 %v7464_v26, %v7487_v18  ;;  %v7511_v46 = vand.u32 4294901760, %v546_v37  ;;  %v7516_v28 = vand.u32 4294901760, %v7496_v52 }
  0x61   : > { %9486 = vst [vmem:[#allocation108_spill] sm:$0xff] %v7460_v49  ;;  %9487 = vst [vmem:[#allocation109_spill] sm:$0xff] %v7464_v26  ;;  %v451_v49 = vsub.f32 %v7453_v58, %v7479_v50  ;;  %5999 = vmatprep.subr.mxu1 %v7499_v27 }
  0x62   : > { %9488 = vst [vmem:[#allocation110_spill] sm:$0xff] %v7468_v6  ;;  %9489 = vst [vmem:[#allocation111_spill] sm:$0xff] %v7472_v32  ;;  %v7507_v6 = vsub.f32 %v7311_v1, %v7356_v43  ;;  %v7530_v37 = vand.u32 4294901760, %v445_v51  ;;  %6000 = vmatpush3.msra.mxu1 %v7511_v46 }
  0x63   : > { %9490 = vst [vmem:[#allocation112_spill] sm:$0xff] %v7474_v34  ;;  %9491 = vst [vmem:[#allocation113_spill] sm:$0xff] %v7479_v50  ;;  %v7519_v34 = vand.u32 4294901760, %v451_v49  ;;  %v7528_v50 = vsub.f32 %v7327_v12, %v7374_v20 }
  0x64   : > { %9492 = vst [vmem:[#allocation114_spill] sm:$0xff] %v7482_v63  ;;  %9493 = vst [vmem:[#allocation115_spill] sm:$0xff] %v7487_v18  ;;  %v7521_v63 = vand.u32 4294901760, %v665_v57  ;;  %v7524_v1 = vand.u32 4294901760, %v7507_v6  ;;  %v7539_v57 = vsub.f32 %v7362_v36, %v7398_v30  ;;  %447 = vmatprep.mubr.f32.mxu0 %v7530_v37 }
  0x65   : > { %9494 = vst [vmem:[#allocation116_spill] sm:$0xff] %v7492_v7  ;;  %9495 = vst [vmem:[#allocation117_spill] sm:$0xff] %v7496_v52  ;;  %v7533_v7 = vand.u32 4294901760, %v553_v33  ;;  %v7545_v12 = vand.u32 4294901760, %v7528_v50  ;;  %453 = vmatmul.mubr.f32.vlgmr.msra.gmra.mxu0 %v7519_v34 }
  0x66   : > { %9496 = vst [vmem:[#allocation118_spill] sm:$0xff] %v7499_v27  ;;  %9497 = vst [vmem:[#allocation119_spill] sm:$0xff] %v7507_v6  ;;  %v672_v27 = vsub.f32 %v7496_v52, %v7516_v28  ;;  %6001 = vmatprep.subr.mxu1 %v7521_v63  ;;  %v560_v49 = vsub.f32 %v7507_v6, %v7524_v1  ;;  %v7552_v33 = vand.u32 4294901760, %v7539_v57  ;;  %6011 = vmatpush3.msra.mxu0 %v7009_v23 }
  0x67   : > { %9498 = vst [vmem:[#allocation120_spill] sm:$0xff] %v7516_v28  ;;  %9499 = vst [vmem:[#allocation121_spill] sm:$0xff] %v7519_v34  ;;  %6002 = vmatpush3.msra.mxu1 %v7533_v7  ;;  %6012 = vmatprep.subr.mxu0 %v7015_v25  ;;  %v9513_v34 = vld [vmem:[#allocation21_spill] sm:$0xff] }
  0x68   : > { %9500 = vst [vmem:[#allocation122_spill] sm:$0xff] %v7521_v63  ;;  %9501 = vst [vmem:[#allocation123_spill] sm:$0xff] %v7524_v1  ;;  %v7549_v51 = vand.u32 4294901760, %v672_v27  ;;  %v7555_v36 = vand.u32 4294901760, %v560_v49  ;;  %v679_v63 = vsub.f32 %v7528_v50, %v7545_v12  ;;  %6013 = vmatpush3.msra.mxu0 %v7031_v31  ;;  %820 = vmatprep.mubr.f32.mxu0 %v7464_v26  ;;  %v9512_v26 = vld [vmem:[#allocation18_spill] sm:$0xff] }
  0x69   : > { %9502 = vst [vmem:[#allocation124_spill] sm:$0xff] %v7528_v50  ;;  %9503 = vst [vmem:[#allocation125_spill] sm:$0xff] %v7530_v37  ;;  %v567_v37 = vsub.f32 %v7539_v57, %v7552_v33  ;;  %6014 = vmatprep.subr.mxu0 %v7044_v35 }
  0x6a   : > { %9504 = vst [vmem:[#allocation126_spill] sm:$0xff] %v7539_v57  ;;  %9505 = vst [vmem:[#allocation127_spill] sm:$0xff] %v7545_v12  ;;  %6003 = vmatprep.subr.mxu1 %v7549_v51  ;;  %v7565_v27 = vand.u32 4294901760, %v679_v63  ;;  %6015 = vmatpush3.msra.mxu0 %v7058_v40  ;;  %v9510_v63 = vld [vmem:[#allocation12_spill] sm:$0xff] }
  0x6b   : > { %9506 = vst [vmem:[#allocation128_spill] sm:$0xff] %v7552_v33  ;;  %9507 = vst [vmem:[#allocation129_spill] sm:$0xff] %v7555_v36  ;;  %6004 = vmatpush3.msra.mxu1 %v7555_v36  ;;  %v7568_v49 = vand.u32 4294901760, %v567_v37  ;;  %6016 = vmatprep.subr.mxu0 %v7072_v45  ;;  %v9511_v37 = vld [vmem:[#allocation14_spill] sm:$0xff] }
  0x6c   : > { %9508 = vst [vmem:[#allocation130_spill] sm:$0xff] %v7565_v27  ;;  %6005 = vmatprep.subr.mxu1 %v7565_v27  ;;  %6017 = vmatpush3.msra.mxu0 %v7108_v59 }
  0x6d   : > { %9509 = vst [vmem:[#allocation131_spill] sm:$0xff] %v7568_v49  ;;  %6006 = vmatpush3.msra.mxu1 %v7568_v49  ;;  %6018 = vmatprep.subr.mxu0 %v7122_v0 }
  0x6e   : > { %685 = vmatmul.mubr.f32.vlgmr.msra.gmra.mxu1 %v7429_v53  ;;  %6045 = vmatprep.subr.mxu1 %v6976_v3 }
  0x6f   : > { %6046 = vmatpush3.msra.mxu1 %v6978_v4  ;;  %6019 = vmatpush3.msra.mxu0 %v7138_v8 }
  0x70   : > { %6047 = vmatprep.subr.mxu1 %v6980_v5  ;;  %6020 = vmatprep.subr.mxu0 %v7154_v42 }
  0x71   : > { %6048 = vmatpush3.msra.mxu1 %v6982_v9  ;;  %6021 = vmatpush3.msra.mxu0 %v7169_v54 }
  0x72   : > { %6049 = vmatprep.subr.mxu1 %v6984_v10  ;;  %6022 = vmatprep.subr.mxu0 %v7185_v21 }
  0x73   : > { %6050 = vmatpush3.msra.mxu1 %v6986_v11  ;;  %6023 = vmatpush3.msra.mxu0 %v7201_v47 }
  0x74   : > { %6051 = vmatprep.subr.mxu1 %v6989_v15  ;;  %6024 = vmatprep.subr.mxu0 %v7234_v55 }
  0x75   : > { %6052 = vmatpush3.msra.mxu1 %v6991_v16  ;;  %6025 = vmatpush3.msra.mxu0 %v7249_v44  ;;  %v9528_v44 = vld [vmem:[#allocation74_spill] sm:$0xff] }
  0x76   : > { %6053 = vmatprep.subr.mxu1 %v6993_v17  ;;  %6026 = vmatprep.subr.mxu0 %v7276_v62  ;;  %v9526_v62 = vld [vmem:[#allocation71_spill] sm:$0xff] }
  0x77   : > { %6054 = vmatpush3.msra.mxu1 %v7006_v22  ;;  %6027 = vmatpush3.msra.mxu0 %v7292_v29  ;;  %v9514_v29 = vld [vmem:[#allocation26_spill] sm:$0xff] }
  0x78   : > { %6055 = vmatprep.subr.mxu1 %v7012_v24  ;;  %6028 = vmatprep.subr.mxu0 %v7306_v14  ;;  %v9515_v14 = vld [vmem:[#allocation32_spill] sm:$0xff] }
  0x79   : > { %6056 = vmatpush3.msra.mxu1 %v9510_v63  ;;  %6029 = vmatpush3.msra.mxu0 %v7322_v60  ;;  %v9516_v60 = vld [vmem:[#allocation35_spill] sm:$0xff] }
  0x7a   : > { %6057 = vmatprep.subr.mxu1 %v9511_v37  ;;  %6030 = vmatprep.subr.mxu0 %v7346_v19  ;;  %v9517_v19 = vld [vmem:[#allocation39_spill] sm:$0xff] }
  0x7b   : > { %6058 = vmatpush3.msra.mxu1 %v9512_v26  ;;  %6031 = vmatpush3.msra.mxu0 %v7360_v41  ;;  %v9518_v41 = vld [vmem:[#allocation43_spill] sm:$0xff] }
  0x7c   : > { %6059 = vmatprep.subr.mxu1 %v9513_v34  ;;  %6032 = vmatprep.subr.mxu0 %v7389_v61  ;;  %v9519_v61 = vld [vmem:[#allocation46_spill] sm:$0xff] }
  0x7d   : > { %6060 = vmatpush3.msra.mxu1 %v9514_v29  ;;  %6033 = vmatpush3.msra.mxu0 %v7402_v38  ;;  %v9520_v38 = vld [vmem:[#allocation49_spill] sm:$0xff] }
  0x7e   : > { %6061 = vmatprep.subr.mxu1 %v9515_v14  ;;  %6034 = vmatprep.subr.mxu0 %v7426_v13  ;;  %v9521_v13 = vld [vmem:[#allocation55_spill] sm:$0xff] }
  0x7f   : > { %6062 = vmatpush3.msra.mxu1 %v9516_v60  ;;  %6035 = vmatpush3.msra.mxu0 %v7442_v48  ;;  %v9522_v48 = vld [vmem:[#allocation60_spill] sm:$0xff] }
  0x80   : > { %6063 = vmatprep.subr.mxu1 %v9517_v19  ;;  %6036 = vmatprep.subr.mxu0 %v7457_v2  ;;  %v9524_v2 = vld [vmem:[#allocation68_spill] sm:$0xff] }
  0x81   : > { %6064 = vmatpush3.msra.mxu1 %v9518_v41  ;;  %6037 = vmatpush3.msra.mxu0 %v7472_v32  ;;  %v9523_v32 = vld [vmem:[#allocation11_spill] sm:$0xff] }
  0x82   : > { %6065 = vmatprep.subr.mxu1 %v9519_v61  ;;  %6038 = vmatprep.subr.mxu0 %v7496_v52  ;;  %v9525_v52 = vld [vmem:[#allocation15_spill] sm:$0xff] }
  0x83   : > { %6066 = vmatpush3.msra.mxu1 %v9520_v38  ;;  %6039 = vmatpush3.msra.mxu0 %v7507_v6  ;;  %v9527_v6 = vld [vmem:[#allocation16_spill] sm:$0xff] }
  0x84   : > { %6067 = vmatprep.subr.mxu1 %v9521_v13  ;;  %6040 = vmatprep.subr.mxu0 %v7528_v50  ;;  %v9529_v50 = vld [vmem:[#allocation19_spill] sm:$0xff] }
  0x85   : > { %6068 = vmatpush3.msra.mxu1 %v9522_v48  ;;  %6041 = vmatpush3.msra.mxu0 %v7539_v57  ;;  %v9530_v57 = vld [vmem:[#allocation22_spill] sm:$0xff] }
  0x86   : > { %6069 = vmatprep.subr.mxu1 %v7263_v39  ;;  %823 = vmatmul.mubr.f32.vlgmr.msra.gmra.mxu0 %v7453_v58  ;;  %v9531_v58 = vld [vmem:[#allocation25_spill] sm:$0xff] }
  0x87   : > { %6080 = vmatprep.subr.mxu0 %v9523_v32  ;;  %6070 = vmatpush3.msra.mxu1 %v9524_v2  ;;  %v9532_v32 = vld [vmem:[#allocation29_spill] sm:$0xff] }
  0x88   : > { %6081 = vmatpush3.msra.mxu0 %v9525_v52  ;;  %6071 = vmatprep.subr.mxu1 %v9526_v62  ;;  %v9534_v52 = vld [vmem:[#allocation113_spill] sm:$0xff] }
  0x89   : > { %6082 = vmatprep.subr.mxu0 %v9527_v6  ;;  %6072 = vmatpush3.msra.mxu1 %v9528_v44  ;;  %v9533_v6 = vld [vmem:[#allocation37_spill] sm:$0xff] }
  0x8a   : > { %6083 = vmatpush3.msra.mxu0 %v9529_v50  ;;  %6073 = vmatprep.subr.mxu1 %v7325_v56  ;;  %v9535_v50 = vld [vmem:[#allocation41_spill] sm:$0xff] }
  0x8b   : > { %6084 = vmatprep.subr.mxu0 %v9530_v57  ;;  %6074 = vmatpush3.msra.mxu1 %v7356_v43  ;;  %v9536_v57 = vld [vmem:[#allocation44_spill] sm:$0xff] }
  0x8c   : > { %6085 = vmatpush3.msra.mxu0 %v9531_v58  ;;  %6075 = vmatprep.subr.mxu1 %v7374_v20  ;;  %v9537_v58 = vld [vmem:[#allocation47_spill] sm:$0xff] }
  0x8d   : > { %6086 = vmatprep.subr.mxu0 %v9532_v32  ;;  %6076 = vmatpush3.msra.mxu1 %v7398_v30  ;;  %v9538_v32 = vld [vmem:[#allocation51_spill] sm:$0xff] }
  0x8e   : > { %927 = vmatprep.mubr.f32.mxu1 %v7487_v18  ;;  %6087 = vmatpush3.msra.mxu0 %v9533_v6  ;;  %v9539_v18 = vld [vmem:[#allocation54_spill] sm:$0xff] }
  0x8f   : > { %931 = vmatmul.mubr.f32.vlgmr.msra.gmra.mxu1 %v9534_v52  ;;  %6088 = vmatprep.subr.mxu0 %v9535_v50  ;;  %v9540_v52 = vld [vmem:[#allocation57_spill] sm:$0xff]  ;;  %v9541_v50 = vld [vmem:[#allocation63_spill] sm:$0xff] }
  0x90   : > { %6115 = vmatprep.subr.mxu1 %v6976_v3  ;;  %6089 = vmatpush3.msra.mxu0 %v9536_v57  ;;  %v9542_v57 = vld [vmem:[#allocation66_spill] sm:$0xff] }
  0x91   : > { %6116 = vmatpush3.msra.mxu1 %v6978_v4  ;;  %6090 = vmatprep.subr.mxu0 %v9537_v58  ;;  %v9543_v58 = vld [vmem:[#allocation72_spill] sm:$0xff] }
  0x92   : > { %6117 = vmatprep.subr.mxu1 %v6980_v5  ;;  %6091 = vmatpush3.msra.mxu0 %v9538_v32  ;;  %v9544_v32 = vld [vmem:[#allocation76_spill] sm:$0xff] }
  0x93   : > { %6118 = vmatpush3.msra.mxu1 %v6982_v9  ;;  %6092 = vmatprep.subr.mxu0 %v9539_v18  ;;  %v9545_v18 = vld [vmem:[#allocation80_spill] sm:$0xff] }
  0x94   : > { %6119 = vmatprep.subr.mxu1 %v6984_v10  ;;  %6093 = vmatpush3.msra.mxu0 %v9540_v52  ;;  %v9546_v52 = vld [vmem:[#allocation82_spill] sm:$0xff] }
  0x95   : > { %6120 = vmatpush3.msra.mxu1 %v6986_v11  ;;  %6094 = vmatprep.subr.mxu0 %v9541_v50  ;;  %v9547_v50 = vld [vmem:[#allocation86_spill] sm:$0xff] }
  0x96   : > { %6121 = vmatprep.subr.mxu1 %v6989_v15  ;;  %6095 = vmatpush3.msra.mxu0 %v9542_v57  ;;  %v9548_v57 = vld [vmem:[#allocation90_spill] sm:$0xff] }
  0x97   : > { %6122 = vmatpush3.msra.mxu1 %v6991_v16  ;;  %6096 = vmatprep.subr.mxu0 %v9543_v58  ;;  %v9549_v58 = vld [vmem:[#allocation96_spill] sm:$0xff] }
  0x98   : > { %6123 = vmatprep.subr.mxu1 %v6993_v17  ;;  %6097 = vmatpush3.msra.mxu0 %v9544_v32  ;;  %v9550_v32 = vld [vmem:[#allocation99_spill] sm:$0xff] }
  0x99   : > { %6124 = vmatpush3.msra.mxu1 %v7006_v22  ;;  %6098 = vmatprep.subr.mxu0 %v9545_v18  ;;  %v9551_v18 = vld [vmem:[#allocation105_spill] sm:$0xff] }
  0x9a   : > { %6125 = vmatprep.subr.mxu1 %v7012_v24  ;;  %6099 = vmatpush3.msra.mxu0 %v9546_v52  ;;  %v9552_v52 = vld [vmem:[#allocation110_spill] sm:$0xff] }
  0x9b   : > { %6126 = vmatpush3.msra.mxu1 %v9510_v63  ;;  %6100 = vmatprep.subr.mxu0 %v9547_v50  ;;  %v9553_v50 = vld [vmem:[#allocation114_spill] sm:$0xff] }
  0x9c   : > { %6127 = vmatprep.subr.mxu1 %v9511_v37  ;;  %6101 = vmatpush3.msra.mxu0 %v9548_v57  ;;  %v9554_v57 = vld [vmem:[#allocation116_spill] sm:$0xff] }
  0x9d   : > { %6128 = vmatpush3.msra.mxu1 %v9512_v26  ;;  %6102 = vmatprep.subr.mxu0 %v9549_v58 }
  0x9e   : > { %6129 = vmatprep.subr.mxu1 %v9513_v34  ;;  %6103 = vmatpush3.msra.mxu0 %v9550_v32 }
  0x9f   : > { %6130 = vmatpush3.msra.mxu1 %v9514_v29  ;;  %6104 = vmatprep.subr.mxu0 %v9551_v18 }
  0xa0   : > { %6131 = vmatprep.subr.mxu1 %v9515_v14  ;;  %6105 = vmatpush3.msra.mxu0 %v9552_v52  ;;  %v342_v52 = vld [vmem:[%s9015_s2] sm:$0xff] }
  0xa1   : > { %6132 = vmatpush3.msra.mxu1 %v9516_v60  ;;  %6106 = vmatprep.subr.mxu0 %v9553_v50  ;;  %v9555_v50 = vld [vmem:[#allocation103_spill] sm:$0xff]  ;;  %v7730_v32 = vand.u32 4294901760, %v342_v52 }
  0xa2   : > { %6133 = vmatprep.subr.mxu1 %v9517_v19  ;;  %6107 = vmatpush3.msra.mxu0 %v9554_v57 }
  0xa3   : > { %6134 = vmatpush3.msra.mxu1 %v9518_v41  ;;  %6108 = vmatprep.subr.mxu0 %v7516_v28  ;;  %v343_v28 = vld [vmem:[%s9015_s2 + $0x8] sm:$0xff]  ;;  %v7744_v55 = vsub.f32 %v342_v52, %v7730_v32 }
  0xa4   : > { %6135 = vmatprep.subr.mxu1 %v9519_v61  ;;  %6109 = vmatpush3.msra.mxu0 %v7524_v1 }
  0xa5   : > { %6136 = vmatpush3.msra.mxu1 %v9520_v38  ;;  %6110 = vmatprep.subr.mxu0 %v7545_v12  ;;  %v344_v12 = vld [vmem:[%s9015_s2 + $0x10] sm:$0xff]  ;;  %v7756_v21 = vand.u32 4294901760, %v7744_v55 }
  0xa6   : > { %6137 = vmatprep.subr.mxu1 %v9521_v13  ;;  %6111 = vmatpush3.msra.mxu0 %v7552_v33  ;;  %v7713_v1 = vand.u32 4294901760, %v344_v12 }
  0xa7   : > { %1097 = vmatprep.mubr.f32.mxu0 %v9555_v50  ;;  %6138 = vmatpush3.msra.mxu1 %v9522_v48  ;;  %9560 = vst [vmem:[#allocation26_spill] sm:$0xff] %v7756_v21  ;;  %v1342_v8 = vsub.f32 %v7744_v55, %v7756_v21 }
  0xa8   : > { %1099 = vmatmul.mubr.f32.vlgmr.msra.gmra.mxu0 %v7429_v53  ;;  %6139 = vmatprep.subr.mxu1 %v7263_v39  ;;  %v7728_v18 = vsub.f32 %v344_v12, %v7713_v1 }
  0xa9   : > { %1201 = vmatprep.mubr.f32.mxu1 %v9555_v50  ;;  %6140 = vmatpush3.msra.mxu1 %v9524_v2  ;;  %v345_v50 = vld [vmem:[%s9015_s2 + $0x18] sm:$0xff] }
  0xaa   : > { %6141 = vmatprep.subr.mxu1 %v9526_v62  ;;  %v7708_v33 = vand.u32 4294901760, %v345_v50  ;;  %v7741_v6 = vand.u32 4294901760, %v7728_v18 }
  0xab   : > { %6142 = vmatpush3.msra.mxu1 %v9528_v44 }
  0xac   : > { %6143 = vmatprep.subr.mxu1 %v7325_v56  ;;  %v7719_v57 = vsub.f32 %v345_v50, %v7708_v33  ;;  %1242 = vmatprep.subr.mxu0 %v7708_v33  ;;  %9558 = vst [vmem:[#allocation18_spill] sm:$0xff] %v7741_v6 }
  0xad   : > { %6144 = vmatpush3.msra.mxu1 %v7356_v43  ;;  %1244 = vmatpush1.msra.mxu0 %v7713_v1 }
  0xae   : > { %6145 = vmatprep.subr.mxu1 %v7374_v20  ;;  %9556 = vst [vmem:[#allocation12_spill] sm:$0xff] %v7719_v57  ;;  %v7734_v58 = vand.u32 4294901760, %v7719_v57 }
  0xaf   : > { %6146 = vmatpush3.msra.mxu1 %v7398_v30 }
  0xb0   : > { %1203 = vmatmul.mubr.f32.vlgmr.msra.gmra.mxu1 %v7429_v53  ;;  %v7721_v53 = vand.u32 4294901760, %v343_v28  ;;  %9557 = vst [vmem:[#allocation14_spill] sm:$0xff] %v7734_v58  ;;  %v1324_v12 = vsub.f32 %v7719_v57, %v7734_v58 }
  0xb2   : > { %v7737_v50 = vsub.f32 %v343_v28, %v7721_v53  ;;  %1246 = vmatprep.subr.mxu0 %v7721_v53  ;;  %v1330_v28 = vsub.f32 %v7728_v18, %v7741_v6  ;;  %v7758_v54 = vand.u32 4294901760, %v1324_v12  ;;  %v9197_v12 = vmov 0.0  }
  0xb3   : > { %1248 = vmatpush1.msra.mxu0 %v7730_v32  ;;  %1377 = vmatprep.mubr.f32.mxu1 %v9197_v12 }
  0xb4   : > { %v7750_v47 = vand.u32 4294901760, %v7737_v50  ;;  %1415 = vmatprep.subr.mxu0 %v7719_v57  ;;  %9561 = vst [vmem:[#allocation32_spill] sm:$0xff] %v7758_v54  ;;  %v7762_v42 = vand.u32 4294901760, %v1330_v28  ;;  %1326 = vmatprep.subr.mxu1 %v7758_v54  ;;  %v7770_v57 = vand.u32 4294901760, %v1342_v8 }
  0xb5   : > { %1281 = vmatprep.mubr.f32.mxu0 %v9197_v12 }
  0xb6   : > { %9559 = vst [vmem:[#allocation21_spill] sm:$0xff] %v7750_v47  ;;  %v1336_v52 = vsub.f32 %v7737_v50, %v7750_v47  ;;  %9562 = vst [vmem:[#allocation35_spill] sm:$0xff] %v7762_v42  ;;  %1332 = vmatpush1.msra.mxu1 %v7762_v42 }
  0xb7   : > { %9564 = vst [vmem:[#allocation43_spill] sm:$0xff] %v7770_v57 }
  0xb8   : > { %v7767_v0 = vand.u32 4294901760, %v1336_v52 }
  0xba   : > { %9563 = vst [vmem:[#allocation39_spill] sm:$0xff] %v7767_v0  ;;  %1338 = vmatprep.subr.mxu1 %v7767_v0 }
  0xbb   : > { %1344 = vmatpush1.msra.mxu1 %v7770_v57 }
  0xbc   : > { %1495 = vmatprep.subr.mxu1 %v7708_v33 }
 0x125   : > { %v5972_v28 = vpop.f32.mrf.mxu0 }
 0x127   : > { %v5973_v59 = vpop.f32.mrf.mxu0 }
 0x128   : > { %v5974_v0 = vadd.f32 %v5973_v59, %v5972_v28  ;;  %v9570_v59 = vld [vmem:[#allocation33_spill] sm:$0xff]  ;;  %v9584_v28 = vld [vmem:[#allocation92_spill] sm:$0xff] }
 0x12e   : > { %v6007_v54 = vpop.f32.mrf.mxu1 }
 0x130   : > { %v6008_v45 = vpop.f32.mrf.mxu1 }
 0x131   : > { %v6009_v35 = vadd.f32 %v6008_v45, %v6007_v54  ;;  %v9574_v54 = vld [vmem:[#allocation53_spill] sm:$0xff] }
 0x133   : > { %v687_v23 = vadd.f32 %v6009_v35, %v5974_v0  ;;  %v9567_v35 = vld [vmem:[#allocation27_spill] sm:$0xff]  ;;  %v9572_v0 = vld [vmem:[#allocation40_spill] sm:$0xff] }
 0x146   : > { %v6042_v52 = vpop.f32.mrf.mxu0 }
 0x148   : > { %v6043_v40 = vpop.f32.mrf.mxu0 }
 0x149   : > { %v6044_v25 = vadd.f32 %v6043_v40, %v6042_v52  ;;  %v9565_v40 = vmov 0.0   ;;  %v9585_v52 = vld [vmem:[#allocation95_spill] sm:$0xff] }
 0x14b   : > { %v825_v20 = vadd.f32 %v6044_v25, %v687_v23 }
 0x14f   : > { %v6077_v42 = vpop.f32.mrf.mxu1 }
 0x151   : > { %v6078_v31 = vpop.f32.mrf.mxu1 }
 0x152   : > { %v6079_v30 = vadd.f32 %v6078_v31, %v6077_v42  ;;  %v9566_v31 = vld [vmem:[#allocation24_spill] sm:$0xff]  ;;  %v9573_v42 = vld [vmem:[#allocation50_spill] sm:$0xff] }
 0x154   : > { %v933_v44 = vadd.f32 %v6079_v30, %v825_v20  ;;  %v9575_v20 = vld [vmem:[#allocation56_spill] sm:$0xff] }
 0x168   : > { %v6112_v8 = vpop.f32.mrf.mxu0 }
 0x16a   : > { %v6113_v57 = vpop.f32.mrf.mxu0 }
 0x16b   : > { %v6114_v43 = vadd.f32 %v6113_v57, %v6112_v8  ;;  %v9579_v57 = vld [vmem:[#allocation69_spill] sm:$0xff]  ;;  %v9586_v8 = vld [vmem:[#allocation98_spill] sm:$0xff] }
 0x16d   : > { %v1101_v62 = vadd.f32 %v6114_v43, %v933_v44  ;;  %v9569_v44 = vld [vmem:[#allocation30_spill] sm:$0xff]  ;;  %v9576_v43 = vld [vmem:[#allocation59_spill] sm:$0xff] }
 0x170   : > { %v6147_v56 = vpop.f32.mrf.mxu1 }
 0x172   : > { %v6148_v12 = vpop.f32.mrf.mxu1 }
 0x173   : > { %v6149_v49 = vadd.f32 %v6148_v12, %v6147_v56  ;;  %v9577_v56 = vld [vmem:[#allocation62_spill] sm:$0xff]  ;;  %v9583_v12 = vld [vmem:[#allocation89_spill] sm:$0xff] }
 0x175   : > { %v1205_v2 = vadd.f32 %v6149_v49, %v1101_v62  ;;  %v9571_v62 = vld [vmem:[#allocation36_spill] sm:$0xff]  ;;  %v9582_v49 = vld [vmem:[#allocation85_spill] sm:$0xff] }
 0x177   : > { %v1208_v27 = vmul.f32 0.0625, %v1205_v2  ;;  %v9578_v2 = vld [vmem:[#allocation65_spill] sm:$0xff] }
 0x179   : > { %v1211_v39 = vsel %vm1209_vm0, %v1208_v27, 0  ;;  %v9581_v27 = vld [vmem:[#allocation79_spill] sm:$0xff] }
 0x17a   : > { %v1282_v36 = vand.u32 4294901760, %v1211_v39 }
 0x17c   : > { %v1283_v45 = vsub.f32 %v1211_v39, %v1282_v36  ;;  %1379 = vmatmul.mubr.f32.vlgmr.msra.gmra.mxu1 %v1282_v36  ;;  %v9568_v39 = vld [vmem:[#allocation28_spill] sm:$0xff] }
 0x17d   : > { %1497 = vmatpush1.msra.mxu1 %v7713_v1  ;;  %1534 = vmatprep.mubr.f32.mxu1 %v9565_v40 }
 0x17e   : > { %1499 = vmatprep.subr.mxu1 %v7721_v53  ;;  %v1284_v23 = vand.u32 4294901760, %v1283_v45 }
 0x17f   : > { %1501 = vmatpush1.msra.mxu1 %v7730_v32 }
 0x180   : > { %1538 = vmatmul.mubr.f32.vlgmr.msra.gmra.mxu1 %v1284_v23  ;;  %1657 = vmatprep.subr.mxu1 %v7708_v33  ;;  %v1285_v25 = vsub.f32 %v1283_v45, %v1284_v23  ;;  %v9588_v23 = vld [vmem:[#allocation108_spill] sm:$0xff] }
 0x181   : > { %1659 = vmatpush1.msra.mxu1 %v7713_v1  ;;  %1696 = vmatprep.mubr.f32.mxu1 %v9565_v40 }
 0x182   : > { %1661 = vmatprep.subr.mxu1 %v7721_v53  ;;  %v1286_v30 = vand.u32 4294901760, %v1285_v25  ;;  %v9589_v25 = vld [vmem:[#allocation112_spill] sm:$0xff] }
 0x183   : > { %1663 = vmatpush1.msra.mxu1 %v7730_v32 }
 0x184   : > { %1287 = vmatmul.mubr.f32.vlgmr.msra.gmra.mxu0 %v1286_v30  ;;  %1698 = vmatmul.mubr.f32.vlgmr.msra.gmra.mxu1 %v1282_v36  ;;  %v9590_v30 = vld [vmem:[#allocation118_spill] sm:$0xff] }
 0x185   : > { %1418 = vmatpush1.msra.mxu0 %v7728_v18  ;;  %1457 = vmatprep.mubr.f32.mxu0 %v9565_v40 }
 0x186   : > { %1421 = vmatprep.subr.mxu0 %v7737_v50  ;;  %6185 = vmatprep.subr.mxu1 %v9566_v31  ;;  %v9591_v31 = vld [vmem:[#allocation122_spill] sm:$0xff] }
 0x187   : > { %1424 = vmatpush1.msra.mxu0 %v7744_v55  ;;  %6186 = vmatpush3.msra.mxu1 %v9567_v35  ;;  %v9592_v35 = vld [vmem:[#allocation129_spill] sm:$0xff] }
 0x188   : > { %1575 = vmatprep.subr.mxu0 %v7734_v58  ;;  %1460 = vmatmul.mubr.f32.vlgmr.msra.gmra.mxu0 %v1283_v45  ;;  %v9587_v45 = vld [vmem:[#allocation102_spill] sm:$0xff] }
 0x189   : > { %1579 = vmatpush1.msra.mxu0 %v7741_v6  ;;  %1620 = vmatprep.mubr.f32.mxu0 %v9565_v40 }
 0x18a   : > { %1583 = vmatprep.subr.mxu0 %v7750_v47  ;;  %6187 = vmatprep.subr.mxu1 %v9568_v39  ;;  %v9593_v39 = vld [vmem:[#allocation64_spill] sm:$0xff] }
 0x18b   : > { %1587 = vmatpush1.msra.mxu0 %v7756_v21  ;;  %6188 = vmatpush3.msra.mxu1 %v9569_v44  ;;  %v9594_v44 = vld [vmem:[#allocation130_spill] sm:$0xff] }
 0x18c   : > { %1622 = vmatmul.mubr.f32.vlgmr.msra.gmra.mxu0 %v1282_v36  ;;  %6189 = vmatprep.subr.mxu1 %v9570_v59  ;;  %v9580_v36 = vld [vmem:[#allocation75_spill] sm:$0xff] }
 0x18d   : > { %6190 = vmatpush3.msra.mxu1 %v9571_v62  ;;  %6150 = vmatprep.subr.mxu0 %v6976_v3  ;;  %v9596_v59 = vld [vmem:[#allocation131_spill] sm:$0xff] }
 0x18e   : > { %6191 = vmatprep.subr.mxu1 %v9572_v0  ;;  %6151 = vmatpush3.msra.mxu0 %v6978_v4  ;;  %v9597_v62 = vld [vmem:[#allocation71_spill] sm:$0xff]  ;;  %v9599_v0 = vld [vmem:[#allocation78_spill] sm:$0xff] }
 0x18f   : > { %6192 = vmatpush3.msra.mxu1 %v9573_v42  ;;  %6152 = vmatprep.subr.mxu0 %v6980_v5  ;;  %v9601_v42 = vld [vmem:[#allocation87_spill] sm:$0xff] }
 0x190   : > { %6193 = vmatprep.subr.mxu1 %v9574_v54  ;;  %6153 = vmatpush3.msra.mxu0 %v6982_v9  ;;  %v9602_v54 = vld [vmem:[#allocation93_spill] sm:$0xff] }
 0x191   : > { %6194 = vmatpush3.msra.mxu1 %v9575_v20  ;;  %6154 = vmatprep.subr.mxu0 %v6984_v10  ;;  %v9603_v20 = vld [vmem:[#allocation8_spill] sm:$0xff] }
 0x192   : > { %6195 = vmatprep.subr.mxu1 %v9576_v43  ;;  %6155 = vmatpush3.msra.mxu0 %v6986_v11 }
 0x193   : > { %6196 = vmatpush3.msra.mxu1 %v9577_v56  ;;  %6156 = vmatprep.subr.mxu0 %v6989_v15 }
 0x194   : > { %6197 = vmatprep.subr.mxu1 %v9578_v2  ;;  %6157 = vmatpush3.msra.mxu0 %v6991_v16 }
 0x195   : > { %6198 = vmatpush3.msra.mxu1 %v9579_v57  ;;  %6158 = vmatprep.subr.mxu0 %v6993_v17 }
 0x196   : > { %6199 = vmatprep.subr.mxu1 %v9580_v36  ;;  %6159 = vmatpush3.msra.mxu0 %v7006_v22 }
 0x197   : > { %6200 = vmatpush3.msra.mxu1 %v9581_v27  ;;  %6160 = vmatprep.subr.mxu0 %v7012_v24 }
 0x198   : > { %6201 = vmatprep.subr.mxu1 %v9582_v49  ;;  %6161 = vmatpush3.msra.mxu0 %v9510_v63 }
 0x199   : > { %6202 = vmatpush3.msra.mxu1 %v9583_v12  ;;  %6162 = vmatprep.subr.mxu0 %v9511_v37 }
 0x19a   : > { %6203 = vmatprep.subr.mxu1 %v9584_v28  ;;  %6163 = vmatpush3.msra.mxu0 %v9512_v26 }
 0x19b   : > { %6204 = vmatpush3.msra.mxu1 %v9585_v52  ;;  %6164 = vmatprep.subr.mxu0 %v9513_v34 }
 0x19c   : > { %6205 = vmatprep.subr.mxu1 %v9586_v8  ;;  %6165 = vmatpush3.msra.mxu0 %v9514_v29 }
 0x19d   : > { %6206 = vmatpush3.msra.mxu1 %v9587_v45  ;;  %6166 = vmatprep.subr.mxu0 %v9515_v14 }
 0x19e   : > { %6207 = vmatprep.subr.mxu1 %v9588_v23  ;;  %6167 = vmatpush3.msra.mxu0 %v9516_v60 }
 0x19f   : > { %6208 = vmatpush3.msra.mxu1 %v9589_v25  ;;  %6168 = vmatprep.subr.mxu0 %v9517_v19 }
 0x1a0   : > { %6209 = vmatprep.subr.mxu1 %v9590_v30  ;;  %6169 = vmatpush3.msra.mxu0 %v9518_v41 }
 0x1a1   : > { %6210 = vmatpush3.msra.mxu1 %v7511_v46  ;;  %6170 = vmatprep.subr.mxu0 %v9519_v61  ;;  %v9595_v46 = vld [vmem:[#allocation68_spill] sm:$0xff] }
 0x1a2   : > { %6211 = vmatprep.subr.mxu1 %v9591_v31  ;;  %6171 = vmatpush3.msra.mxu0 %v9520_v38 }
 0x1a3   : > { %6212 = vmatpush3.msra.mxu1 %v7533_v7  ;;  %6172 = vmatprep.subr.mxu0 %v9521_v13  ;;  %v9598_v7 = vld [vmem:[#allocation74_spill] sm:$0xff] }
 0x1a4   : > { %6213 = vmatprep.subr.mxu1 %v7549_v51  ;;  %6173 = vmatpush3.msra.mxu0 %v9522_v48  ;;  %v9600_v51 = vld [vmem:[#allocation83_spill] sm:$0xff] }
 0x1a5   : > { %6214 = vmatpush3.msra.mxu1 %v9592_v35  ;;  %6174 = vmatprep.subr.mxu0 %v9593_v39 }
 0x1a6   : > { %6215 = vmatprep.subr.mxu1 %v9594_v44  ;;  %6175 = vmatpush3.msra.mxu0 %v9595_v46 }
 0x1a7   : > { %6216 = vmatpush3.msra.mxu1 %v9596_v59  ;;  %6176 = vmatprep.subr.mxu0 %v9597_v62 }
 0x1a8   : > { %6255 = vmatprep.subr.mxu1 %v6976_v3  ;;  %6177 = vmatpush3.msra.mxu0 %v9598_v7 }
 0x1a9   : > { %6178 = vmatprep.subr.mxu0 %v9599_v0 }
 0x1aa   : > { %6179 = vmatpush3.msra.mxu0 %v9600_v51 }
 0x1ab   : > { %6180 = vmatprep.subr.mxu0 %v9601_v42 }
 0x1ac   : > { %6181 = vmatpush3.msra.mxu0 %v9602_v54 }
 0x1ad   : > { %6220 = vmatprep.subr.mxu0 %v9603_v20 }
 0x23c   : > { %v1380_v43 = vpop.f32.mrf.mxu1 }
 0x23e   : > { %v1382_v56 = vpop.f32.mrf.mxu1 }
 0x240   : > { %v1539_v2 = vpop.f32.mrf.mxu1 }
 0x242   : > { %v1541_v49 = vpop.f32.mrf.mxu1 }
 0x244   : > { %v1288_v57 = vpop.f32.mrf.mxu0  ;;  %v1699_v25 = vpop.f32.mrf.mxu1 }
 0x245   : > { %v1381_v27 = vadd.f32 %v1380_v43, %v1288_v57  ;;  %v9605_v43 = vld [vmem:[#allocation88_spill] sm:$0xff] }
 0x246   : > { %v1290_v36 = vpop.f32.mrf.mxu0  ;;  %v1701_v20 = vpop.f32.mrf.mxu1 }
 0x247   : > { %v1383_v28 = vadd.f32 %v1382_v56, %v1290_v36 }
 0x248   : > { %v1461_v12 = vpop.f32.mrf.mxu0 }
 0x249   : > { %v1462_v52 = vadd.f32 %v1461_v12, %v1381_v27 }
 0x24a   : > { %v1463_v8 = vpop.f32.mrf.mxu0 }
 0x24b   : > { %v1464_v45 = vadd.f32 %v1463_v8, %v1383_v28  ;;  %v1540_v23 = vadd.f32 %v1539_v2, %v1462_v52  ;;  %v9606_v8 = vld [vmem:[#allocation9_spill] sm:$0xff] }
 0x24c   : > { %v1623_v30 = vpop.f32.mrf.mxu0 }
 0x24d   : > { %v1624_v31 = vadd.f32 %v1623_v30, %v1540_v23  ;;  %v1542_v35 = vadd.f32 %v1541_v49, %v1464_v45  ;;  %v9607_v45 = vld [vmem:[#allocation10_spill] sm:$0xff]  ;;  %v9608_v23 = vld [vmem:[#allocation13_spill] sm:$0xff]  ;;  %v9610_v30 = vld [vmem:[#allocation20_spill] sm:$0xff] }
 0x24e   : > { %v1625_v44 = vpop.f32.mrf.mxu0 }
 0x24f   : > { %v1626_v59 = vadd.f32 %v1625_v44, %v1542_v35  ;;  %v1700_v21 = vadd.f32 %v1699_v25, %v1624_v31  ;;  %v9609_v25 = vld [vmem:[#allocation17_spill] sm:$0xff]  ;;  %v9611_v31 = vld [vmem:[#allocation23_spill] sm:$0xff]  ;;  %v9613_v44 = vld [vmem:[#allocation34_spill] sm:$0xff] }
 0x250   : > { %v9612_v35 = vld [vmem:[#allocation31_spill] sm:$0xff] }
 0x251   : > { %v1702_v47 = vadd.f32 %v1701_v20, %v1626_v59  ;;  %v9614_v59 = vld [vmem:[#allocation38_spill] sm:$0xff] }
 0x252   : > { %v9615_v20 = vld [vmem:[#allocation42_spill] sm:$0xff] }
 0x253   : > { %v7862_v6 = vcombine.low %v1700_v21, %v1702_v47 }
 0x255   : > { %9604 = vst [vmem:[#allocation46_spill] sm:$0xff] %v7862_v6  ;;  %v1709_v57 = vsub.f32 %v9605_v43, %v7862_v6  ;;  %v9616_v43 = vld [vmem:[#allocation45_spill] sm:$0xff] }
 0x257   : > { %v1710_v58 = vmul.f32 %v1709_v57, %v1709_v57  ;;  %v9617_v57 = vld [vmem:[#allocation48_spill] sm:$0xff] }
 0x259   : > { %v1712_v56 = vcombine.high %v1710_v58, %v1710_v58  ;;  %v7866_v36 = vand.u32 4294901760, %v1710_v58 }
 0x25b   : > { %v7868_v27 = vand.u32 4294901760, %v1712_v56  ;;  %v7871_v2 = vsub.f32 %v1710_v58, %v7866_v36 }
 0x25d   : > { %2051 = vmatprep.mubr.f32.mxu1 %v7868_v27  ;;  %v1811_v49 = vsub.f32 %v1712_v56, %v7868_v27  ;;  %v1818_v12 = vand.u32 4294901760, %v7871_v2  ;;  %v9618_v56 = vld [vmem:[#allocation52_spill] sm:$0xff] }
 0x25e   : > { %2053 = vmatmul.mubr.f32.vlgmr.msra.gmra.mxu1 %v7866_v36 }
 0x25f   : > { %6256 = vmatpush3.msra.mxu1 %v6978_v4  ;;  %v1812_v47 = vand.u32 4294901760, %v1811_v49  ;;  %v1819_v21 = vsub.f32 %v7871_v2, %v1818_v12 }
 0x260   : > { %6257 = vmatprep.subr.mxu1 %v6980_v5 }
 0x261   : > { %6258 = vmatpush3.msra.mxu1 %v6982_v9  ;;  %2295 = vmatprep.mubr.f32.mxu1 %v1812_v47  ;;  %v1813_v58 = vsub.f32 %v1811_v49, %v1812_v47  ;;  %v1820_v52 = vand.u32 4294901760, %v1819_v21  ;;  %v9620_v47 = vld [vmem:[#allocation61_spill] sm:$0xff]  ;;  %v9621_v21 = vld [vmem:[#allocation67_spill] sm:$0xff] }
 0x262   : > { %6259 = vmatprep.subr.mxu1 %v6984_v10 }
 0x263   : > { %6260 = vmatpush3.msra.mxu1 %v6986_v11  ;;  %v1814_v28 = vand.u32 4294901760, %v1813_v58  ;;  %v9622_v58 = vld [vmem:[#allocation70_spill] sm:$0xff] }
 0x264   : > { %6261 = vmatprep.subr.mxu1 %v6989_v15 }
 0x265   : > { %6262 = vmatpush3.msra.mxu1 %v6991_v16  ;;  %1815 = vmatprep.mubr.f32.mxu0 %v1814_v28  ;;  %v9623_v28 = vld [vmem:[#allocation73_spill] sm:$0xff] }
 0x266   : > { %6263 = vmatprep.subr.mxu1 %v6993_v17  ;;  %1821 = vmatmul.mubr.f32.vlgmr.msra.gmra.mxu0 %v1820_v52  ;;  %v9624_v52 = vld [vmem:[#allocation77_spill] sm:$0xff] }
 0x267   : > { %6221 = vmatpush3.msra.mxu0 %v9606_v8  ;;  %6264 = vmatpush3.msra.mxu1 %v7006_v22  ;;  %v9625_v8 = vld [vmem:[#allocation81_spill] sm:$0xff] }
 0x268   : > { %6222 = vmatprep.subr.mxu0 %v9607_v45  ;;  %2188 = vmatprep.mubr.f32.mxu0 %v1811_v49  ;;  %v9619_v49 = vld [vmem:[#allocation58_spill] sm:$0xff]  ;;  %v9626_v45 = vld [vmem:[#allocation84_spill] sm:$0xff] }
 0x269   : > { %6265 = vmatprep.subr.mxu1 %v7012_v24  ;;  %6223 = vmatpush3.msra.mxu0 %v9608_v23  ;;  %v9627_v23 = vld [vmem:[#allocation91_spill] sm:$0xff] }
 0x26a   : > { %6266 = vmatpush3.msra.mxu1 %v9510_v63  ;;  %6224 = vmatprep.subr.mxu0 %v9609_v25  ;;  %v9628_v25 = vld [vmem:[#allocation94_spill] sm:$0xff] }
 0x26b   : > { %6267 = vmatprep.subr.mxu1 %v9511_v37  ;;  %6225 = vmatpush3.msra.mxu0 %v9610_v30  ;;  %v9629_v30 = vld [vmem:[#allocation100_spill] sm:$0xff] }
 0x26c   : > { %6268 = vmatpush3.msra.mxu1 %v9512_v26  ;;  %6226 = vmatprep.subr.mxu0 %v9611_v31  ;;  %v9630_v31 = vld [vmem:[#allocation104_spill] sm:$0xff] }
 0x26d   : > { %6269 = vmatprep.subr.mxu1 %v9513_v34  ;;  %6227 = vmatpush3.msra.mxu0 %v9612_v35  ;;  %v9631_v35 = vld [vmem:[#allocation107_spill] sm:$0xff] }
 0x26e   : > { %6270 = vmatpush3.msra.mxu1 %v9514_v29  ;;  %6228 = vmatprep.subr.mxu0 %v9613_v44  ;;  %v9632_v44 = vld [vmem:[#allocation111_spill] sm:$0xff] }
 0x26f   : > { %6271 = vmatprep.subr.mxu1 %v9515_v14  ;;  %6229 = vmatpush3.msra.mxu0 %v9614_v59  ;;  %v9633_v59 = vld [vmem:[#allocation117_spill] sm:$0xff] }
 0x270   : > { %6272 = vmatpush3.msra.mxu1 %v9516_v60  ;;  %6230 = vmatprep.subr.mxu0 %v9615_v20  ;;  %v9667_v20 = vld [vmem:[#allocation120_spill] sm:$0xff] }
 0x271   : > { %6273 = vmatprep.subr.mxu1 %v9517_v19  ;;  %6231 = vmatpush3.msra.mxu0 %v9616_v43  ;;  %v9669_v43 = vld [vmem:[#allocation123_spill] sm:$0xff] }
 0x272   : > { %6274 = vmatpush3.msra.mxu1 %v9518_v41  ;;  %6232 = vmatprep.subr.mxu0 %v9617_v57  ;;  %v9671_v57 = vld [vmem:[#allocation127_spill] sm:$0xff] }
 0x273   : > { %6275 = vmatprep.subr.mxu1 %v9519_v61  ;;  %6233 = vmatpush3.msra.mxu0 %v9618_v56  ;;  %v9672_v56 = vld [vmem:[#allocation128_spill] sm:$0xff] }
 0x274   : > { %6276 = vmatpush3.msra.mxu1 %v9520_v38  ;;  %6234 = vmatprep.subr.mxu0 %v9619_v49  ;;  %v9673_v49 = vld [vmem:[#allocation12_spill] sm:$0xff] }
 0x275   : > { %6277 = vmatprep.subr.mxu1 %v9521_v13  ;;  %6235 = vmatpush3.msra.mxu0 %v9620_v47 }
 0x276   : > { %6278 = vmatpush3.msra.mxu1 %v9522_v48  ;;  %6236 = vmatprep.subr.mxu0 %v9621_v21 }
 0x277   : > { %6279 = vmatprep.subr.mxu1 %v9593_v39  ;;  %6237 = vmatpush3.msra.mxu0 %v9622_v58 }
 0x278   : > { %6280 = vmatpush3.msra.mxu1 %v9595_v46  ;;  %6238 = vmatprep.subr.mxu0 %v9623_v28 }
 0x279   : > { %6281 = vmatprep.subr.mxu1 %v9597_v62  ;;  %6239 = vmatpush3.msra.mxu0 %v9624_v52 }
 0x27a   : > { %6282 = vmatpush3.msra.mxu1 %v9598_v7  ;;  %6240 = vmatprep.subr.mxu0 %v9625_v8 }
 0x27b   : > { %6283 = vmatprep.subr.mxu1 %v9599_v0  ;;  %6241 = vmatpush3.msra.mxu0 %v9626_v45 }
 0x27c   : > { %6284 = vmatpush3.msra.mxu1 %v9600_v51  ;;  %6242 = vmatprep.subr.mxu0 %v9627_v23 }
 0x27d   : > { %6285 = vmatprep.subr.mxu1 %v9601_v42  ;;  %6243 = vmatpush3.msra.mxu0 %v9628_v25 }
 0x27e   : > { %6286 = vmatpush3.msra.mxu1 %v9602_v54  ;;  %6244 = vmatprep.subr.mxu0 %v9629_v30 }
 0x27f   : > { %2299 = vmatmul.mubr.f32.vlgmr.msra.gmra.mxu1 %v1818_v12  ;;  %6325 = vmatprep.subr.mxu1 %v6976_v3  ;;  %v9634_v12 = vld [vmem:[#allocation119_spill] sm:$0xff]  ;;  %v9635_v3 = vld [vmem:[#allocation124_spill] sm:$0xff] }
 0x280   : > { %6245 = vmatpush3.msra.mxu0 %v9630_v31  ;;  %6326 = vmatpush3.msra.mxu1 %v6978_v4  ;;  %v9636_v4 = vld [vmem:[#allocation126_spill] sm:$0xff] }
 0x281   : > { %2569 = vmatprep.mubr.f32.mxu1 %v7868_v27  ;;  %6246 = vmatprep.subr.mxu0 %v9631_v35 }
 0x282   : > { %6327 = vmatprep.subr.mxu1 %v6980_v5  ;;  %6247 = vmatpush3.msra.mxu0 %v9632_v44  ;;  %v9637_v5 = vld [vmem:[#allocation11_spill] sm:$0xff] }
 0x283   : > { %6328 = vmatpush3.msra.mxu1 %v6982_v9  ;;  %6248 = vmatprep.subr.mxu0 %v9633_v59  ;;  %v9638_v9 = vld [vmem:[#allocation15_spill] sm:$0xff] }
 0x284   : > { %6329 = vmatprep.subr.mxu1 %v6984_v10  ;;  %6249 = vmatpush3.msra.mxu0 %v9634_v12  ;;  %v9639_v10 = vld [vmem:[#allocation16_spill] sm:$0xff] }
 0x285   : > { %6330 = vmatpush3.msra.mxu1 %v6986_v11  ;;  %6250 = vmatprep.subr.mxu0 %v9635_v3  ;;  %v9640_v11 = vld [vmem:[#allocation19_spill] sm:$0xff] }
 0x286   : > { %6331 = vmatprep.subr.mxu1 %v6989_v15  ;;  %6251 = vmatpush3.msra.mxu0 %v9636_v4  ;;  %v9641_v15 = vld [vmem:[#allocation22_spill] sm:$0xff] }
 0x287   : > { %6332 = vmatpush3.msra.mxu1 %v6991_v16  ;;  %2191 = vmatmul.mubr.f32.vlgmr.msra.gmra.mxu0 %v7871_v2  ;;  %v9642_v16 = vld [vmem:[#allocation25_spill] sm:$0xff]  ;;  %v9665_v2 = vld [vmem:[#allocation116_spill] sm:$0xff] }
 0x288   : > { %6290 = vmatprep.subr.mxu0 %v9637_v5  ;;  %6333 = vmatprep.subr.mxu1 %v6993_v17  ;;  %v9643_v17 = vld [vmem:[#allocation29_spill] sm:$0xff] }
 0x289   : > { %6291 = vmatpush3.msra.mxu0 %v9638_v9  ;;  %2465 = vmatprep.mubr.f32.mxu0 %v7868_v27  ;;  %v9663_v27 = vld [vmem:[#allocation114_spill] sm:$0xff] }
 0x28a   : > { %6334 = vmatpush3.msra.mxu1 %v7006_v22  ;;  %6292 = vmatprep.subr.mxu0 %v9639_v10  ;;  %v9644_v22 = vld [vmem:[#allocation37_spill] sm:$0xff] }
 0x28b   : > { %6335 = vmatprep.subr.mxu1 %v7012_v24  ;;  %6293 = vmatpush3.msra.mxu0 %v9640_v11  ;;  %v9645_v24 = vld [vmem:[#allocation41_spill] sm:$0xff] }
 0x28c   : > { %6336 = vmatpush3.msra.mxu1 %v9510_v63  ;;  %6294 = vmatprep.subr.mxu0 %v9641_v15  ;;  %v9646_v63 = vld [vmem:[#allocation44_spill] sm:$0xff] }
 0x28d   : > { %6337 = vmatprep.subr.mxu1 %v9511_v37  ;;  %6295 = vmatpush3.msra.mxu0 %v9642_v16  ;;  %v9647_v37 = vld [vmem:[#allocation47_spill] sm:$0xff] }
 0x28e   : > { %6338 = vmatpush3.msra.mxu1 %v9512_v26  ;;  %6296 = vmatprep.subr.mxu0 %v9643_v17  ;;  %v9648_v26 = vld [vmem:[#allocation51_spill] sm:$0xff] }
 0x28f   : > { %6339 = vmatprep.subr.mxu1 %v9513_v34  ;;  %6297 = vmatpush3.msra.mxu0 %v9644_v22  ;;  %v9649_v34 = vld [vmem:[#allocation54_spill] sm:$0xff]  ;;  %v3109_v22 = vld [vmem:[#allocation4 + $0xf8] sm:$0xff] }
 0x290   : > { %6340 = vmatpush3.msra.mxu1 %v9514_v29  ;;  %6298 = vmatprep.subr.mxu0 %v9645_v24  ;;  %v9650_v29 = vld [vmem:[#allocation57_spill] sm:$0xff]  ;;  %v8025_v24 = vand.u32 4294901760, %v3109_v22 }
 0x291   : > { %6341 = vmatprep.subr.mxu1 %v9515_v14  ;;  %6299 = vmatpush3.msra.mxu0 %v9646_v63  ;;  %v9651_v14 = vld [vmem:[#allocation63_spill] sm:$0xff] }
 0x292   : > { %6342 = vmatpush3.msra.mxu1 %v9516_v60  ;;  %6300 = vmatprep.subr.mxu0 %v9647_v37  ;;  %v9652_v60 = vld [vmem:[#allocation66_spill] sm:$0xff]  ;;  %v3093_v63 = vld [vmem:[#allocation4 + $0x78] sm:$0xff] }
 0x293   : > { %6343 = vmatprep.subr.mxu1 %v9517_v19  ;;  %6301 = vmatpush3.msra.mxu0 %v9648_v26  ;;  %v9653_v19 = vld [vmem:[#allocation72_spill] sm:$0xff]  ;;  %v3108_v37 = vld [vmem:[#allocation4 + $0xf0] sm:$0xff]  ;;  %v8027_v26 = vand.u32 4294901760, %v3093_v63 }
 0x294   : > { %6344 = vmatpush3.msra.mxu1 %v9518_v41  ;;  %6302 = vmatprep.subr.mxu0 %v9649_v34  ;;  %v9654_v41 = vld [vmem:[#allocation76_spill] sm:$0xff]  ;;  %v8030_v34 = vsub.f32 %v3109_v22, %v8025_v24 }
 0x295   : > { %6345 = vmatprep.subr.mxu1 %v9519_v61  ;;  %6303 = vmatpush3.msra.mxu0 %v9650_v29  ;;  %v9655_v61 = vld [vmem:[#allocation80_spill] sm:$0xff]  ;;  %v3092_v29 = vld [vmem:[#allocation4 + $0x70] sm:$0xff] }
 0x296   : > { %6346 = vmatpush3.msra.mxu1 %v9520_v38  ;;  %6304 = vmatprep.subr.mxu0 %v9651_v14  ;;  %v9656_v38 = vld [vmem:[#allocation82_spill] sm:$0xff]  ;;  %9674 = vst [vmem:[#allocation49_spill] sm:$0xff] %v8030_v34  ;;  %v8032_v14 = vand.u32 4294901760, %v3108_v37 }
 0x297   : > { %6347 = vmatprep.subr.mxu1 %v9521_v13  ;;  %6305 = vmatpush3.msra.mxu0 %v9652_v60  ;;  %v9657_v13 = vld [vmem:[#allocation86_spill] sm:$0xff]  ;;  %v3107_v60 = vld [vmem:[#allocation4 + $0xe8] sm:$0xff] }
 0x298   : > { %6348 = vmatpush3.msra.mxu1 %v9522_v48  ;;  %6306 = vmatprep.subr.mxu0 %v9653_v19  ;;  %v9658_v48 = vld [vmem:[#allocation90_spill] sm:$0xff]  ;;  %v8035_v19 = vsub.f32 %v3093_v63, %v8027_v26 }
 0x299   : > { %6349 = vmatprep.subr.mxu1 %v9593_v39  ;;  %6307 = vmatpush3.msra.mxu0 %v9654_v41  ;;  %v9659_v39 = vld [vmem:[#allocation96_spill] sm:$0xff]  ;;  %v8037_v41 = vand.u32 4294901760, %v3092_v29 }
 0x29a   : > { %6350 = vmatpush3.msra.mxu1 %v9595_v46  ;;  %6308 = vmatprep.subr.mxu0 %v9655_v61  ;;  %v9660_v46 = vld [vmem:[#allocation99_spill] sm:$0xff]  ;;  %9675 = vst [vmem:[#allocation55_spill] sm:$0xff] %v8035_v19  ;;  %v3091_v61 = vld [vmem:[#allocation4 + $0x68] sm:$0xff] }
 0x29b   : > { %6351 = vmatprep.subr.mxu1 %v9597_v62  ;;  %6309 = vmatpush3.msra.mxu0 %v9656_v38  ;;  %v9661_v62 = vld [vmem:[#allocation105_spill] sm:$0xff]  ;;  %v8040_v38 = vand.u32 4294901760, %v8030_v34 }
 0x29c   : > { %6352 = vmatpush3.msra.mxu1 %v9598_v7  ;;  %6310 = vmatprep.subr.mxu0 %v9657_v13  ;;  %v9662_v7 = vld [vmem:[#allocation110_spill] sm:$0xff]  ;;  %v3106_v13 = vld [vmem:[#allocation4 + $0xe0] sm:$0xff] }
 0x29d   : > { %6353 = vmatprep.subr.mxu1 %v9599_v0  ;;  %6311 = vmatpush3.msra.mxu0 %v9658_v48  ;;  %v9664_v0 = vld [vmem:[#allocation32_spill] sm:$0xff]  ;;  %9676 = vst [vmem:[#allocation60_spill] sm:$0xff] %v8040_v38  ;;  %v8043_v48 = vsub.f32 %v3108_v37, %v8032_v14 }
 0x29e   : > { %6354 = vmatpush3.msra.mxu1 %v9600_v51  ;;  %6312 = vmatprep.subr.mxu0 %v9659_v39  ;;  %v9666_v51 = vld [vmem:[#allocation35_spill] sm:$0xff]  ;;  %v8045_v39 = vand.u32 4294901760, %v3107_v60 }
 0x29f   : > { %6355 = vmatprep.subr.mxu1 %v9601_v42  ;;  %6313 = vmatpush3.msra.mxu0 %v9660_v46  ;;  %v9668_v42 = vld [vmem:[#allocation39_spill] sm:$0xff]  ;;  %9677 = vst [vmem:[#allocation24_spill] sm:$0xff] %v8043_v48  ;;  %v3090_v46 = vld [vmem:[#allocation4 + $0x60] sm:$0xff] }
 0x2a0   : > { %6356 = vmatpush3.msra.mxu1 %v9602_v54  ;;  %6314 = vmatprep.subr.mxu0 %v9661_v62  ;;  %v9670_v54 = vld [vmem:[#allocation43_spill] sm:$0xff]  ;;  %9678 = vst [vmem:[#allocation27_spill] sm:$0xff] %v8045_v39  ;;  %v8047_v62 = vand.u32 4294901760, %v3091_v61 }
 0x2a1   : > { %2571 = vmatmul.mubr.f32.vlgmr.msra.gmra.mxu1 %v7866_v36  ;;  %6315 = vmatpush3.msra.mxu0 %v9662_v7  ;;  %v3105_v7 = vld [vmem:[#allocation4 + $0xd8] sm:$0xff] }
 0x2a2   : > { %6316 = vmatprep.subr.mxu0 %v9663_v27  ;;  %2695 = vmatprep.subr.mxu1 %v9664_v0  ;;  %9679 = vst [vmem:[#allocation28_spill] sm:$0xff] %v8047_v62  ;;  %v8050_v27 = vand.u32 4294901760, %v8035_v19  ;;  %v8053_v0 = vsub.f32 %v3092_v29, %v8037_v41 }
 0x2a3   : > { %6317 = vmatpush3.msra.mxu0 %v9665_v2  ;;  %2701 = vmatpush1.msra.mxu1 %v9666_v51  ;;  %v8055_v2 = vand.u32 4294901760, %v3106_v13  ;;  %v3089_v51 = vld [vmem:[#allocation4 + $0x58] sm:$0xff] }
 0x2a4   : > { %6318 = vmatprep.subr.mxu0 %v9667_v20  ;;  %2707 = vmatprep.subr.mxu1 %v9668_v42  ;;  %9680 = vst [vmem:[#allocation30_spill] sm:$0xff] %v8050_v27  ;;  %9681 = vst [vmem:[#allocation33_spill] sm:$0xff] %v8053_v0  ;;  %v3342_v42 = vsub.f32 %v8030_v34, %v8040_v38  ;;  %v9718_v38 = vld [vmem:[#allocation18_spill] sm:$0xff] }
 0x2a5   : > { %6319 = vmatpush3.msra.mxu0 %v9669_v43  ;;  %2713 = vmatpush1.msra.mxu1 %v9670_v54  ;;  %v8059_v43 = vand.u32 4294901760, %v3090_v46  ;;  %v3104_v54 = vld [vmem:[#allocation4 + $0xd0] sm:$0xff] }
 0x2a6   : > { %6320 = vmatprep.subr.mxu0 %v9671_v57  ;;  %2746 = vmatprep.mubr.f32.mxu1 %v9565_v40 }
 0x2a7   : > { %6321 = vmatpush3.msra.mxu0 %v9672_v56  ;;  %2864 = vmatprep.subr.mxu1 %v7708_v33  ;;  %9682 = vst [vmem:[#allocation36_spill] sm:$0xff] %v8059_v43  ;;  %v8063_v56 = vand.u32 4294901760, %v8043_v48 }
 0x2a8   : > { %2467 = vmatmul.mubr.f32.vlgmr.msra.gmra.mxu0 %v7866_v36  ;;  %2611 = vmatprep.subr.mxu0 %v7708_v33 }
 0x2a9   : > { %2613 = vmatpush1.msra.mxu0 %v7713_v1  ;;  %2650 = vmatprep.mubr.f32.mxu0 %v9565_v40  ;;  %9683 = vst [vmem:[#allocation40_spill] sm:$0xff] %v8063_v56 }
 0x2aa   : > { %2615 = vmatprep.subr.mxu0 %v7721_v53 }
 0x2ab   : > { %2617 = vmatpush1.msra.mxu0 %v7730_v32 }
 0x2ac   : > { %2784 = vmatprep.subr.mxu0 %v9673_v49  ;;  %v8066_v49 = vsub.f32 %v3107_v60, %v8045_v39 }
 0x2ae   : > { %9684 = vst [vmem:[#allocation50_spill] sm:$0xff] %v8066_v49 }
 0x31e   : > { %v6217_v21 = vpop.f32.mrf.mxu1 }
 0x320   : > { %v6218_v52 = vpop.f32.mrf.mxu1 }
 0x321   : > { %v6219_v23 = vadd.f32 %v6218_v52, %v6217_v21  ;;  %v3088_v21 = vld [vmem:[#allocation4 + $0x50] sm:$0xff]  ;;  %v8075_v52 = vand.u32 4294901760, %v3089_v51 }
 0x326   : > { %v6182_v47 = vpop.f32.mrf.mxu0 }
 0x328   : > { %v6183_v58 = vpop.f32.mrf.mxu0 }
 0x329   : > { %v6184_v36 = vadd.f32 %v6183_v58, %v6182_v47  ;;  %v8068_v47 = vand.u32 4294901760, %v3105_v7 }
 0x32b   : > { %v2055_v31 = vadd.f32 %v6219_v23, %v6184_v36  ;;  %v8080_v36 = vand.u32 4294901760, %v8053_v0  ;;  %v8083_v23 = vsub.f32 %v3106_v13, %v8055_v2 }
 0x32d   : > { %9686 = vst [vmem:[#allocation56_spill] sm:$0xff] %v8080_v36  ;;  %9687 = vst [vmem:[#allocation59_spill] sm:$0xff] %v8083_v23  ;;  %v8124_v63 = vand.u32 4294901760, %v8083_v23 }
 0x32f   : > { %9695 = vst [vmem:[#allocation92_spill] sm:$0xff] %v8124_v63 }
 0x33f   : > { %v6287_v8 = vpop.f32.mrf.mxu1 }
 0x341   : > { %v6288_v30 = vpop.f32.mrf.mxu1 }
 0x342   : > { %v6289_v12 = vadd.f32 %v6288_v30, %v6287_v8  ;;  %v3103_v8 = vld [vmem:[#allocation4 + $0xc8] sm:$0xff] }
 0x343   : > { %v3087_v30 = vld [vmem:[#allocation4 + $0x48] sm:$0xff] }
 0x347   : > { %v6252_v28 = vpop.f32.mrf.mxu0 }
 0x349   : > { %v6253_v45 = vpop.f32.mrf.mxu0 }
 0x34a   : > { %v6254_v25 = vadd.f32 %v6253_v45, %v6252_v28  ;;  %v8073_v28 = vsub.f32 %v3091_v61, %v8047_v62  ;;  %v3230_v45 = vsub.f32 %v8035_v19, %v8050_v27  ;;  %v3237_v61 = vsub.f32 %v8053_v0, %v8080_v36  ;;  %v3099_v36 = vld [vmem:[#allocation4 + $0xa8] sm:$0xff] }
 0x34c   : > { %v2193_v44 = vadd.f32 %v6254_v25, %v2055_v31  ;;  %9685 = vst [vmem:[#allocation53_spill] sm:$0xff] %v8073_v28  ;;  %v8085_v25 = vand.u32 4294901760, %v3104_v54  ;;  %v8121_v22 = vand.u32 4294901760, %v3230_v45  ;;  %v8174_v6 = vand.u32 4294901760, %v3237_v61 }
 0x34e   : > { %v2301_v5 = vadd.f32 %v6289_v12, %v2193_v44  ;;  %v8094_v44 = vsub.f32 %v3090_v46, %v8059_v43  ;;  %v3102_v12 = vld [vmem:[#allocation4 + $0xc0] sm:$0xff]  ;;  %9694 = vst [vmem:[#allocation89_spill] sm:$0xff] %v8121_v22  ;;  %v8127_v37 = vsub.f32 %v3104_v54, %v8085_v25  ;;  %9706 = vst [vmem:[#allocation68_spill] sm:$0xff] %v8174_v6 }
 0x34f   : > { %v8129_v29 = vand.u32 4294901760, %v3102_v12 }
 0x350   : > { %9689 = vst [vmem:[#allocation65_spill] sm:$0xff] %v8094_v44  ;;  %9696 = vst [vmem:[#allocation95_spill] sm:$0xff] %v8127_v37  ;;  %v8136_v13 = vand.u32 4294901760, %v8094_v44 }
 0x352   : > { %9697 = vst [vmem:[#allocation98_spill] sm:$0xff] %v8136_v13 }
 0x361   : > { %v6357_v35 = vpop.f32.mrf.mxu1 }
 0x363   : > { %v6358_v3 = vpop.f32.mrf.mxu1 }
 0x364   : > { %v6359_v10 = vadd.f32 %v6358_v3, %v6357_v35  ;;  %v8091_v35 = vand.u32 4294901760, %v3342_v42  ;;  %v3349_v3 = vsub.f32 %v8043_v48, %v8063_v56  ;;  %v3101_v42 = vld [vmem:[#allocation4 + $0xb8] sm:$0xff]  ;;  %v9715_v56 = vld [vmem:[#allocation14_spill] sm:$0xff] }
 0x366   : > { %9688 = vst [vmem:[#allocation62_spill] sm:$0xff] %v8091_v35  ;;  %v8163_v45 = vand.u32 4294901760, %v3349_v3  ;;  %v8181_v3 = vand.u32 4294901760, %v3101_v42 }
 0x368   : > { %v6322_v59 = vpop.f32.mrf.mxu0  ;;  %9703 = vst [vmem:[#allocation129_spill] sm:$0xff] %v8163_v45 }
 0x36a   : > { %v6323_v4 = vpop.f32.mrf.mxu0 }
 0x36b   : > { %v6324_v9 = vadd.f32 %v6323_v4, %v6322_v59  ;;  %v8096_v59 = vand.u32 4294901760, %v3088_v21  ;;  %v8103_v4 = vand.u32 4294901760, %v8066_v49 }
 0x36d   : > { %v2469_v11 = vadd.f32 %v6324_v9, %v2301_v5  ;;  %9690 = vst [vmem:[#allocation69_spill] sm:$0xff] %v8103_v4  ;;  %v8106_v5 = vsub.f32 %v3105_v7, %v8068_v47  ;;  %v8108_v9 = vand.u32 4294901760, %v3103_v8  ;;  %v8139_v46 = vsub.f32 %v3088_v21, %v8096_v59 }
 0x36e   : > { %v3356_v7 = vsub.f32 %v8066_v49, %v8103_v4 }
 0x36f   : > { %v2573_v15 = vadd.f32 %v6359_v10, %v2469_v11  ;;  %9691 = vst [vmem:[#allocation75_spill] sm:$0xff] %v8106_v5  ;;  %v8113_v11 = vand.u32 4294901760, %v8073_v28  ;;  %9698 = vst [vmem:[#allocation102_spill] sm:$0xff] %v8139_v46 }
 0x371   : > { %v2576_v16 = vmul.f32 0.06666667, %v2573_v15  ;;  %9692 = vst [vmem:[#allocation79_spill] sm:$0xff] %v8113_v11  ;;  %v8116_v15 = vsub.f32 %v3089_v51, %v8075_v52  ;;  %v8149_v51 = vsub.f32 %v3103_v8, %v8108_v9  ;;  %v3363_v8 = vsub.f32 %v8083_v23, %v8124_v63  ;;  %v3100_v63 = vld [vmem:[#allocation4 + $0xb0] sm:$0xff] }
 0x373   : > { %v2577_v17 = vadd.f32 1e-08, %v2576_v16  ;;  %9693 = vst [vmem:[#allocation85_spill] sm:$0xff] %v8116_v15  ;;  %v8118_v16 = vand.u32 4294901760, %v3087_v30  ;;  %9700 = vst [vmem:[#allocation112_spill] sm:$0xff] %v8149_v51  ;;  %v8190_v61 = vand.u32 4294901760, %v8149_v51 }
 0x375   : > { %6813 = vrsqrt.f32 %v2577_v17  ;;  %v3086_v17 = vld [vmem:[#allocation4 + $0x40] sm:$0xff]  ;;  %v8160_v21 = vsub.f32 %v3087_v30, %v8118_v16  ;;  %v8179_v30 = vand.u32 4294901760, %v8139_v46  ;;  %9709 = vst [vmem:[#allocation74_spill] sm:$0xff] %v8190_v61 }
 0x377   : > { %9702 = vst [vmem:[#allocation122_spill] sm:$0xff] %v8160_v21  ;;  %9707 = vst [vmem:[#allocation131_spill] sm:$0xff] %v8179_v30 }
 0x382   : > { %v6814_v20 = vpop.eup %6813 }
 0x383   : > { %v2580_v57 = vsel %vm1209_vm0, %v6814_v20, 0  ;;  %v8151_v20 = vand.u32 4294901760, %v3086_v17 }
 0x384   : > { %v8070_v58 = vand.u32 4294901760, %v2580_v57 }
 0x386   : > { %v8088_v31 = vsub.f32 %v2580_v57, %v8070_v58  ;;  %2748 = vmatmul.mubr.f32.vlgmr.msra.gmra.mxu1 %v8070_v58  ;;  %v8157_v57 = vand.u32 4294901760, %v8116_v15 }
 0x387   : > { %2866 = vmatpush1.msra.mxu1 %v7713_v1  ;;  %2903 = vmatprep.mubr.f32.mxu1 %v9565_v40 }
 0x388   : > { %2868 = vmatprep.subr.mxu1 %v7721_v53  ;;  %v2653_v10 = vand.u32 4294901760, %v8088_v31  ;;  %9701 = vst [vmem:[#allocation118_spill] sm:$0xff] %v8157_v57 }
 0x389   : > { %2870 = vmatpush1.msra.mxu1 %v7730_v32 }
 0x38a   : > { %2907 = vmatmul.mubr.f32.vlgmr.msra.gmra.mxu1 %v2653_v10  ;;  %3026 = vmatprep.subr.mxu1 %v7708_v33  ;;  %v2654_v60 = vsub.f32 %v8088_v31, %v2653_v10  ;;  %v8146_v33 = vand.u32 4294901760, %v8106_v5  ;;  %v8168_v10 = vand.u32 4294901760, %v8127_v37 }
 0x38b   : > { %3028 = vmatpush1.msra.mxu1 %v7713_v1  ;;  %3065 = vmatprep.mubr.f32.mxu1 %v9565_v40  ;;  %v3244_v1 = vsub.f32 %v8073_v28, %v8113_v11  ;;  %v3084_v11 = vld [vmem:[#allocation4 + $0x30] sm:$0xff] }
 0x38c   : > { %9699 = vst [vmem:[#allocation108_spill] sm:$0xff] %v8146_v33  ;;  %3030 = vmatprep.subr.mxu1 %v7721_v53  ;;  %v2655_v54 = vand.u32 4294901760, %v2654_v60  ;;  %9704 = vst [vmem:[#allocation64_spill] sm:$0xff] %v8168_v10  ;;  %v8171_v53 = vsub.f32 %v3102_v12, %v8129_v29  ;;  %v3085_v60 = vld [vmem:[#allocation4 + $0x38] sm:$0xff]  ;;  %v8185_v12 = vand.u32 4294901760, %v3356_v7  ;;  %v8202_v7 = vand.u32 4294901760, %v8160_v21 }
 0x38d   : > { %3032 = vmatpush1.msra.mxu1 %v7730_v32  ;;  %v3251_v32 = vsub.f32 %v8094_v44, %v8136_v13  ;;  %v8193_v13 = vsub.f32 %v3086_v17, %v8151_v20  ;;  %v8197_v4 = vand.u32 4294901760, %v3244_v1  ;;  %v8208_v17 = vand.u32 4294901760, %v3363_v8  ;;  %v3079_v44 = vld [vmem:[#allocation4 + $0x8] sm:$0xff] }
 0x38e   : > { %9705 = vst [vmem:[#allocation130_spill] sm:$0xff] %v8171_v53  ;;  %2656 = vmatmul.mubr.f32.vlgmr.msra.gmra.mxu0 %v2655_v54  ;;  %3067 = vmatmul.mubr.f32.vlgmr.msra.gmra.mxu1 %v8070_v58  ;;  %9708 = vst [vmem:[#allocation71_spill] sm:$0xff] %v8185_v12  ;;  %v3370_v54 = vsub.f32 %v8106_v5, %v8146_v33  ;;  %v8204_v33 = vand.u32 4294901760, %v3085_v60  ;;  %v8213_v1 = vand.u32 4294901760, %v8171_v53 }
 0x38f   : > { %2787 = vmatpush1.msra.mxu0 %v7728_v18  ;;  %2826 = vmatprep.mubr.f32.mxu0 %v9565_v40  ;;  %9710 = vst [vmem:[#allocation78_spill] sm:$0xff] %v8193_v13  ;;  %9711 = vst [vmem:[#allocation83_spill] sm:$0xff] %v8197_v4  ;;  %v3258_v18 = vsub.f32 %v8116_v15, %v8157_v57  ;;  %v3083_v57 = vld [vmem:[#allocation4 + $0x28] sm:$0xff]  ;;  %v8219_v27 = vand.u32 4294901760, %v3251_v32  ;;  %v8224_v8 = vsub.f32 %v3101_v42, %v8181_v3 }
 0x390   : > { %2790 = vmatprep.subr.mxu0 %v7737_v50  ;;  %6395 = vmatprep.subr.mxu1 %v8091_v35  ;;  %9712 = vst [vmem:[#allocation87_spill] sm:$0xff] %v8202_v7  ;;  %9713 = vst [vmem:[#allocation93_spill] sm:$0xff] %v8208_v17  ;;  %v3377_v50 = vsub.f32 %v8127_v37, %v8168_v10  ;;  %v8215_v35 = vand.u32 4294901760, %v3100_v63  ;;  %v3098_v10 = vld [vmem:[#allocation4 + $0xa0] sm:$0xff]  ;;  %v8230_v37 = vand.u32 4294901760, %v3370_v54  ;;  %v8237_v32 = vand.u32 4294901760, %v3099_v36 }
 0x391   : > { %2793 = vmatpush1.msra.mxu0 %v7744_v55  ;;  %6396 = vmatpush3.msra.mxu1 %v8121_v22  ;;  %9714 = vst [vmem:[#allocation8_spill] sm:$0xff] %v8213_v1  ;;  %9716 = vst [vmem:[#allocation88_spill] sm:$0xff] %v8219_v27  ;;  %v3265_v55 = vsub.f32 %v8139_v46, %v8179_v30  ;;  %v8226_v22 = vand.u32 4294901760, %v3084_v11  ;;  %v3082_v30 = vld [vmem:[#allocation4 + $0x20] sm:$0xff]  ;;  %v9721_v42 = vld [vmem:[#allocation21_spill] sm:$0xff]  ;;  %v8241_v46 = vand.u32 4294901760, %v3258_v18 }
 0x392   : > { %2944 = vmatprep.subr.mxu0 %v9715_v56  ;;  %2829 = vmatmul.mubr.f32.vlgmr.msra.gmra.mxu0 %v8088_v31  ;;  %9717 = vst [vmem:[#allocation9_spill] sm:$0xff] %v8224_v8  ;;  %9719 = vst [vmem:[#allocation10_spill] sm:$0xff] %v8230_v37  ;;  %v3384_v56 = vsub.f32 %v8149_v51, %v8190_v61  ;;  %v8235_v31 = vand.u32 4294901760, %v8193_v13  ;;  %v8246_v54 = vsub.f32 %v3085_v60, %v8204_v33  ;;  %v3097_v61 = vld [vmem:[#allocation4 + $0x98] sm:$0xff]  ;;  %v9725_v51 = vld [vmem:[#allocation26_spill] sm:$0xff] }
 0x393   : > { %2948 = vmatpush1.msra.mxu0 %v9718_v38  ;;  %2989 = vmatprep.mubr.f32.mxu0 %v9565_v40  ;;  %9722 = vst [vmem:[#allocation17_spill] sm:$0xff] %v8241_v46  ;;  %v3272_v38 = vsub.f32 %v8160_v21, %v8202_v7  ;;  %v8248_v40 = vand.u32 4294901760, %v3083_v57  ;;  %v8252_v15 = vand.u32 4294901760, %v3377_v50  ;;  %v8257_v18 = vsub.f32 %v3100_v63, %v8215_v35  ;;  %v3081_v7 = vld [vmem:[#allocation4 + $0x18] sm:$0xff]  ;;  %v3080_v21 = vld [vmem:[#allocation4 + $0x10] sm:$0xff] }
 0x394   : > { %9720 = vst [vmem:[#allocation13_spill] sm:$0xff] %v8235_v31  ;;  %2952 = vmatprep.subr.mxu0 %v9721_v42  ;;  %6397 = vmatprep.subr.mxu1 %v8163_v45  ;;  %9723 = vst [vmem:[#allocation20_spill] sm:$0xff] %v8246_v54  ;;  %v3391_v42 = vsub.f32 %v8171_v53, %v8213_v1  ;;  %v8259_v45 = vand.u32 4294901760, %v3098_v10  ;;  %v8263_v60 = vand.u32 4294901760, %v3265_v55  ;;  %v3096_v1 = vld [vmem:[#allocation4 + $0x90] sm:$0xff]  ;;  %v8275_v63 = vand.u32 4294901760, %v3384_v56 }
 0x395   : > { %9724 = vst [vmem:[#allocation23_spill] sm:$0xff] %v8248_v40  ;;  %2956 = vmatpush1.msra.mxu0 %v9725_v51  ;;  %6398 = vmatpush3.msra.mxu1 %v8174_v6  ;;  %9726 = vst [vmem:[#allocation31_spill] sm:$0xff] %v8252_v15  ;;  %v8266_v51 = vand.u32 4294901760, %v8224_v8  ;;  %v8269_v50 = vsub.f32 %v3084_v11, %v8226_v22  ;;  %v8271_v6 = vand.u32 4294901760, %v3082_v30  ;;  %v8282_v53 = vand.u32 4294901760, %v3097_v61 }
 0x396   : > { %9727 = vst [vmem:[#allocation34_spill] sm:$0xff] %v8257_v18  ;;  %9728 = vst [vmem:[#allocation38_spill] sm:$0xff] %v8259_v45  ;;  %6360 = vmatprep.subr.mxu0 %v8025_v24  ;;  %2991 = vmatmul.mubr.f32.vlgmr.msra.gmra.mxu0 %v8070_v58  ;;  %v3279_v58 = vsub.f32 %v8193_v13, %v8235_v31  ;;  %v8280_v55 = vsub.f32 %v3099_v36, %v8237_v32  ;;  %v8286_v11 = vand.u32 4294901760, %v3272_v38  ;;  %v3095_v31 = vld [vmem:[#allocation4 + $0x88] sm:$0xff] }
 0x397   : > { %9729 = vst [vmem:[#allocation42_spill] sm:$0xff] %v8263_v60  ;;  %9730 = vst [vmem:[#allocation45_spill] sm:$0xff] %v8266_v51  ;;  %6361 = vmatpush3.msra.mxu0 %v8027_v26  ;;  %6399 = vmatprep.subr.mxu1 %v8185_v12  ;;  %v8289_v5 = vand.u32 4294901760, %v8246_v54  ;;  %v8292_v56 = vsub.f32 %v3083_v57, %v8248_v40  ;;  %v8294_v12 = vand.u32 4294901760, %v3081_v7  ;;  %v8298_v36 = vand.u32 4294901760, %v3391_v42 }
 0x398   : > { %9731 = vst [vmem:[#allocation48_spill] sm:$0xff] %v8269_v50  ;;  %9732 = vst [vmem:[#allocation52_spill] sm:$0xff] %v8271_v6  ;;  %6362 = vmatprep.subr.mxu0 %v8032_v14  ;;  %6400 = vmatpush3.msra.mxu1 %v8197_v4  ;;  %v8301_v13 = vand.u32 4294901760, %v8257_v18  ;;  %v8304_v38 = vsub.f32 %v3098_v10, %v8259_v45  ;;  %v8306_v4 = vand.u32 4294901760, %v3096_v1  ;;  %v8318_v23 = vand.u32 4294901760, %v3080_v21  ;;  %v3094_v10 = vld [vmem:[#allocation4 + $0x80] sm:$0xff] }
 0x399   : > { %9733 = vst [vmem:[#allocation58_spill] sm:$0xff] %v8275_v63  ;;  %9734 = vst [vmem:[#allocation61_spill] sm:$0xff] %v8280_v55  ;;  %6363 = vmatpush3.msra.mxu0 %v8037_v41  ;;  %6401 = vmatprep.subr.mxu1 %v8208_v17  ;;  %v3398_v57 = vsub.f32 %v8224_v8, %v8266_v51  ;;  %v8313_v17 = vand.u32 4294901760, %v8269_v50  ;;  %v8316_v42 = vsub.f32 %v3082_v30, %v8271_v6 }
 0x39a   : > { %9735 = vst [vmem:[#allocation67_spill] sm:$0xff] %v8282_v53  ;;  %9736 = vst [vmem:[#allocation70_spill] sm:$0xff] %v8286_v11  ;;  %6364 = vmatprep.subr.mxu0 %v8045_v39  ;;  %6402 = vmatpush3.msra.mxu1 %v8219_v27  ;;  %v8322_v28 = vand.u32 4294901760, %v3279_v58  ;;  %v8325_v27 = vand.u32 4294901760, %v8280_v55  ;;  %v8328_v51 = vsub.f32 %v3097_v61, %v8282_v53  ;;  %v8330_v8 = vand.u32 4294901760, %v3095_v31  ;;  %v3078_v39 = vld [vmem:[#allocation4] sm:$0xff] }
 0x39b   : > { %9737 = vst [vmem:[#allocation73_spill] sm:$0xff] %v8289_v5  ;;  %9738 = vst [vmem:[#allocation77_spill] sm:$0xff] %v8292_v56  ;;  %6365 = vmatpush3.msra.mxu0 %v8047_v62  ;;  %6403 = vmatprep.subr.mxu1 %v8230_v37  ;;  %v3286_v30 = vsub.f32 %v8246_v54, %v8289_v5  ;;  %v8337_v62 = vand.u32 4294901760, %v8292_v56  ;;  %v8340_v58 = vsub.f32 %v3081_v7, %v8294_v12 }
 0x39c   : > { %9739 = vst [vmem:[#allocation81_spill] sm:$0xff] %v8294_v12  ;;  %9740 = vst [vmem:[#allocation84_spill] sm:$0xff] %v8298_v36  ;;  %6366 = vmatprep.subr.mxu0 %v8055_v2  ;;  %6404 = vmatpush3.msra.mxu1 %v8241_v46  ;;  %v8342_v37 = vand.u32 4294901760, %v3079_v44  ;;  %v3405_v61 = vsub.f32 %v8257_v18, %v8301_v13  ;;  %v8349_v46 = vand.u32 4294901760, %v8304_v38  ;;  %v8354_v54 = vand.u32 4294901760, %v3094_v10 }
 0x39d   : > { %9741 = vst [vmem:[#allocation91_spill] sm:$0xff] %v8301_v13  ;;  %9742 = vst [vmem:[#allocation94_spill] sm:$0xff] %v8304_v38  ;;  %6367 = vmatpush3.msra.mxu0 %v8059_v43  ;;  %6405 = vmatprep.subr.mxu1 %v8252_v15  ;;  %v8352_v5 = vsub.f32 %v3096_v1, %v8306_v4  ;;  %v8358_v7 = vand.u32 4294901760, %v3398_v57  ;;  %v3293_v15 = vsub.f32 %v8269_v50, %v8313_v17 }
 0x39e   : > { %9743 = vst [vmem:[#allocation100_spill] sm:$0xff] %v8306_v4  ;;  %9744 = vst [vmem:[#allocation104_spill] sm:$0xff] %v8313_v17  ;;  %6368 = vmatprep.subr.mxu0 %v8068_v47  ;;  %6406 = vmatpush3.msra.mxu1 %v8263_v60  ;;  %v8363_v43 = vand.u32 4294901760, %v8316_v42  ;;  %v8366_v13 = vsub.f32 %v3080_v21, %v8318_v23  ;;  %v3412_v1 = vsub.f32 %v8280_v55, %v8325_v27 }
 0x39f   : > { %9745 = vst [vmem:[#allocation107_spill] sm:$0xff] %v8316_v42  ;;  %9746 = vst [vmem:[#allocation111_spill] sm:$0xff] %v8318_v23  ;;  %6369 = vmatpush3.msra.mxu0 %v8075_v52  ;;  %6407 = vmatprep.subr.mxu1 %v8275_v63  ;;  %v8373_v60 = vand.u32 4294901760, %v8328_v51  ;;  %v8376_v57 = vsub.f32 %v3095_v31, %v8330_v8  ;;  %v8378_v17 = vand.u32 4294901760, %v3078_v39  ;;  %v8382_v21 = vand.u32 4294901760, %v3286_v30 }
 0x3a0   : > { %9747 = vst [vmem:[#allocation117_spill] sm:$0xff] %v8322_v28  ;;  %9748 = vst [vmem:[#allocation119_spill] sm:$0xff] %v8325_v27  ;;  %6370 = vmatprep.subr.mxu0 %v8085_v25  ;;  %6408 = vmatpush3.msra.mxu1 %v8286_v11  ;;  %v3300_v63 = vsub.f32 %v8292_v56, %v8337_v62  ;;  %v8387_v50 = vand.u32 4294901760, %v8340_v58  ;;  %v8390_v27 = vsub.f32 %v3079_v44, %v8342_v37 }
 0x3a1   : > { %9749 = vst [vmem:[#allocation124_spill] sm:$0xff] %v8328_v51  ;;  %9750 = vst [vmem:[#allocation126_spill] sm:$0xff] %v8330_v8  ;;  %6371 = vmatpush3.msra.mxu0 %v8096_v59  ;;  %6409 = vmatprep.subr.mxu1 %v8298_v36  ;;  %v8394_v31 = vand.u32 4294901760, %v3405_v61  ;;  %v3419_v11 = vsub.f32 %v8304_v38, %v8349_v46  ;;  %v8399_v30 = vand.u32 4294901760, %v8352_v5  ;;  %v8406_v44 = vand.u32 4294901760, %v3293_v15 }
 0x3a2   : > { %9751 = vst [vmem:[#allocation11_spill] sm:$0xff] %v8337_v62  ;;  %9752 = vst [vmem:[#allocation15_spill] sm:$0xff] %v8340_v58  ;;  %v8402_v62 = vsub.f32 %v3094_v10, %v8354_v54  ;;  %6372 = vmatprep.subr.mxu0 %v8108_v9  ;;  %6410 = vmatpush3.msra.mxu1 %v8322_v28  ;;  %v3307_v36 = vsub.f32 %v8316_v42, %v8363_v43  ;;  %v8411_v61 = vand.u32 4294901760, %v8366_v13 }
 0x3a3   : > { %9753 = vst [vmem:[#allocation16_spill] sm:$0xff] %v8342_v37  ;;  %9754 = vst [vmem:[#allocation19_spill] sm:$0xff] %v8349_v46  ;;  %6373 = vmatpush3.msra.mxu0 %v8118_v16  ;;  %6411 = vmatprep.subr.mxu1 %v8358_v7  ;;  %v8415_v46 = vand.u32 4294901760, %v3412_v1  ;;  %v3426_v10 = vsub.f32 %v8328_v51, %v8373_v60  ;;  %v8420_v38 = vand.u32 4294901760, %v8376_v57  ;;  %v8427_v28 = vand.u32 4294901760, %v3300_v63 }
 0x3a4   : > { %9755 = vst [vmem:[#allocation22_spill] sm:$0xff] %v8352_v5  ;;  %9756 = vst [vmem:[#allocation25_spill] sm:$0xff] %v8354_v54  ;;  %v8423_v15 = vsub.f32 %v3078_v39, %v8378_v17  ;;  %6374 = vmatprep.subr.mxu0 %v8129_v29  ;;  %6412 = vmatpush3.msra.mxu1 %v8382_v21  ;;  %v8432_v1 = vand.u32 4294901760, %v8390_v27  ;;  %v3433_v39 = vsub.f32 %v8352_v5, %v8399_v30 }
 0x3a5   : > { %9757 = vst [vmem:[#allocation29_spill] sm:$0xff] %v8358_v7  ;;  %9758 = vst [vmem:[#allocation37_spill] sm:$0xff] %v8363_v43  ;;  %v3314_v7 = vsub.f32 %v8340_v58, %v8387_v50  ;;  %6375 = vmatpush3.msra.mxu0 %v8151_v20  ;;  %6413 = vmatprep.subr.mxu1 %v8394_v31  ;;  %v8441_v43 = vand.u32 4294901760, %v8402_v62  ;;  %v8445_v63 = vand.u32 4294901760, %v3307_v36 }
 0x3a6   : > { %9759 = vst [vmem:[#allocation41_spill] sm:$0xff] %v8366_v13  ;;  %9760 = vst [vmem:[#allocation44_spill] sm:$0xff] %v8373_v60  ;;  %v8436_v60 = vand.u32 4294901760, %v3419_v11  ;;  %6376 = vmatprep.subr.mxu0 %v8181_v3  ;;  %6414 = vmatpush3.msra.mxu1 %v8406_v44  ;;  %v8451_v11 = vand.u32 4294901760, %v3426_v10  ;;  %v8466_v10 = vand.u32 4294901760, %v3433_v39 }
 0x3a7   : > { %9761 = vst [vmem:[#allocation47_spill] sm:$0xff] %v8376_v57  ;;  %9762 = vst [vmem:[#allocation51_spill] sm:$0xff] %v8378_v17  ;;  %6377 = vmatpush3.msra.mxu0 %v8204_v33  ;;  %6415 = vmatprep.subr.mxu1 %v8415_v46  ;;  %v8460_v36 = vand.u32 4294901760, %v3314_v7 }
 0x3a8   : > { %9763 = vst [vmem:[#allocation54_spill] sm:$0xff] %v8382_v21  ;;  %9764 = vst [vmem:[#allocation57_spill] sm:$0xff] %v8387_v50  ;;  %v3321_v21 = vsub.f32 %v8366_v13, %v8411_v61  ;;  %6378 = vmatprep.subr.mxu0 %v8215_v35  ;;  %6416 = vmatpush3.msra.mxu1 %v8427_v28 }
 0x3a9   : > { %9765 = vst [vmem:[#allocation63_spill] sm:$0xff] %v8390_v27  ;;  %9766 = vst [vmem:[#allocation66_spill] sm:$0xff] %v8394_v31  ;;  %v3440_v31 = vsub.f32 %v8376_v57, %v8420_v38  ;;  %6379 = vmatpush3.msra.mxu0 %v8226_v22  ;;  %6417 = vmatprep.subr.mxu1 %v8436_v60 }
 0x3aa   : > { %9767 = vst [vmem:[#allocation72_spill] sm:$0xff] %v8399_v30  ;;  %9768 = vst [vmem:[#allocation76_spill] sm:$0xff] %v8402_v62  ;;  %v8456_v30 = vand.u32 4294901760, %v8423_v15  ;;  %6380 = vmatprep.subr.mxu0 %v8237_v32  ;;  %6418 = vmatpush3.msra.mxu1 %v8445_v63 }
 0x3ab   : > { %9769 = vst [vmem:[#allocation80_spill] sm:$0xff] %v8406_v44  ;;  %9770 = vst [vmem:[#allocation82_spill] sm:$0xff] %v8411_v61  ;;  %v3328_v44 = vsub.f32 %v8390_v27, %v8432_v1  ;;  %6381 = vmatpush3.msra.mxu0 %v8248_v40  ;;  %6419 = vmatprep.subr.mxu1 %v8451_v11  ;;  %v8476_v7 = vand.u32 4294901760, %v3440_v31 }
 0x3ac   : > { %9771 = vst [vmem:[#allocation86_spill] sm:$0xff] %v8415_v46  ;;  %9772 = vst [vmem:[#allocation90_spill] sm:$0xff] %v8420_v38  ;;  %v3447_v46 = vsub.f32 %v8402_v62, %v8441_v43  ;;  %v8472_v38 = vand.u32 4294901760, %v3321_v21  ;;  %6382 = vmatprep.subr.mxu0 %v8259_v45  ;;  %6420 = vmatpush3.msra.mxu1 %v8460_v36 }
 0x3ad   : > { %9773 = vst [vmem:[#allocation96_spill] sm:$0xff] %v8423_v15  ;;  %9774 = vst [vmem:[#allocation99_spill] sm:$0xff] %v8432_v1  ;;  %v8482_v39 = vand.u32 4294901760, %v3328_v44  ;;  %6383 = vmatpush3.msra.mxu0 %v8271_v6  ;;  %6421 = vmatprep.subr.mxu1 %v8466_v10  ;;  %v9786_v44 = vld [vmem:[#allocation101_spill] sm:$0xff] }
 0x3ae   : > { %9775 = vst [vmem:[#allocation105_spill] sm:$0xff] %v8436_v60  ;;  %9776 = vst [vmem:[#allocation110_spill] sm:$0xff] %v8441_v43  ;;  %v3335_v60 = vsub.f32 %v8423_v15, %v8456_v30  ;;  %v8486_v21 = vand.u32 4294901760, %v3447_v46  ;;  %6384 = vmatprep.subr.mxu0 %v8282_v53  ;;  %6422 = vmatpush3.msra.mxu1 %v8472_v38  ;;  %v9784_v46 = vld [vmem:[#allocation125_spill] sm:$0xff] }
 0x3af   : > { %9777 = vst [vmem:[#allocation114_spill] sm:$0xff] %v8456_v30  ;;  %9778 = vst [vmem:[#allocation32_spill] sm:$0xff] %v8466_v10  ;;  %6385 = vmatpush3.msra.mxu0 %v8294_v12  ;;  %6423 = vmatprep.subr.mxu1 %v8476_v7 }
 0x3b0   : > { %9779 = vst [vmem:[#allocation116_spill] sm:$0xff] %v8472_v38  ;;  %9780 = vst [vmem:[#allocation35_spill] sm:$0xff] %v8476_v7  ;;  %v8492_v31 = vand.u32 4294901760, %v3335_v60  ;;  %6386 = vmatprep.subr.mxu0 %v8306_v4  ;;  %6424 = vmatpush3.msra.mxu1 %v8482_v39  ;;  %v9785_v60 = vld [vmem:[#allocation103_spill] sm:$0xff] }
 0x3b1   : > { %9781 = vst [vmem:[#allocation120_spill] sm:$0xff] %v8482_v39  ;;  %9782 = vst [vmem:[#allocation39_spill] sm:$0xff] %v8486_v21  ;;  %6387 = vmatpush3.msra.mxu0 %v8318_v23  ;;  %6425 = vmatprep.subr.mxu1 %v8486_v21  ;;  %v9787_v39 = vld [vmem:[#allocation121_spill] sm:$0xff]  ;;  %v9794_v21 = vld [vmem:[#allocation75_spill] sm:$0xff] }
 0x3b2   : > { %9783 = vst [vmem:[#allocation123_spill] sm:$0xff] %v8492_v31  ;;  %6388 = vmatprep.subr.mxu0 %v8330_v8  ;;  %3215 = vmatprep.mubr.f32.mxu0 %v9784_v46  ;;  %v9788_v46 = vld [vmem:[#allocation27_spill] sm:$0xff] }
 0x3b3   : > { %6389 = vmatpush3.msra.mxu0 %v8342_v37  ;;  %6426 = vmatpush3.msra.mxu1 %v8492_v31  ;;  %v9791_v31 = vld [vmem:[#allocation59_spill] sm:$0xff] }
 0x3b4   : > { %6390 = vmatprep.subr.mxu0 %v8354_v54  ;;  %3451 = vmatprep.mubr.f32.mxu1 %v9785_v60 }
 0x3b5   : > { %6391 = vmatpush3.msra.mxu0 %v8378_v17  ;;  %3453 = vmatmul.mubr.f32.vlgmr.msra.gmra.mxu1 %v9786_v44 }
 0x3b6   : > { %3221 = vmatmul.mubr.f32.vlgmr.msra.gmra.mxu0 %v9787_v39  ;;  %6430 = vmatprep.subr.mxu0 %v8030_v34  ;;  %v9789_v39 = vld [vmem:[#allocation53_spill] sm:$0xff]  ;;  %v9790_v34 = vld [vmem:[#allocation28_spill] sm:$0xff] }
 0x3b7   : > { %6465 = vmatprep.subr.mxu1 %v8025_v24  ;;  %6431 = vmatpush3.msra.mxu0 %v8035_v19  ;;  %v9792_v19 = vld [vmem:[#allocation65_spill] sm:$0xff] }
 0x3b8   : > { %6466 = vmatpush3.msra.mxu1 %v8027_v26  ;;  %6432 = vmatprep.subr.mxu0 %v8043_v48  ;;  %v9793_v48 = vld [vmem:[#allocation36_spill] sm:$0xff] }
 0x3b9   : > { %6467 = vmatprep.subr.mxu1 %v8032_v14  ;;  %6433 = vmatpush3.msra.mxu0 %v8053_v0  ;;  %v9795_v0 = vld [vmem:[#allocation85_spill] sm:$0xff] }
 0x3ba   : > { %6468 = vmatpush3.msra.mxu1 %v8037_v41  ;;  %6434 = vmatprep.subr.mxu0 %v8066_v49  ;;  %v9796_v49 = vld [vmem:[#allocation95_spill] sm:$0xff] }
 0x3bb   : > { %6469 = vmatprep.subr.mxu1 %v9788_v46  ;;  %6435 = vmatpush3.msra.mxu0 %v9789_v39  ;;  %v9797_v39 = vld [vmem:[#allocation102_spill] sm:$0xff] }
 0x3bc   : > { %6470 = vmatpush3.msra.mxu1 %v9790_v34  ;;  %6436 = vmatprep.subr.mxu0 %v9791_v31  ;;  %v9798_v31 = vld [vmem:[#allocation112_spill] sm:$0xff] }
 0x3bd   : > { %6471 = vmatprep.subr.mxu1 %v8055_v2  ;;  %6437 = vmatpush3.msra.mxu0 %v9792_v19  ;;  %v9799_v19 = vld [vmem:[#allocation122_spill] sm:$0xff] }
 0x3be   : > { %6472 = vmatpush3.msra.mxu1 %v9793_v48  ;;  %6438 = vmatprep.subr.mxu0 %v9794_v21  ;;  %v9800_v21 = vld [vmem:[#allocation130_spill] sm:$0xff] }
 0x3bf   : > { %6473 = vmatprep.subr.mxu1 %v8068_v47  ;;  %6439 = vmatpush3.msra.mxu0 %v9795_v0  ;;  %v9801_v0 = vld [vmem:[#allocation78_spill] sm:$0xff] }
 0x3c0   : > { %6474 = vmatpush3.msra.mxu1 %v8075_v52  ;;  %6440 = vmatprep.subr.mxu0 %v9796_v49  ;;  %v9802_v49 = vld [vmem:[#allocation9_spill] sm:$0xff] }
 0x3c1   : > { %6475 = vmatprep.subr.mxu1 %v8085_v25  ;;  %6441 = vmatpush3.msra.mxu0 %v9797_v39  ;;  %v9803_v39 = vld [vmem:[#allocation20_spill] sm:$0xff] }
 0x3c2   : > { %6476 = vmatpush3.msra.mxu1 %v8096_v59  ;;  %6442 = vmatprep.subr.mxu0 %v9798_v31 }
 0x3c3   : > { %6477 = vmatprep.subr.mxu1 %v8108_v9  ;;  %6443 = vmatpush3.msra.mxu0 %v9799_v19  ;;  %v9804_v19 = vld [vmem:[#allocation48_spill] sm:$0xff] }
 0x3c4   : > { %6478 = vmatpush3.msra.mxu1 %v8118_v16  ;;  %6444 = vmatprep.subr.mxu0 %v9800_v21 }
 0x3c5   : > { %6479 = vmatprep.subr.mxu1 %v8129_v29  ;;  %6445 = vmatpush3.msra.mxu0 %v9801_v0 }
 0x3c6   : > { %6480 = vmatpush3.msra.mxu1 %v8151_v20  ;;  %6446 = vmatprep.subr.mxu0 %v9802_v49  ;;  %v9805_v49 = vld [vmem:[#allocation94_spill] sm:$0xff] }
 0x3c7   : > { %6481 = vmatprep.subr.mxu1 %v8181_v3  ;;  %6447 = vmatpush3.msra.mxu0 %v9803_v39 }
 0x3c8   : > { %6482 = vmatpush3.msra.mxu1 %v8204_v33  ;;  %6448 = vmatprep.subr.mxu0 %v8257_v18 }
 0x3c9   : > { %6483 = vmatprep.subr.mxu1 %v8215_v35  ;;  %6449 = vmatpush3.msra.mxu0 %v9804_v19 }
 0x3ca   : > { %6484 = vmatpush3.msra.mxu1 %v8226_v22  ;;  %6450 = vmatprep.subr.mxu0 %v8280_v55 }
 0x3cb   : > { %6485 = vmatprep.subr.mxu1 %v8237_v32  ;;  %6451 = vmatpush3.msra.mxu0 %v8292_v56 }
 0x3cc   : > { %6486 = vmatpush3.msra.mxu1 %v8248_v40  ;;  %6452 = vmatprep.subr.mxu0 %v9805_v49 }
 0x3cd   : > { %6487 = vmatprep.subr.mxu1 %v8259_v45  ;;  %6453 = vmatpush3.msra.mxu0 %v8316_v42 }
 0x3ce   : > { %6488 = vmatpush3.msra.mxu1 %v8271_v6  ;;  %6454 = vmatprep.subr.mxu0 %v8328_v51  ;;  %v9811_v51 = vld [vmem:[#allocation30_spill] sm:$0xff] }
 0x3cf   : > { %6489 = vmatprep.subr.mxu1 %v8282_v53  ;;  %6455 = vmatpush3.msra.mxu0 %v8340_v58  ;;  %v9808_v58 = vld [vmem:[#allocation115_spill] sm:$0xff] }
 0x3d0   : > { %6490 = vmatpush3.msra.mxu1 %v8294_v12  ;;  %6456 = vmatprep.subr.mxu0 %v8352_v5  ;;  %v9806_v5 = vld [vmem:[#allocation109_spill] sm:$0xff] }
 0x3d1   : > { %6491 = vmatprep.subr.mxu1 %v8306_v4  ;;  %6457 = vmatpush3.msra.mxu0 %v8366_v13  ;;  %v9807_v13 = vld [vmem:[#allocation106_spill] sm:$0xff] }
 0x3d2   : > { %6492 = vmatpush3.msra.mxu1 %v8318_v23  ;;  %6458 = vmatprep.subr.mxu0 %v8376_v57  ;;  %v9809_v57 = vld [vmem:[#allocation60_spill] sm:$0xff] }
 0x3d3   : > { %6493 = vmatprep.subr.mxu1 %v8330_v8  ;;  %6459 = vmatpush3.msra.mxu0 %v8390_v27  ;;  %v9810_v27 = vld [vmem:[#allocation113_spill] sm:$0xff] }
 0x3d4   : > { %6494 = vmatpush3.msra.mxu1 %v8342_v37  ;;  %6460 = vmatprep.subr.mxu0 %v8402_v62  ;;  %v9812_v62 = vld [vmem:[#allocation40_spill] sm:$0xff] }
 0x3d5   : > { %6495 = vmatprep.subr.mxu1 %v8354_v54  ;;  %6461 = vmatpush3.msra.mxu0 %v8423_v15 }
 0x3d6   : > { %3588 = vmatprep.mubr.f32.mxu0 %v9806_v5  ;;  %6496 = vmatpush3.msra.mxu1 %v8378_v17  ;;  %v9813_v5 = vld [vmem:[#allocation56_spill] sm:$0xff] }
 0x3d7   : > { %3591 = vmatmul.mubr.f32.vlgmr.msra.gmra.mxu0 %v9807_v13  ;;  %3695 = vmatprep.mubr.f32.mxu1 %v9808_v58  ;;  %v9814_v13 = vld [vmem:[#allocation69_spill] sm:$0xff]  ;;  %v9815_v58 = vld [vmem:[#allocation79_spill] sm:$0xff] }
 0x3d8   : > { %6500 = vmatprep.subr.mxu0 %v9809_v57  ;;  %6535 = vmatprep.subr.mxu1 %v8025_v24 }
 0x3d9   : > { %3699 = vmatmul.mubr.f32.vlgmr.msra.gmra.mxu1 %v9810_v27  ;;  %6501 = vmatpush3.msra.mxu0 %v9811_v51  ;;  %v9816_v27 = vld [vmem:[#allocation92_spill] sm:$0xff]  ;;  %v9817_v51 = vld [vmem:[#allocation98_spill] sm:$0xff] }
 0x3da   : > { %6536 = vmatpush3.msra.mxu1 %v8027_v26  ;;  %6502 = vmatprep.subr.mxu0 %v9812_v62  ;;  %v9818_v62 = vld [vmem:[#allocation108_spill] sm:$0xff] }
 0x3db   : > { %6537 = vmatprep.subr.mxu1 %v8032_v14  ;;  %6503 = vmatpush3.msra.mxu0 %v9813_v5  ;;  %v9819_v5 = vld [vmem:[#allocation118_spill] sm:$0xff] }
 0x3dc   : > { %6538 = vmatpush3.msra.mxu1 %v8037_v41  ;;  %6504 = vmatprep.subr.mxu0 %v9814_v13  ;;  %v9820_v13 = vld [vmem:[#allocation64_spill] sm:$0xff] }
 0x3dd   : > { %6539 = vmatprep.subr.mxu1 %v9788_v46  ;;  %6505 = vmatpush3.msra.mxu0 %v9815_v58  ;;  %v9821_v58 = vld [vmem:[#allocation131_spill] sm:$0xff] }
 0x3de   : > { %6540 = vmatpush3.msra.mxu1 %v9790_v34  ;;  %6506 = vmatprep.subr.mxu0 %v9816_v27  ;;  %v9822_v27 = vld [vmem:[#allocation74_spill] sm:$0xff] }
 0x3df   : > { %6541 = vmatprep.subr.mxu1 %v8055_v2  ;;  %6507 = vmatpush3.msra.mxu0 %v9817_v51  ;;  %v9823_v51 = vld [vmem:[#allocation87_spill] sm:$0xff] }
 0x3e0   : > { %6542 = vmatpush3.msra.mxu1 %v9793_v48  ;;  %6508 = vmatprep.subr.mxu0 %v9818_v62  ;;  %v9824_v62 = vld [vmem:[#allocation8_spill] sm:$0xff] }
 0x3e1   : > { %6543 = vmatprep.subr.mxu1 %v8068_v47  ;;  %6509 = vmatpush3.msra.mxu0 %v9819_v5  ;;  %v9825_v5 = vld [vmem:[#allocation13_spill] sm:$0xff] }
 0x3e2   : > { %6544 = vmatpush3.msra.mxu1 %v8075_v52  ;;  %6510 = vmatprep.subr.mxu0 %v9820_v13  ;;  %v9826_v13 = vld [vmem:[#allocation45_spill] sm:$0xff] }
 0x3e3   : > { %6545 = vmatprep.subr.mxu1 %v8085_v25  ;;  %6511 = vmatpush3.msra.mxu0 %v9821_v58  ;;  %v9827_v58 = vld [vmem:[#allocation73_spill] sm:$0xff] }
 0x3e4   : > { %6546 = vmatpush3.msra.mxu1 %v8096_v59  ;;  %6512 = vmatprep.subr.mxu0 %v9822_v27  ;;  %v9828_v27 = vld [vmem:[#allocation91_spill] sm:$0xff] }
 0x3e5   : > { %6547 = vmatprep.subr.mxu1 %v8108_v9  ;;  %6513 = vmatpush3.msra.mxu0 %v9823_v51  ;;  %v9829_v51 = vld [vmem:[#allocation104_spill] sm:$0xff] }
 0x3e6   : > { %6548 = vmatpush3.msra.mxu1 %v8118_v16  ;;  %6514 = vmatprep.subr.mxu0 %v9824_v62  ;;  %v9837_v62 = vld [vmem:[#allocation97_spill] sm:$0xff] }
 0x3e7   : > { %6549 = vmatprep.subr.mxu1 %v8129_v29  ;;  %6515 = vmatpush3.msra.mxu0 %v9825_v5  ;;  %v9830_v5 = vld [vmem:[#allocation119_spill] sm:$0xff] }
 0x3e8   : > { %6550 = vmatpush3.msra.mxu1 %v8151_v20  ;;  %6516 = vmatprep.subr.mxu0 %v9826_v13  ;;  %v9831_v13 = vld [vmem:[#allocation11_spill] sm:$0xff] }
 0x3e9   : > { %6551 = vmatprep.subr.mxu1 %v8181_v3  ;;  %6517 = vmatpush3.msra.mxu0 %v9827_v58  ;;  %v9832_v58 = vld [vmem:[#allocation19_spill] sm:$0xff] }
 0x3ea   : > { %6552 = vmatpush3.msra.mxu1 %v8204_v33  ;;  %6518 = vmatprep.subr.mxu0 %v9828_v27  ;;  %v9833_v27 = vld [vmem:[#allocation37_spill] sm:$0xff] }
 0x3eb   : > { %6553 = vmatprep.subr.mxu1 %v8215_v35  ;;  %6519 = vmatpush3.msra.mxu0 %v9829_v51  ;;  %v9834_v51 = vld [vmem:[#allocation44_spill] sm:$0xff] }
 0x3ec   : > { %6554 = vmatpush3.msra.mxu1 %v8226_v22  ;;  %6520 = vmatprep.subr.mxu0 %v9830_v5  ;;  %v8629_v5 = vld [vmem:[%s7334_s12] sm:$0xff] }
 0x3ed   : > { %6555 = vmatprep.subr.mxu1 %v8237_v32  ;;  %6521 = vmatpush3.msra.mxu0 %v9831_v13  ;;  %v9835_v13 = vld [vmem:[#allocation72_spill] sm:$0xff]  ;;  %9836 = vst [vmem:[#allocation43_spill] sm:$0xff] %v8629_v5 }
 0x3ee   : > { %6556 = vmatpush3.msra.mxu1 %v8248_v40  ;;  %6522 = vmatprep.subr.mxu0 %v9832_v58  ;;  %v260_v58 = vsel %vm259_vm1, %v8629_v5, 0.0 }
 0x3ef   : > { %6557 = vmatprep.subr.mxu1 %v8259_v45  ;;  %6523 = vmatpush3.msra.mxu0 %v9833_v27  ;;  %v267_v27 = vsel %vm259_vm1, %v9837_v62, 0.0 }
 0x3f0   : > { %6558 = vmatpush3.msra.mxu1 %v8271_v6  ;;  %6524 = vmatprep.subr.mxu0 %v9834_v51  ;;  %v9838_v51 = vld [vmem:[#allocation90_spill] sm:$0xff] }
 0x3f1   : > { %6559 = vmatprep.subr.mxu1 %v8282_v53  ;;  %6525 = vmatpush3.msra.mxu0 %v8387_v50  ;;  %v268_v50 = vrot.slane %v267_v27, 4 }
 0x3f2   : > { %6560 = vmatpush3.msra.mxu1 %v8294_v12  ;;  %6526 = vmatprep.subr.mxu0 %v9835_v13  ;;  %v261_v13 = vrot.slane %v260_v58, 4 }
 0x3f3   : > { %6561 = vmatprep.subr.mxu1 %v8306_v4  ;;  %6527 = vmatpush3.msra.mxu0 %v8411_v61 }
 0x3f4   : > { %6562 = vmatpush3.msra.mxu1 %v8318_v23  ;;  %6528 = vmatprep.subr.mxu0 %v9838_v51  ;;  %v262_v62 = vadd.f32 %v261_v13, %v260_v58  ;;  %v9839_v51 = vmov 0.0  }
 0x3f5   : > { %6563 = vmatprep.subr.mxu1 %v8330_v8  ;;  %6529 = vmatpush3.msra.mxu0 %v8432_v1  ;;  %v269_v1 = vadd.f32 %v268_v50, %v267_v27 }
 0x3f6   : > { %6564 = vmatpush3.msra.mxu1 %v8342_v37  ;;  %6530 = vmatprep.subr.mxu0 %v8441_v43  ;;  %v263_v43 = vrot.slane %v262_v62, 2 }
 0x3f7   : > { %6565 = vmatprep.subr.mxu1 %v8354_v54  ;;  %6531 = vmatpush3.msra.mxu0 %v8456_v30  ;;  %v270_v61 = vrot.slane %v269_v1, 2 }
 0x3f8   : > { %3865 = vmatprep.mubr.f32.mxu0 %v9785_v60  ;;  %6566 = vmatpush3.msra.mxu1 %v8378_v17  ;;  %v264_v57 = vadd.f32 %v263_v43, %v262_v62 }
 0x3f9   : > { %3969 = vmatprep.mubr.f32.mxu1 %v9785_v60  ;;  %3867 = vmatmul.mubr.f32.vlgmr.msra.gmra.mxu0 %v9786_v44  ;;  %v271_v30 = vadd.f32 %v270_v61, %v269_v1 }
 0x3fa   : > { %3971 = vmatmul.mubr.f32.vlgmr.msra.gmra.mxu1 %v9786_v44  ;;  %4048 = vmatprep.mubr.f32.mxu0 %v9839_v51  ;;  %v265_v15 = vrot.slane %v264_v57, 1 }
 0x3fb   : > { %4144 = vmatprep.mubr.f32.mxu1 %v9839_v51  ;;  %v272_v42 = vrot.slane %v271_v30, 1 }
 0x3fc   : > { %v266_v49 = vadd.f32 %v265_v15, %v264_v57 }
 0x3fd   : > { %v273_v56 = vadd.f32 %v272_v42, %v271_v30 }
 0x3fe   : > { %v274_v55 = vmul.f32 0.25, %v266_v49 }
 0x3ff   : > { %v275_v60 = vmul.f32 0.25, %v273_v56 }
 0x401   : > { %v278_v19 = vcombine.low %v274_v55, %v275_v60  ;;  %v3113_v60 = vld [vmem:[%s9017_s4 + $0x18] sm:$0xff] }
 0x402   : > { %v8662_v18 = vand.u32 4294901760, %v3113_v60 }
 0x403   : > { %v8653_v13 = vsub.f32 %v8629_v5, %v278_v19 }
 0x404   : > { %4009 = vmatprep.subr.mxu0 %v8662_v18 }
 0x405   : > { %v281_v50 = vmul.f32 %v8653_v13, %v8653_v13 }
 0x407   : > { %v283_v44 = vcombine.high %v281_v50, %v281_v50  ;;  %v285_v58 = vsel %vm259_vm1, %v281_v50, 0.0  ;;  %v3112_v50 = vld [vmem:[%s9017_s4 + $0x10] sm:$0xff] }
 0x408   : > { %v286_v43 = vrot.slane %v285_v58, 4 }
 0x409   : > { %v292_v27 = vsel %vm259_vm1, %v283_v44, 0.0  ;;  %v8667_v44 = vand.u32 4294901760, %v3112_v50 }
 0x40a   : > { %v293_v61 = vrot.slane %v292_v27, 4  ;;  %v287_v1 = vadd.f32 %v286_v43, %v285_v58  ;;  %v3111_v58 = vld [vmem:[%s9017_s4 + $0x8] sm:$0xff]  ;;  %v8673_v43 = vsub.f32 %v3113_v60, %v8662_v18 }
 0x40b   : > { %4011 = vmatpush1.msra.mxu0 %v8667_v44 }
 0x40c   : > { %v294_v62 = vadd.f32 %v293_v61, %v292_v27  ;;  %v288_v57 = vrot.slane %v287_v1, 2  ;;  %9840 = vst [vmem:[#allocation127_spill] sm:$0xff] %v8673_v43  ;;  %v8675_v61 = vand.u32 4294901760, %v3111_v58 }
 0x40e   : > { %v295_v42 = vrot.slane %v294_v62, 2  ;;  %v289_v49 = vadd.f32 %v288_v57, %v287_v1  ;;  %v3110_v1 = vld [vmem:[%s9017_s4] sm:$0xff]  ;;  %v8682_v57 = vsub.f32 %v3112_v50, %v8667_v44  ;;  %4013 = vmatprep.subr.mxu0 %v8675_v61 }
 0x410   : > { %v296_v56 = vadd.f32 %v295_v42, %v294_v62  ;;  %v290_v55 = vrot.slane %v289_v49, 1  ;;  %v8684_v42 = vand.u32 4294901760, %v3110_v1 }
 0x412   : > { %v297_v30 = vrot.slane %v296_v56, 1  ;;  %v291_v19 = vadd.f32 %v290_v55, %v289_v49  ;;  %v8688_v49 = vand.u32 4294901760, %v8673_v43  ;;  %v8695_v55 = vand.u32 4294901760, %v8682_v57  ;;  %4015 = vmatpush1.msra.mxu0 %v8684_v42 }
 0x413   : > { %4182 = vmatprep.subr.mxu0 %v8673_v43 }
 0x414   : > { %v298_v15 = vadd.f32 %v297_v30, %v296_v56  ;;  %v299_v27 = vmul.f32 0.33333334, %v291_v19  ;;  %9841 = vst [vmem:[#allocation128_spill] sm:$0xff] %v8688_v49  ;;  %v8691_v56 = vsub.f32 %v3111_v58, %v8675_v61  ;;  %9842 = vst [vmem:[#allocation12_spill] sm:$0xff] %v8695_v55  ;;  %v8698_v30 = vsub.f32 %v3110_v1, %v8684_v42 }
 0x415   : > { %v4097_v58 = vsub.f32 %v8682_v57, %v8695_v55 }
 0x416   : > { %v300_v62 = vmul.f32 0.33333334, %v298_v15  ;;  %v301_v19 = vadd.f32 1e-08, %v299_v27  ;;  %v4091_v15 = vsub.f32 %v8673_v43, %v8688_v49  ;;  %v8704_v60 = vand.u32 4294901760, %v8691_v56 }
 0x417   : > { %v8710_v39 = vand.u32 4294901760, %v8698_v30  ;;  %v8716_v0 = vand.u32 4294901760, %v4097_v58 }
 0x418   : > { %9843 = vst [vmem:[#allocation14_spill] sm:$0xff] %v8704_v60  ;;  %v302_v50 = vadd.f32 1e-08, %v300_v62  ;;  %v8712_v1 = vand.u32 4294901760, %v4091_v15  ;;  %v4103_v27 = vsub.f32 %v8691_v56, %v8704_v60  ;;  %6815 = vrsqrt.f32 %v301_v19 }
 0x419   : > { %9844 = vst [vmem:[#allocation18_spill] sm:$0xff] %v8710_v39  ;;  %9846 = vst [vmem:[#allocation26_spill] sm:$0xff] %v8716_v0  ;;  %v4109_v21 = vsub.f32 %v8698_v30, %v8710_v39 }
 0x41a   : > { %9845 = vst [vmem:[#allocation21_spill] sm:$0xff] %v8712_v1  ;;  %4093 = vmatprep.subr.mxu1 %v8712_v1  ;;  %v8721_v62 = vand.u32 4294901760, %v4103_v27  ;;  %6817 = vrsqrt.f32 %v302_v50 }
 0x41b   : > { %4099 = vmatpush1.msra.mxu1 %v8716_v0  ;;  %v8724_v43 = vand.u32 4294901760, %v4109_v21 }
 0x41c   : > { %9847 = vst [vmem:[#allocation125_spill] sm:$0xff] %v8721_v62  ;;  %4105 = vmatprep.subr.mxu1 %v8721_v62 }
 0x41d   : > { %9848 = vst [vmem:[#allocation103_spill] sm:$0xff] %v8724_v43  ;;  %4111 = vmatpush1.msra.mxu1 %v8724_v43 }
 0x41e   : > { %4262 = vmatprep.subr.mxu1 %v8662_v18 }
 0x425   : > { %v6816_v1 = vpop.eup %6815 }
 0x427   : > { %v6818_v54 = vpop.eup %6817 }
 0x428   : > { %v307_v8 = vcombine.low %v6816_v1, %v6818_v54 }
 0x42a   : > { %v309_v7 = vmul.f32 %v307_v8, %v8653_v13 }
 0x446   : > { %v2749_v15 = vpop.f32.mrf.mxu1 }
 0x448   : > { %v2751_v58 = vpop.f32.mrf.mxu1 }
 0x44a   : > { %v2908_v31 = vpop.f32.mrf.mxu1 }
 0x44c   : > { %v2910_v50 = vpop.f32.mrf.mxu1 }
 0x44e   : > { %v2657_v5 = vpop.f32.mrf.mxu0  ;;  %v3068_v62 = vpop.f32.mrf.mxu1 }
 0x44f   : > { %v2750_v19 = vadd.f32 %v2749_v15, %v2657_v5 }
 0x450   : > { %v2659_v17 = vpop.f32.mrf.mxu0  ;;  %v3070_v15 = vpop.f32.mrf.mxu1 }
 0x451   : > { %v2752_v27 = vadd.f32 %v2751_v58, %v2659_v17  ;;  %v9849_v17 = vld [vmem:[#allocation46_spill] sm:$0xff] }
 0x452   : > { %v2830_v37 = vpop.f32.mrf.mxu0  ;;  %v1708_v58 = vsub.f32 %v309_v7, %v9849_v17 }
 0x453   : > { %v2831_v0 = vadd.f32 %v2830_v37, %v2750_v19 }
 0x454   : > { %v2832_v21 = vpop.f32.mrf.mxu0 }
 0x455   : > { %v2833_v23 = vadd.f32 %v2832_v21, %v2752_v27  ;;  %v2909_v4 = vadd.f32 %v2908_v31, %v2831_v0 }
 0x456   : > { %v2992_v12 = vpop.f32.mrf.mxu0 }
 0x457   : > { %v2993_v43 = vadd.f32 %v2992_v12, %v2909_v4  ;;  %v2911_v53 = vadd.f32 %v2910_v50, %v2833_v23 }
 0x458   : > { %v2994_v6 = vpop.f32.mrf.mxu0 }
 0x459   : > { %v3069_v45 = vadd.f32 %v3068_v62, %v2993_v43  ;;  %v2995_v5 = vadd.f32 %v2994_v6, %v2911_v53 }
 0x45b   : > { %v3071_v38 = vadd.f32 %v3070_v15, %v2995_v5 }
 0x45d   : > { %v3075_v40 = vcombine.low %v3069_v45, %v3071_v38 }
 0x45f   : > { %v8731_v10 = vmul.f32 %v3075_v40, %v1708_v58 }
 0x475   : > { %v6427_v54 = vpop.f32.mrf.mxu1 }
 0x476   : > { %v6392_v37 = vpop.f32.mrf.mxu0 }
 0x477   : > { %v6428_v31 = vpop.f32.mrf.mxu1 }
 0x478   : > { %v6393_v1 = vpop.f32.mrf.mxu0  ;;  %v6429_v12 = vadd.f32 %v6428_v31, %v6427_v54  ;;  %v9850_v31 = vld [vmem:[#allocation62_spill] sm:$0xff] }
 0x479   : > { %v6394_v23 = vadd.f32 %v6393_v1, %v6392_v37 }
 0x47b   : > { %v3455_v13 = vadd.f32 %v6429_v12, %v6394_v23  ;;  %v9853_v23 = vld [vmem:[#allocation68_spill] sm:$0xff]  ;;  %v9854_v12 = vld [vmem:[#allocation71_spill] sm:$0xff] }
 0x497   : > { %v6462_v0 = vpop.f32.mrf.mxu0 }
 0x499   : > { %v6497_v19 = vpop.f32.mrf.mxu1  ;;  %v6463_v4 = vpop.f32.mrf.mxu0 }
 0x49a   : > { %v6464_v27 = vadd.f32 %v6463_v4, %v6462_v0  ;;  %v9852_v4 = vld [vmem:[#allocation129_spill] sm:$0xff] }
 0x49b   : > { %v6498_v8 = vpop.f32.mrf.mxu1 }
 0x49c   : > { %v3593_v6 = vadd.f32 %v6464_v27, %v3455_v13  ;;  %v6499_v53 = vadd.f32 %v6498_v8, %v6497_v19  ;;  %v9851_v19 = vld [vmem:[#allocation89_spill] sm:$0xff]  ;;  %v9855_v27 = vld [vmem:[#allocation83_spill] sm:$0xff]  ;;  %v9857_v13 = vld [vmem:[#allocation88_spill] sm:$0xff] }
 0x49d   : > { %v9856_v8 = vld [vmem:[#allocation93_spill] sm:$0xff] }
 0x49e   : > { %v3701_v45 = vadd.f32 %v6499_v53, %v3593_v6  ;;  %v9858_v6 = vld [vmem:[#allocation10_spill] sm:$0xff]  ;;  %v9859_v53 = vld [vmem:[#allocation17_spill] sm:$0xff] }
 0x4b9   : > { %v6532_v43 = vpop.f32.mrf.mxu0 }
 0x4ba   : > { %v6567_v62 = vpop.f32.mrf.mxu1 }
 0x4bb   : > { %v6533_v7 = vpop.f32.mrf.mxu0 }
 0x4bc   : > { %v6534_v40 = vadd.f32 %v6533_v7, %v6532_v43  ;;  %v6568_v38 = vpop.f32.mrf.mxu1  ;;  %v9860_v43 = vld [vmem:[#allocation31_spill] sm:$0xff]  ;;  %v9862_v7 = vld [vmem:[#allocation58_spill] sm:$0xff] }
 0x4bd   : > { %v6569_v21 = vadd.f32 %v6568_v38, %v6567_v62  ;;  %v9861_v62 = vld [vmem:[#allocation42_spill] sm:$0xff]  ;;  %v9865_v38 = vld [vmem:[#allocation117_spill] sm:$0xff] }
 0x4be   : > { %v3869_v50 = vadd.f32 %v6534_v40, %v3701_v45  ;;  %v9863_v45 = vld [vmem:[#allocation70_spill] sm:$0xff]  ;;  %v9864_v40 = vld [vmem:[#allocation84_spill] sm:$0xff] }
 0x4c0   : > { %v3973_v5 = vadd.f32 %v6569_v21, %v3869_v50  ;;  %v9866_v50 = vld [vmem:[#allocation29_spill] sm:$0xff]  ;;  %v9867_v21 = vld [vmem:[#allocation54_spill] sm:$0xff] }
 0x4c2   : > { %v3976_v15 = vmul.f32 0.0625, %v3973_v5  ;;  %v9868_v5 = vld [vmem:[#allocation66_spill] sm:$0xff] }
 0x4c4   : > { %v3978_v17 = vsel %vm1209_vm0, %v3976_v15, 0  ;;  %v9869_v15 = vld [vmem:[#allocation80_spill] sm:$0xff] }
 0x4c5   : > { %v4049_v58 = vand.u32 4294901760, %v3978_v17 }
 0x4c7   : > { %v4050_v37 = vsub.f32 %v3978_v17, %v4049_v58  ;;  %4146 = vmatmul.mubr.f32.vlgmr.msra.gmra.mxu1 %v4049_v58  ;;  %v9870_v17 = vld [vmem:[#allocation86_spill] sm:$0xff] }
 0x4c8   : > { %4264 = vmatpush1.msra.mxu1 %v8667_v44  ;;  %4301 = vmatprep.mubr.f32.mxu1 %v9839_v51 }
 0x4c9   : > { %4266 = vmatprep.subr.mxu1 %v8675_v61  ;;  %v4051_v54 = vand.u32 4294901760, %v4050_v37 }
 0x4ca   : > { %4268 = vmatpush1.msra.mxu1 %v8684_v42 }
 0x4cb   : > { %4305 = vmatmul.mubr.f32.vlgmr.msra.gmra.mxu1 %v4051_v54  ;;  %4424 = vmatprep.subr.mxu1 %v8662_v18  ;;  %v4052_v1 = vsub.f32 %v4050_v37, %v4051_v54  ;;  %v9874_v54 = vld [vmem:[#allocation116_spill] sm:$0xff] }
 0x4cc   : > { %4426 = vmatpush1.msra.mxu1 %v8667_v44  ;;  %4463 = vmatprep.mubr.f32.mxu1 %v9839_v51 }
 0x4cd   : > { %4428 = vmatprep.subr.mxu1 %v8675_v61  ;;  %v4053_v0 = vand.u32 4294901760, %v4052_v1  ;;  %v9875_v1 = vld [vmem:[#allocation38_spill] sm:$0xff] }
 0x4ce   : > { %4430 = vmatpush1.msra.mxu1 %v8684_v42 }
 0x4cf   : > { %4054 = vmatmul.mubr.f32.vlgmr.msra.gmra.mxu0 %v4053_v0  ;;  %4465 = vmatmul.mubr.f32.vlgmr.msra.gmra.mxu1 %v4049_v58  ;;  %v9876_v0 = vld [vmem:[#allocation35_spill] sm:$0xff] }
 0x4d0   : > { %4185 = vmatpush1.msra.mxu0 %v8682_v57  ;;  %4224 = vmatprep.mubr.f32.mxu0 %v9839_v51 }
 0x4d1   : > { %4188 = vmatprep.subr.mxu0 %v8691_v56  ;;  %6605 = vmatprep.subr.mxu1 %v9850_v31  ;;  %v9878_v31 = vld [vmem:[#allocation120_spill] sm:$0xff] }
 0x4d2   : > { %4191 = vmatpush1.msra.mxu0 %v8698_v30  ;;  %6606 = vmatpush3.msra.mxu1 %v9851_v19  ;;  %v9880_v19 = vld [vmem:[#allocation39_spill] sm:$0xff] }
 0x4d3   : > { %4342 = vmatprep.subr.mxu0 %v8688_v49  ;;  %4227 = vmatmul.mubr.f32.vlgmr.msra.gmra.mxu0 %v4050_v37  ;;  %v9872_v37 = vld [vmem:[#allocation32_spill] sm:$0xff] }
 0x4d4   : > { %4346 = vmatpush1.msra.mxu0 %v8695_v55  ;;  %4387 = vmatprep.mubr.f32.mxu0 %v9839_v51 }
 0x4d5   : > { %4350 = vmatprep.subr.mxu0 %v8704_v60  ;;  %6607 = vmatprep.subr.mxu1 %v9852_v4  ;;  %v9882_v4 = vld [vmem:[#allocation123_spill] sm:$0xff] }
 0x4d6   : > { %4354 = vmatpush1.msra.mxu0 %v8710_v39  ;;  %6608 = vmatpush3.msra.mxu1 %v9853_v23  ;;  %v9883_v23 = vld [vmem:[#allocation100_spill] sm:$0xff] }
 0x4d7   : > { %4389 = vmatmul.mubr.f32.vlgmr.msra.gmra.mxu0 %v4049_v58  ;;  %6609 = vmatprep.subr.mxu1 %v9854_v12  ;;  %v9871_v58 = vld [vmem:[#allocation105_spill] sm:$0xff]  ;;  %v9884_v12 = vld [vmem:[#allocation111_spill] sm:$0xff] }
 0x4d8   : > { %6610 = vmatpush3.msra.mxu1 %v9855_v27  ;;  %6570 = vmatprep.subr.mxu0 %v8025_v24  ;;  %v9885_v27 = vld [vmem:[#allocation126_spill] sm:$0xff] }
 0x4d9   : > { %6611 = vmatprep.subr.mxu1 %v9856_v8  ;;  %6571 = vmatpush3.msra.mxu0 %v8027_v26  ;;  %v9886_v8 = vld [vmem:[#allocation16_spill] sm:$0xff] }
 0x4da   : > { %6612 = vmatpush3.msra.mxu1 %v9857_v13  ;;  %6572 = vmatprep.subr.mxu0 %v8032_v14  ;;  %v9887_v13 = vld [vmem:[#allocation25_spill] sm:$0xff] }
 0x4db   : > { %6613 = vmatprep.subr.mxu1 %v9858_v6  ;;  %6573 = vmatpush3.msra.mxu0 %v8037_v41  ;;  %v9888_v6 = vld [vmem:[#allocation51_spill] sm:$0xff] }
 0x4dc   : > { %6614 = vmatpush3.msra.mxu1 %v9859_v53  ;;  %6574 = vmatprep.subr.mxu0 %v9788_v46  ;;  %v9889_v53 = vld [vmem:[#allocation49_spill] sm:$0xff] }
 0x4dd   : > { %6615 = vmatprep.subr.mxu1 %v9860_v43  ;;  %6575 = vmatpush3.msra.mxu0 %v9790_v34 }
 0x4de   : > { %6616 = vmatpush3.msra.mxu1 %v9861_v62  ;;  %6576 = vmatprep.subr.mxu0 %v8055_v2 }
 0x4df   : > { %6617 = vmatprep.subr.mxu1 %v9862_v7  ;;  %6577 = vmatpush3.msra.mxu0 %v9793_v48 }
 0x4e0   : > { %6618 = vmatpush3.msra.mxu1 %v9863_v45  ;;  %6578 = vmatprep.subr.mxu0 %v8068_v47 }
 0x4e1   : > { %6619 = vmatprep.subr.mxu1 %v9864_v40  ;;  %6579 = vmatpush3.msra.mxu0 %v8075_v52 }
 0x4e2   : > { %6620 = vmatpush3.msra.mxu1 %v9865_v38  ;;  %6580 = vmatprep.subr.mxu0 %v8085_v25 }
 0x4e3   : > { %6621 = vmatprep.subr.mxu1 %v9866_v50  ;;  %6581 = vmatpush3.msra.mxu0 %v8096_v59 }
 0x4e4   : > { %6622 = vmatpush3.msra.mxu1 %v9867_v21  ;;  %6582 = vmatprep.subr.mxu0 %v8108_v9 }
 0x4e5   : > { %6623 = vmatprep.subr.mxu1 %v9868_v5  ;;  %6583 = vmatpush3.msra.mxu0 %v8118_v16 }
 0x4e6   : > { %6624 = vmatpush3.msra.mxu1 %v9869_v15  ;;  %6584 = vmatprep.subr.mxu0 %v8129_v29 }
 0x4e7   : > { %6625 = vmatprep.subr.mxu1 %v9870_v17  ;;  %6585 = vmatpush3.msra.mxu0 %v8151_v20 }
 0x4e8   : > { %6626 = vmatpush3.msra.mxu1 %v8427_v28  ;;  %6586 = vmatprep.subr.mxu0 %v8181_v3  ;;  %v9873_v28 = vld [vmem:[#allocation23_spill] sm:$0xff] }
 0x4e9   : > { %6627 = vmatprep.subr.mxu1 %v9871_v58  ;;  %6587 = vmatpush3.msra.mxu0 %v8204_v33 }
 0x4ea   : > { %6628 = vmatpush3.msra.mxu1 %v8445_v63  ;;  %6588 = vmatprep.subr.mxu0 %v8215_v35  ;;  %v9877_v63 = vld [vmem:[#allocation52_spill] sm:$0xff] }
 0x4eb   : > { %6629 = vmatprep.subr.mxu1 %v8451_v11  ;;  %6589 = vmatpush3.msra.mxu0 %v8226_v22  ;;  %v9879_v11 = vld [vmem:[#allocation67_spill] sm:$0xff] }
 0x4ec   : > { %6630 = vmatpush3.msra.mxu1 %v8460_v36  ;;  %6590 = vmatprep.subr.mxu0 %v8237_v32  ;;  %v9881_v36 = vld [vmem:[#allocation81_spill] sm:$0xff] }
 0x4ed   : > { %6631 = vmatprep.subr.mxu1 %v9872_v37  ;;  %6591 = vmatpush3.msra.mxu0 %v9873_v28 }
 0x4ee   : > { %6632 = vmatpush3.msra.mxu1 %v9874_v54  ;;  %6592 = vmatprep.subr.mxu0 %v9875_v1 }
 0x4ef   : > { %6633 = vmatprep.subr.mxu1 %v9876_v0  ;;  %6593 = vmatpush3.msra.mxu0 %v9877_v63 }
 0x4f0   : > { %6634 = vmatpush3.msra.mxu1 %v9878_v31  ;;  %6594 = vmatprep.subr.mxu0 %v9879_v11 }
 0x4f1   : > { %6635 = vmatprep.subr.mxu1 %v9880_v19  ;;  %6595 = vmatpush3.msra.mxu0 %v9881_v36 }
 0x4f2   : > { %6636 = vmatpush3.msra.mxu1 %v9882_v4  ;;  %6596 = vmatprep.subr.mxu0 %v9883_v23 }
 0x4f3   : > { %6675 = vmatprep.subr.mxu1 %v8025_v24  ;;  %6597 = vmatpush3.msra.mxu0 %v9884_v12 }
 0x4f4   : > { %6598 = vmatprep.subr.mxu0 %v9885_v27 }
 0x4f5   : > { %6599 = vmatpush3.msra.mxu0 %v9886_v8 }
 0x4f6   : > { %6600 = vmatprep.subr.mxu0 %v9887_v13 }
 0x4f7   : > { %6601 = vmatpush3.msra.mxu0 %v9888_v6 }
 0x4f8   : > { %6640 = vmatprep.subr.mxu0 %v9889_v53 }
 0x587   : > { %v4147_v43 = vpop.f32.mrf.mxu1 }
 0x589   : > { %v4149_v62 = vpop.f32.mrf.mxu1 }
 0x58b   : > { %v4306_v7 = vpop.f32.mrf.mxu1 }
 0x58d   : > { %v4308_v50 = vpop.f32.mrf.mxu1 }
 0x58f   : > { %v4055_v45 = vpop.f32.mrf.mxu0  ;;  %v4466_v54 = vpop.f32.mrf.mxu1 }
 0x590   : > { %v4148_v38 = vadd.f32 %v4147_v43, %v4055_v45 }
 0x591   : > { %v4057_v40 = vpop.f32.mrf.mxu0  ;;  %v4468_v53 = vpop.f32.mrf.mxu1 }
 0x592   : > { %v4150_v5 = vadd.f32 %v4149_v62, %v4057_v40  ;;  %v9890_v62 = vld [vmem:[#allocation43_spill] sm:$0xff] }
 0x593   : > { %v4228_v21 = vpop.f32.mrf.mxu0 }
 0x594   : > { %v4229_v15 = vadd.f32 %v4228_v21, %v4148_v38 }
 0x595   : > { %v4230_v17 = vpop.f32.mrf.mxu0 }
 0x596   : > { %v4231_v58 = vadd.f32 %v4230_v17, %v4150_v5  ;;  %v4307_v37 = vadd.f32 %v4306_v7, %v4229_v15 }
 0x597   : > { %v4390_v0 = vpop.f32.mrf.mxu0 }
 0x598   : > { %v4391_v31 = vadd.f32 %v4390_v0, %v4307_v37  ;;  %v4309_v19 = vadd.f32 %v4308_v50, %v4231_v58  ;;  %v9891_v37 = vld [vmem:[#allocation55_spill] sm:$0xff]  ;;  %v9893_v0 = vld [vmem:[#allocation33_spill] sm:$0xff] }
 0x599   : > { %v4392_v4 = vpop.f32.mrf.mxu0 }
 0x59a   : > { %v4393_v39 = vadd.f32 %v4392_v4, %v4309_v19  ;;  %v4467_v60 = vadd.f32 %v4466_v54, %v4391_v31  ;;  %v9892_v54 = vld [vmem:[#allocation24_spill] sm:$0xff]  ;;  %v9894_v31 = vld [vmem:[#allocation50_spill] sm:$0xff]  ;;  %v9895_v19 = vld [vmem:[#allocation53_spill] sm:$0xff] }
 0x59b   : > { %v9896_v4 = vld [vmem:[#allocation59_spill] sm:$0xff] }
 0x59c   : > { %v4469_v55 = vadd.f32 %v4468_v53, %v4393_v39  ;;  %v9897_v53 = vld [vmem:[#allocation65_spill] sm:$0xff] }
 0x59e   : > { %v8818_v49 = vcombine.low %v4467_v60, %v4469_v55 }
 0x5a0   : > { %v4475_v43 = vsub.f32 %v8731_v10, %v8818_v49  ;;  %v4476_v45 = vsub.f32 %v9890_v62, %v8818_v49  ;;  %v9898_v62 = vld [vmem:[#allocation75_spill] sm:$0xff] }
 0x5a2   : > { %v4477_v40 = vmul.f32 %v4476_v45, %v4476_v45  ;;  %v9899_v45 = vld [vmem:[#allocation85_spill] sm:$0xff] }
 0x5a4   : > { %v4479_v38 = vcombine.high %v4477_v40, %v4477_v40  ;;  %v8824_v7 = vand.u32 4294901760, %v4477_v40 }
 0x5a6   : > { %v8826_v21 = vand.u32 4294901760, %v4479_v38  ;;  %v8829_v50 = vsub.f32 %v4477_v40, %v8824_v7  ;;  %v9900_v40 = vld [vmem:[#allocation95_spill] sm:$0xff] }
 0x5a8   : > { %4818 = vmatprep.mubr.f32.mxu1 %v8826_v21  ;;  %v4578_v39 = vsub.f32 %v4479_v38, %v8826_v21  ;;  %v4585_v55 = vand.u32 4294901760, %v8829_v50  ;;  %v9901_v38 = vld [vmem:[#allocation102_spill] sm:$0xff] }
 0x5a9   : > { %4820 = vmatmul.mubr.f32.vlgmr.msra.gmra.mxu1 %v8824_v7 }
 0x5aa   : > { %6676 = vmatpush3.msra.mxu1 %v8027_v26  ;;  %v4579_v60 = vand.u32 4294901760, %v4578_v39  ;;  %v4586_v5 = vsub.f32 %v8829_v50, %v4585_v55 }
 0x5ab   : > { %6677 = vmatprep.subr.mxu1 %v8032_v14 }
 0x5ac   : > { %6678 = vmatpush3.msra.mxu1 %v8037_v41  ;;  %5062 = vmatprep.mubr.f32.mxu1 %v4579_v60  ;;  %v4580_v15 = vsub.f32 %v4578_v39, %v4579_v60  ;;  %v4587_v58 = vand.u32 4294901760, %v4586_v5  ;;  %v9903_v60 = vld [vmem:[#allocation122_spill] sm:$0xff] }
 0x5ad   : > { %6679 = vmatprep.subr.mxu1 %v9788_v46  ;;  %v9904_v5 = vld [vmem:[#allocation130_spill] sm:$0xff] }
 0x5ae   : > { %6680 = vmatpush3.msra.mxu1 %v9790_v34  ;;  %v4581_v17 = vand.u32 4294901760, %v4580_v15  ;;  %v9905_v15 = vld [vmem:[#allocation78_spill] sm:$0xff] }
 0x5af   : > { %6681 = vmatprep.subr.mxu1 %v8055_v2 }
 0x5b0   : > { %6682 = vmatpush3.msra.mxu1 %v9793_v48  ;;  %4582 = vmatprep.mubr.f32.mxu0 %v4581_v17  ;;  %v9906_v17 = vld [vmem:[#allocation9_spill] sm:$0xff] }
 0x5b1   : > { %6683 = vmatprep.subr.mxu1 %v8068_v47  ;;  %4588 = vmatmul.mubr.f32.vlgmr.msra.gmra.mxu0 %v4587_v58  ;;  %v9907_v58 = vld [vmem:[#allocation20_spill] sm:$0xff] }
 0x5b2   : > { %6641 = vmatpush3.msra.mxu0 %v9891_v37  ;;  %6684 = vmatpush3.msra.mxu1 %v8075_v52  ;;  %v9908_v37 = vld [vmem:[#allocation34_spill] sm:$0xff] }
 0x5b3   : > { %6642 = vmatprep.subr.mxu0 %v9892_v54  ;;  %4955 = vmatprep.mubr.f32.mxu0 %v4578_v39  ;;  %v9902_v39 = vld [vmem:[#allocation112_spill] sm:$0xff] }
 0x5b4   : > { %6685 = vmatprep.subr.mxu1 %v8085_v25  ;;  %6643 = vmatpush3.msra.mxu0 %v9893_v0  ;;  %v9909_v54 = vld [vmem:[#allocation48_spill] sm:$0xff]  ;;  %v9910_v0 = vld [vmem:[#allocation61_spill] sm:$0xff] }
 0x5b5   : > { %6686 = vmatpush3.msra.mxu1 %v8096_v59  ;;  %6644 = vmatprep.subr.mxu0 %v9894_v31  ;;  %v9911_v31 = vld [vmem:[#allocation77_spill] sm:$0xff] }
 0x5b6   : > { %6687 = vmatprep.subr.mxu1 %v8108_v9  ;;  %6645 = vmatpush3.msra.mxu0 %v9895_v19  ;;  %v9912_v19 = vld [vmem:[#allocation94_spill] sm:$0xff] }
 0x5b7   : > { %6688 = vmatpush3.msra.mxu1 %v8118_v16  ;;  %6646 = vmatprep.subr.mxu0 %v9896_v4  ;;  %v9913_v4 = vld [vmem:[#allocation107_spill] sm:$0xff] }
 0x5b8   : > { %6689 = vmatprep.subr.mxu1 %v8129_v29  ;;  %6647 = vmatpush3.msra.mxu0 %v9897_v53  ;;  %v9914_v53 = vld [vmem:[#allocation124_spill] sm:$0xff] }
 0x5b9   : > { %6690 = vmatpush3.msra.mxu1 %v8151_v20  ;;  %6648 = vmatprep.subr.mxu0 %v9898_v62  ;;  %v9915_v62 = vld [vmem:[#allocation15_spill] sm:$0xff] }
 0x5ba   : > { %6691 = vmatprep.subr.mxu1 %v8181_v3  ;;  %6649 = vmatpush3.msra.mxu0 %v9899_v45  ;;  %v9916_v45 = vld [vmem:[#allocation22_spill] sm:$0xff] }
 0x5bb   : > { %6692 = vmatpush3.msra.mxu1 %v8204_v33  ;;  %6650 = vmatprep.subr.mxu0 %v9900_v40  ;;  %v9917_v40 = vld [vmem:[#allocation41_spill] sm:$0xff] }
 0x5bc   : > { %6693 = vmatprep.subr.mxu1 %v8215_v35  ;;  %6651 = vmatpush3.msra.mxu0 %v9901_v38  ;;  %v9918_v38 = vld [vmem:[#allocation47_spill] sm:$0xff] }
 0x5bd   : > { %6694 = vmatpush3.msra.mxu1 %v8226_v22  ;;  %6652 = vmatprep.subr.mxu0 %v9902_v39  ;;  %v9952_v39 = vld [vmem:[#allocation90_spill] sm:$0xff] }
 0x5be   : > { %6695 = vmatprep.subr.mxu1 %v8237_v32  ;;  %6653 = vmatpush3.msra.mxu0 %v9903_v60  ;;  %v9954_v60 = vld [vmem:[#allocation99_spill] sm:$0xff] }
 0x5bf   : > { %6696 = vmatpush3.msra.mxu1 %v9873_v28  ;;  %6654 = vmatprep.subr.mxu0 %v9904_v5  ;;  %v9956_v5 = vld [vmem:[#allocation110_spill] sm:$0xff] }
 0x5c0   : > { %6697 = vmatprep.subr.mxu1 %v9875_v1  ;;  %6655 = vmatpush3.msra.mxu0 %v9905_v15  ;;  %v9957_v15 = vld [vmem:[#allocation114_spill] sm:$0xff] }
 0x5c1   : > { %6698 = vmatpush3.msra.mxu1 %v9877_v63  ;;  %6656 = vmatprep.subr.mxu0 %v9906_v17  ;;  %v9958_v17 = vld [vmem:[#allocation127_spill] sm:$0xff] }
 0x5c2   : > { %6699 = vmatprep.subr.mxu1 %v9879_v11  ;;  %6657 = vmatpush3.msra.mxu0 %v9907_v58 }
 0x5c3   : > { %6700 = vmatpush3.msra.mxu1 %v9881_v36  ;;  %6658 = vmatprep.subr.mxu0 %v9908_v37 }
 0x5c4   : > { %6701 = vmatprep.subr.mxu1 %v9883_v23  ;;  %6659 = vmatpush3.msra.mxu0 %v9909_v54 }
 0x5c5   : > { %6702 = vmatpush3.msra.mxu1 %v9884_v12  ;;  %6660 = vmatprep.subr.mxu0 %v9910_v0 }
 0x5c6   : > { %6703 = vmatprep.subr.mxu1 %v9885_v27  ;;  %6661 = vmatpush3.msra.mxu0 %v9911_v31 }
 0x5c7   : > { %6704 = vmatpush3.msra.mxu1 %v9886_v8  ;;  %6662 = vmatprep.subr.mxu0 %v9912_v19 }
 0x5c8   : > { %6705 = vmatprep.subr.mxu1 %v9887_v13  ;;  %6663 = vmatpush3.msra.mxu0 %v9913_v4 }
 0x5c9   : > { %6706 = vmatpush3.msra.mxu1 %v9888_v6  ;;  %6664 = vmatprep.subr.mxu0 %v9914_v53 }
 0x5ca   : > { %5066 = vmatmul.mubr.f32.vlgmr.msra.gmra.mxu1 %v4585_v55  ;;  %6745 = vmatprep.subr.mxu1 %v8025_v24  ;;  %v9919_v55 = vld [vmem:[#allocation63_spill] sm:$0xff]  ;;  %v9920_v24 = vld [vmem:[#allocation76_spill] sm:$0xff] }
 0x5cb   : > { %6665 = vmatpush3.msra.mxu0 %v9915_v62  ;;  %6746 = vmatpush3.msra.mxu1 %v8027_v26  ;;  %v9921_v26 = vld [vmem:[#allocation96_spill] sm:$0xff] }
 0x5cc   : > { %5336 = vmatprep.mubr.f32.mxu1 %v8826_v21  ;;  %6666 = vmatprep.subr.mxu0 %v9916_v45 }
 0x5cd   : > { %6747 = vmatprep.subr.mxu1 %v8032_v14  ;;  %6667 = vmatpush3.msra.mxu0 %v9917_v40  ;;  %v9922_v14 = vld [vmem:[#allocation60_spill] sm:$0xff] }
 0x5ce   : > { %6748 = vmatpush3.msra.mxu1 %v8037_v41  ;;  %6668 = vmatprep.subr.mxu0 %v9918_v38  ;;  %v9923_v41 = vld [vmem:[#allocation30_spill] sm:$0xff] }
 0x5cf   : > { %6749 = vmatprep.subr.mxu1 %v9788_v46  ;;  %6669 = vmatpush3.msra.mxu0 %v9919_v55  ;;  %v9927_v46 = vld [vmem:[#allocation79_spill] sm:$0xff] }
 0x5d0   : > { %6750 = vmatpush3.msra.mxu1 %v9790_v34  ;;  %6670 = vmatprep.subr.mxu0 %v9920_v24  ;;  %v9924_v34 = vld [vmem:[#allocation40_spill] sm:$0xff] }
 0x5d1   : > { %6751 = vmatprep.subr.mxu1 %v8055_v2  ;;  %6671 = vmatpush3.msra.mxu0 %v9921_v26  ;;  %v9925_v2 = vld [vmem:[#allocation56_spill] sm:$0xff] }
 0x5d2   : > { %6752 = vmatpush3.msra.mxu1 %v9793_v48  ;;  %4958 = vmatmul.mubr.f32.vlgmr.msra.gmra.mxu0 %v8829_v50  ;;  %v9926_v48 = vld [vmem:[#allocation69_spill] sm:$0xff]  ;;  %v9950_v50 = vld [vmem:[#allocation82_spill] sm:$0xff] }
 0x5d3   : > { %6710 = vmatprep.subr.mxu0 %v9922_v14  ;;  %6753 = vmatprep.subr.mxu1 %v8068_v47  ;;  %v9928_v47 = vld [vmem:[#allocation92_spill] sm:$0xff] }
 0x5d4   : > { %6711 = vmatpush3.msra.mxu0 %v9923_v41  ;;  %5232 = vmatprep.mubr.f32.mxu0 %v8826_v21  ;;  %v9948_v21 = vld [vmem:[#allocation72_spill] sm:$0xff] }
 0x5d5   : > { %6754 = vmatpush3.msra.mxu1 %v8075_v52  ;;  %6712 = vmatprep.subr.mxu0 %v9924_v34  ;;  %v9929_v52 = vld [vmem:[#allocation98_spill] sm:$0xff] }
 0x5d6   : > { %6755 = vmatprep.subr.mxu1 %v8085_v25  ;;  %6713 = vmatpush3.msra.mxu0 %v9925_v2  ;;  %v9930_v25 = vld [vmem:[#allocation108_spill] sm:$0xff] }
 0x5d7   : > { %6756 = vmatpush3.msra.mxu1 %v8096_v59  ;;  %6714 = vmatprep.subr.mxu0 %v9926_v48  ;;  %v9931_v59 = vld [vmem:[#allocation118_spill] sm:$0xff] }
 0x5d8   : > { %6757 = vmatprep.subr.mxu1 %v8108_v9  ;;  %6715 = vmatpush3.msra.mxu0 %v9927_v46  ;;  %v9932_v9 = vld [vmem:[#allocation64_spill] sm:$0xff] }
 0x5d9   : > { %6758 = vmatpush3.msra.mxu1 %v8118_v16  ;;  %6716 = vmatprep.subr.mxu0 %v9928_v47  ;;  %v9933_v16 = vld [vmem:[#allocation131_spill] sm:$0xff] }
 0x5da   : > { %6759 = vmatprep.subr.mxu1 %v8129_v29  ;;  %6717 = vmatpush3.msra.mxu0 %v9929_v52  ;;  %v9934_v29 = vld [vmem:[#allocation74_spill] sm:$0xff] }
 0x5db   : > { %6760 = vmatpush3.msra.mxu1 %v8151_v20  ;;  %6718 = vmatprep.subr.mxu0 %v9930_v25  ;;  %v9935_v20 = vld [vmem:[#allocation87_spill] sm:$0xff] }
 0x5dc   : > { %6761 = vmatprep.subr.mxu1 %v8181_v3  ;;  %6719 = vmatpush3.msra.mxu0 %v9931_v59  ;;  %v9936_v3 = vld [vmem:[#allocation8_spill] sm:$0xff] }
 0x5dd   : > { %6762 = vmatpush3.msra.mxu1 %v8204_v33  ;;  %6720 = vmatprep.subr.mxu0 %v9932_v9  ;;  %v9937_v33 = vld [vmem:[#allocation13_spill] sm:$0xff] }
 0x5de   : > { %6763 = vmatprep.subr.mxu1 %v8215_v35  ;;  %6721 = vmatpush3.msra.mxu0 %v9933_v16  ;;  %v9938_v35 = vld [vmem:[#allocation45_spill] sm:$0xff] }
 0x5df   : > { %6764 = vmatpush3.msra.mxu1 %v8226_v22  ;;  %6722 = vmatprep.subr.mxu0 %v9934_v29  ;;  %v9939_v22 = vld [vmem:[#allocation73_spill] sm:$0xff] }
 0x5e0   : > { %6765 = vmatprep.subr.mxu1 %v8237_v32  ;;  %6723 = vmatpush3.msra.mxu0 %v9935_v20  ;;  %v9940_v32 = vld [vmem:[#allocation91_spill] sm:$0xff] }
 0x5e1   : > { %6766 = vmatpush3.msra.mxu1 %v9873_v28  ;;  %6724 = vmatprep.subr.mxu0 %v9936_v3  ;;  %v9941_v28 = vld [vmem:[#allocation104_spill] sm:$0xff] }
 0x5e2   : > { %6767 = vmatprep.subr.mxu1 %v9875_v1  ;;  %6725 = vmatpush3.msra.mxu0 %v9937_v33  ;;  %v9942_v1 = vld [vmem:[#allocation119_spill] sm:$0xff] }
 0x5e3   : > { %6768 = vmatpush3.msra.mxu1 %v9877_v63  ;;  %6726 = vmatprep.subr.mxu0 %v9938_v35  ;;  %v9943_v63 = vld [vmem:[#allocation11_spill] sm:$0xff] }
 0x5e4   : > { %6769 = vmatprep.subr.mxu1 %v9879_v11  ;;  %6727 = vmatpush3.msra.mxu0 %v9939_v22  ;;  %v9944_v11 = vld [vmem:[#allocation19_spill] sm:$0xff] }
 0x5e5   : > { %6770 = vmatpush3.msra.mxu1 %v9881_v36  ;;  %6728 = vmatprep.subr.mxu0 %v9940_v32  ;;  %v9945_v36 = vld [vmem:[#allocation37_spill] sm:$0xff] }
 0x5e6   : > { %6771 = vmatprep.subr.mxu1 %v9883_v23  ;;  %6729 = vmatpush3.msra.mxu0 %v9941_v28  ;;  %v9946_v23 = vld [vmem:[#allocation44_spill] sm:$0xff] }
 0x5e7   : > { %6772 = vmatpush3.msra.mxu1 %v9884_v12  ;;  %6730 = vmatprep.subr.mxu0 %v9942_v1  ;;  %v9947_v12 = vld [vmem:[#allocation57_spill] sm:$0xff] }
 0x5e8   : > { %6773 = vmatprep.subr.mxu1 %v9885_v27  ;;  %6731 = vmatpush3.msra.mxu0 %v9943_v63  ;;  %v9949_v27 = vld [vmem:[#allocation21_spill] sm:$0xff] }
 0x5e9   : > { %6774 = vmatpush3.msra.mxu1 %v9886_v8  ;;  %6732 = vmatprep.subr.mxu0 %v9944_v11  ;;  %v9951_v8 = vld [vmem:[#allocation26_spill] sm:$0xff] }
 0x5ea   : > { %6775 = vmatprep.subr.mxu1 %v9887_v13  ;;  %6733 = vmatpush3.msra.mxu0 %v9945_v36  ;;  %v9953_v13 = vld [vmem:[#allocation125_spill] sm:$0xff] }
 0x5eb   : > { %6776 = vmatpush3.msra.mxu1 %v9888_v6  ;;  %6734 = vmatprep.subr.mxu0 %v9946_v23  ;;  %v9955_v6 = vld [vmem:[#allocation103_spill] sm:$0xff] }
 0x5ec   : > { %5338 = vmatmul.mubr.f32.vlgmr.msra.gmra.mxu1 %v8824_v7  ;;  %6735 = vmatpush3.msra.mxu0 %v9947_v12 }
 0x5ed   : > { %6736 = vmatprep.subr.mxu0 %v9948_v21  ;;  %5462 = vmatprep.subr.mxu1 %v9949_v27 }
 0x5ee   : > { %6737 = vmatpush3.msra.mxu0 %v9950_v50  ;;  %5468 = vmatpush1.msra.mxu1 %v9951_v8 }
 0x5ef   : > { %6738 = vmatprep.subr.mxu0 %v9952_v39  ;;  %5474 = vmatprep.subr.mxu1 %v9953_v13 }
 0x5f0   : > { %6739 = vmatpush3.msra.mxu0 %v9954_v60  ;;  %5480 = vmatpush1.msra.mxu1 %v9955_v6 }
 0x5f1   : > { %6740 = vmatprep.subr.mxu0 %v9956_v5  ;;  %5513 = vmatprep.mubr.f32.mxu1 %v9839_v51 }
 0x5f2   : > { %6741 = vmatpush3.msra.mxu0 %v9957_v15  ;;  %5631 = vmatprep.subr.mxu1 %v8662_v18 }
 0x5f3   : > { %5234 = vmatmul.mubr.f32.vlgmr.msra.gmra.mxu0 %v8824_v7  ;;  %5378 = vmatprep.subr.mxu0 %v8662_v18 }
 0x5f4   : > { %5380 = vmatpush1.msra.mxu0 %v8667_v44  ;;  %5417 = vmatprep.mubr.f32.mxu0 %v9839_v51 }
 0x5f5   : > { %5382 = vmatprep.subr.mxu0 %v8675_v61 }
 0x5f6   : > { %5384 = vmatpush1.msra.mxu0 %v8684_v42 }
 0x5f7   : > { %5551 = vmatprep.subr.mxu0 %v9958_v17 }
 0x669   : > { %v6637_v37 = vpop.f32.mrf.mxu1 }
 0x66b   : > { %v6638_v31 = vpop.f32.mrf.mxu1 }
 0x66c   : > { %v6639_v53 = vadd.f32 %v6638_v31, %v6637_v37 }
 0x671   : > { %v6602_v58 = vpop.f32.mrf.mxu0 }
 0x673   : > { %v6603_v54 = vpop.f32.mrf.mxu0 }
 0x674   : > { %v6604_v7 = vadd.f32 %v6603_v54, %v6602_v58 }
 0x676   : > { %v4822_v40 = vadd.f32 %v6639_v53, %v6604_v7 }
 0x68a   : > { %v6707_v19 = vpop.f32.mrf.mxu1 }
 0x68c   : > { %v6708_v45 = vpop.f32.mrf.mxu1 }
 0x68d   : > { %v6709_v26 = vadd.f32 %v6708_v45, %v6707_v19 }
 0x692   : > { %v6672_v0 = vpop.f32.mrf.mxu0 }
 0x694   : > { %v6673_v4 = vpop.f32.mrf.mxu0 }
 0x695   : > { %v6674_v62 = vadd.f32 %v6673_v4, %v6672_v0 }
 0x697   : > { %v4960_v55 = vadd.f32 %v6674_v62, %v4822_v40 }
 0x699   : > { %v5068_v34 = vadd.f32 %v6709_v26, %v4960_v55 }
 0x6ac   : > { %v6777_v38 = vpop.f32.mrf.mxu1 }
 0x6ae   : > { %v6778_v14 = vpop.f32.mrf.mxu1 }
 0x6af   : > { %v6779_v48 = vadd.f32 %v6778_v14, %v6777_v38 }
 0x6b3   : > { %v6742_v24 = vpop.f32.mrf.mxu0 }
 0x6b5   : > { %v6743_v41 = vpop.f32.mrf.mxu0 }
 0x6b6   : > { %v6744_v2 = vadd.f32 %v6743_v41, %v6742_v24 }
 0x6b8   : > { %v5236_v46 = vadd.f32 %v6744_v2, %v5068_v34 }
 0x6ba   : > { %v5340_v47 = vadd.f32 %v6779_v48, %v5236_v46 }
 0x6bc   : > { %v5343_v52 = vmul.f32 0.06666667, %v5340_v47 }
 0x6be   : > { %v5344_v25 = vadd.f32 1e-08, %v5343_v52 }
 0x6c0   : > { %6819 = vrsqrt.f32 %v5344_v25 }
 0x6cd   : > { %v6820_v59 = vpop.eup %6819 }
 0x6ce   : > { %v5347_v9 = vsel %vm1209_vm0, %v6820_v59, 0 }
 0x6cf   : > { %v5418_v16 = vand.u32 4294901760, %v5347_v9 }
 0x6d1   : > { %v5419_v29 = vsub.f32 %v5347_v9, %v5418_v16  ;;  %5515 = vmatmul.mubr.f32.vlgmr.msra.gmra.mxu1 %v5418_v16 }
 0x6d2   : > { %5633 = vmatpush1.msra.mxu1 %v8667_v44  ;;  %5670 = vmatprep.mubr.f32.mxu1 %v9839_v51 }
 0x6d3   : > { %5635 = vmatprep.subr.mxu1 %v8675_v61  ;;  %v5420_v20 = vand.u32 4294901760, %v5419_v29 }
 0x6d4   : > { %5637 = vmatpush1.msra.mxu1 %v8684_v42 }
 0x6d5   : > { %5674 = vmatmul.mubr.f32.vlgmr.msra.gmra.mxu1 %v5420_v20  ;;  %5793 = vmatprep.subr.mxu1 %v8662_v18  ;;  %v5421_v3 = vsub.f32 %v5419_v29, %v5420_v20  ;;  %v9959_v18 = vld [vmem:[#allocation128_spill] sm:$0xff] }
 0x6d6   : > { %5795 = vmatpush1.msra.mxu1 %v8667_v44  ;;  %5832 = vmatprep.mubr.f32.mxu1 %v9839_v51  ;;  %v9960_v44 = vld [vmem:[#allocation12_spill] sm:$0xff] }
 0x6d7   : > { %5797 = vmatprep.subr.mxu1 %v8675_v61  ;;  %v5422_v33 = vand.u32 4294901760, %v5421_v3  ;;  %v9961_v61 = vld [vmem:[#allocation14_spill] sm:$0xff] }
 0x6d8   : > { %5799 = vmatpush1.msra.mxu1 %v8684_v42  ;;  %v9962_v42 = vld [vmem:[#allocation18_spill] sm:$0xff] }
 0x6d9   : > { %5423 = vmatmul.mubr.f32.vlgmr.msra.gmra.mxu0 %v5422_v33  ;;  %5834 = vmatmul.mubr.f32.vlgmr.msra.gmra.mxu1 %v5418_v16 }
 0x6da   : > { %5554 = vmatpush1.msra.mxu0 %v8682_v57  ;;  %5593 = vmatprep.mubr.f32.mxu0 %v9839_v51 }
 0x6db   : > { %5557 = vmatprep.subr.mxu0 %v8691_v56 }
 0x6dc   : > { %5560 = vmatpush1.msra.mxu0 %v8698_v30 }
 0x6dd   : > { %5711 = vmatprep.subr.mxu0 %v9959_v18  ;;  %5596 = vmatmul.mubr.f32.vlgmr.msra.gmra.mxu0 %v5419_v29 }
 0x6de   : > { %5715 = vmatpush1.msra.mxu0 %v9960_v44  ;;  %5756 = vmatprep.mubr.f32.mxu0 %v9839_v51 }
 0x6df   : > { %5719 = vmatprep.subr.mxu0 %v9961_v61 }
 0x6e0   : > { %5723 = vmatpush1.msra.mxu0 %v9962_v42 }
 0x6e1   : > { %5758 = vmatmul.mubr.f32.vlgmr.msra.gmra.mxu0 %v5418_v16 }
 0x791   : > { %v5516_v35 = vpop.f32.mrf.mxu1 }
 0x793   : > { %v5518_v57 = vpop.f32.mrf.mxu1 }
 0x795   : > { %v5675_v22 = vpop.f32.mrf.mxu1 }
 0x797   : > { %v5677_v1 = vpop.f32.mrf.mxu1 }
 0x799   : > { %v5424_v32 = vpop.f32.mrf.mxu0  ;;  %v5835_v51 = vpop.f32.mrf.mxu1 }
 0x79a   : > { %v5517_v56 = vadd.f32 %v5516_v35, %v5424_v32 }
 0x79b   : > { %v5426_v28 = vpop.f32.mrf.mxu0  ;;  %v5837_v13 = vpop.f32.mrf.mxu1 }
 0x79c   : > { %v5519_v63 = vadd.f32 %v5518_v57, %v5426_v28 }
 0x79d   : > { %v5597_v30 = vpop.f32.mrf.mxu0 }
 0x79e   : > { %v5598_v11 = vadd.f32 %v5597_v30, %v5517_v56 }
 0x79f   : > { %v5599_v36 = vpop.f32.mrf.mxu0 }
 0x7a0   : > { %v5600_v23 = vadd.f32 %v5599_v36, %v5519_v63  ;;  %v5676_v12 = vadd.f32 %v5675_v22, %v5598_v11 }
 0x7a1   : > { %v5759_v21 = vpop.f32.mrf.mxu0 }
 0x7a2   : > { %v5760_v27 = vadd.f32 %v5759_v21, %v5676_v12  ;;  %v5678_v50 = vadd.f32 %v5677_v1, %v5600_v23 }
 0x7a3   : > { %v5761_v8 = vpop.f32.mrf.mxu0 }
 0x7a4   : > { %v5762_v39 = vadd.f32 %v5761_v8, %v5678_v50  ;;  %v5836_v60 = vadd.f32 %v5835_v51, %v5760_v27 }
 0x7a6   : > { %v5838_v6 = vadd.f32 %v5837_v13, %v5762_v39 }
 0x7a8   : > { %v5842_v5 = vcombine.low %v5836_v60, %v5838_v6 }
 0x7aa   : > { %v5844_v15 = vmul.f32 %v5842_v5, %v4475_v43 }
 0x7ac   : > { %5845 = vst [vmem:[%s254_s8] sm:$0xff] %v5844_v15 }
 0x7ad PF: > { %s17_s18 = sadd.s32 1, %s6888_s18  }
 0x7ae   : > { %p14_p3 = scmp.ge.s32.totalorder %s17_s18, 4  }
 0x7b0   :  { %16 = sbr.rel (!%p14_p3) target bundleno = 2 (0x2), region = 79 }
 0x7b5   :  { %5867 = vsyncpa [#allocation3], 1 }
 0x7b6   :  { %5869 = vsyncpa [#allocation3 + $0x1], 1 }
 0x7b7   :  { %5870 = vsyncpa [#allocation5], 1 }

</bundles_post_ra>
